<compile_context>
chip_gen: v7x
topology: tpu7x:2x2x1
jax: 0.10.0
libtpu: 0.0.40
codegen_flags: <defaults>
</compile_context>

<pallas_src>
import jax
import jax.numpy as jnp
import numpy as np
from jax.experimental import pallas as pl
from jax.experimental.pallas import tpu as pltpu

NEG_INF = -1e30


# -----------------------------------------------------------------------------
# Kernel A: state (x_context -> LSTM -> attention -> p_gen -> out1) at tile 0,
# then per V-tile: logits = out1 @ Wo2_tile + bo2_tile, staged to HBM, with an
# online running max / sum-exp.  grid = (num_v_tiles,), "arbitrary".
# -----------------------------------------------------------------------------
def _state_stats_kernel(
    # data
    y_emb_ref, c_t1_ref, h0_ref, c0_ref, enc_out_ref, enc_feat_ref, mask_ref,
    # small weights (pre-transposed to (in, out); concat-input layers are split)
    wxc_c_ref, wxc_e_ref, bxc_ref, wih_ref, whh_ref, blstm_ref,
    wdp_h_ref, wdp_c_ref, bdp_ref, wv_ref,
    wpg_ct_ref, wpg_h_ref, wpg_c_ref, wpg_x_ref, bpg_ref,
    wo1_h_ref, wo1_ct_ref, bo1_ref,
    # V-tiled weights
    wo2_ref, bo2_ref,
    # outputs
    h_ref, c_ref, ctx_ref, attn_ref, pgen_ref, attnw_ref, logits_ref, shift_ref,
    # scratch
    out1_sc, pgen_sc, m_sc, l_sc,
):
    f32 = jnp.float32
    H = h0_ref.shape[-1]
    j = pl.program_id(0)

    @pl.when(j == 0)
    def _compute_state():
        # x = x_context(cat(c_t_1, y_emb))      (split matmul == matmul of concat)
        x = (jnp.dot(c_t1_ref[...], wxc_c_ref[...], preferred_element_type=f32)
             + jnp.dot(y_emb_ref[...], wxc_e_ref[...], preferred_element_type=f32)
             + bxc_ref[...])

        # single-step LSTM cell (PyTorch gate order i, f, g, o)
        gates = (jnp.dot(x, wih_ref[...], preferred_element_type=f32)
                 + jnp.dot(h0_ref[...], whh_ref[...], preferred_element_type=f32)
                 + blstm_ref[...])
        i_g = jax.nn.sigmoid(gates[:, 0:H])
        f_g = jax.nn.sigmoid(gates[:, H:2 * H])
        g_g = jnp.tanh(gates[:, 2 * H:3 * H])
        o_g = jax.nn.sigmoid(gates[:, 3 * H:4 * H])
        c_new = f_g * c0_ref[...] + i_g * g_g
        h_new = o_g * jnp.tanh(c_new)

        # attention (mask folded into scores pre-softmax; approx reciprocal)
        dec_fea = (jnp.dot(h_new, wdp_h_ref[...], preferred_element_type=f32)
                   + jnp.dot(c_new, wdp_c_ref[...], preferred_element_type=f32)
                   + bdp_ref[...])                                   # (B, 2H)
        e = jnp.tanh(enc_feat_ref[...] + dec_fea[:, None, :])        # (B, T, 2H)
        scores = jnp.sum(e * wv_ref[...][None, :, :], axis=-1)       # (B, T)
        scores = jnp.where(mask_ref[...] > 0.5, scores, NEG_INF)
        scores = scores - jnp.max(scores, axis=-1, keepdims=True)
        exp_s = jnp.exp(scores)
        attn = exp_s * pl.reciprocal(
            jnp.sum(exp_s, axis=-1, keepdims=True), approx=True)     # (B, T)
        c_t = jnp.einsum('bqt,btn->bqn', attn[:, None, :], enc_out_ref[...],
                         preferred_element_type=f32)[:, 0, :]        # (B, 2H)

        # p_gen on the VPU/XLU (no N=1 MXU dots)
        pgen_logit = (jnp.sum(c_t * wpg_ct_ref[...], axis=-1, keepdims=True)
                      + jnp.sum(h_new * wpg_h_ref[...], axis=-1, keepdims=True)
                      + jnp.sum(c_new * wpg_c_ref[...], axis=-1, keepdims=True)
                      + jnp.sum(x * wpg_x_ref[...], axis=-1, keepdims=True)
                      + bpg_ref[...])
        p_gen = jax.nn.sigmoid(pgen_logit)                           # (B, 1)

        out1 = (jnp.dot(h_new, wo1_h_ref[...], preferred_element_type=f32)
                + jnp.dot(c_t, wo1_ct_ref[...], preferred_element_type=f32)
                + bo1_ref[...])                                      # (B, H)

        h_ref[...] = h_new
        c_ref[...] = c_new
        ctx_ref[...] = c_t
        attn_ref[...] = attn
        pgen_ref[...] = p_gen
        attnw_ref[...] = (1.0 - p_gen) * attn
        out1_sc[...] = out1
        pgen_sc[...] = p_gen
        m_sc[...] = jnp.full_like(m_sc, NEG_INF)
        l_sc[...] = jnp.zeros_like(l_sc)

    # every tile: logits for this V-slab (Wo2 streamed, bf16-capable) + online stats
    wo2 = wo2_ref[...]
    logits = (jnp.dot(out1_sc[...].astype(wo2.dtype), wo2,
                      preferred_element_type=f32)
              + bo2_ref[...])                                        # (B, TV)
    logits_ref[...] = logits
    m_prev = m_sc[...]
    m_new = jnp.maximum(m_prev, jnp.max(logits, axis=-1, keepdims=True))
    l_sc[...] = (l_sc[...] * jnp.exp(m_prev - m_new)
                 + jnp.sum(jnp.exp(logits - m_new), axis=-1, keepdims=True))
    m_sc[...] = m_new

    @pl.when(j == pl.num_programs(0) - 1)
    def _finalize():
        # p_gen * softmax(logits) == exp(logits - shift)
        shift_ref[...] = m_sc[...] + jnp.log(l_sc[...]) - jnp.log(pgen_sc[...])


# -----------------------------------------------------------------------------
# Kernel B: per V-tile, final_dist = p_gen * softmax + pointer scatter.
# grid = (num_v_tiles,), "parallel" (independent tiles -> v7x both cores).
# -----------------------------------------------------------------------------
def _final_dist_kernel(ext_ids_ref, attnw_ref, shift_ref, logits_ref, final_ref):
    f32 = jnp.float32
    tv = final_ref.shape[-1]
    base = pl.program_id(0) * tv

    vocab = jnp.exp(logits_ref[...] - shift_ref[...])                # (B, tv)

    ids = ext_ids_ref[...]                                           # (B, T)
    iota = jax.lax.broadcasted_iota(jnp.int32, (1, 1, tv), 2) + base
    onehot = (ids[:, :, None] == iota).astype(f32)                   # (B, T, tv)
    scatter = jnp.einsum('bqt,btv->bqv', attnw_ref[...][:, None, :], onehot,
                         preferred_element_type=f32)[:, 0, :]        # (B, tv)

    final_ref[...] = vocab + scatter


# -----------------------------------------------------------------------------
# One-time parameter preprocessing (hoisted out of the decode loop).
# -----------------------------------------------------------------------------
def prepare_params(params, *, max_extra_vocab, v_tile=128, wo2_dtype=jnp.float32):
    E = params["emb"].shape[1]
    H = params["Whh"].shape[1]
    V = params["Wo2"].shape[0]
    v_ext_pad = ((V + max_extra_vocab + v_tile - 1) // v_tile) * v_tile

    WxcT = params["Wxc"].T                               # (2H+E, E)
    WdpT = params["Wdp"].T                               # (2H, 2H)
    Wo1T = params["Wo1"].T                               # (3H, H)
    Wpg = params["Wpg"].reshape(-1)                      # (4H+E,)

    wo2t = params["Wo2"].T.astype(wo2_dtype)             # (H, V)
    wo2t_pad = jnp.zeros((H, v_ext_pad), wo2_dtype).at[:, :V].set(wo2t)
    bo2_pad = jnp.full((1, v_ext_pad), NEG_INF,
                       jnp.float32).at[0, :V].set(params["bo2"])

    return dict(
        emb=params["emb"], H=H, E=E, V=V, v_ext_pad=v_ext_pad, v_tile=v_tile,
        wxc_c=WxcT[:2 * H], wxc_e=WxcT[2 * H:], bxc=params["bxc"].reshape(1, E),
        wih=params["Wih"].T, whh=params["Whh"].T,
        blstm=(params["bih"] + params["bhh"]).reshape(1, 4 * H),
        wdp_h=WdpT[:H], wdp_c=WdpT[H:], bdp=params["bdp"].reshape(1, 2 * H),
        wv=params["Wv"].reshape(1, 2 * H),
        wpg_ct=Wpg[:2 * H].reshape(1, 2 * H), wpg_h=Wpg[2 * H:3 * H].reshape(1, H),
        wpg_c=Wpg[3 * H:4 * H].reshape(1, H), wpg_x=Wpg[4 * H:].reshape(1, E),
        bpg=params["bpg"].reshape(1, 1),
        wo1_h=Wo1T[:H], wo1_ct=Wo1T[H:], bo1=params["bo1"].reshape(1, H),
        wo2t=wo2t_pad, bo2=bo2_pad,
    )


# -----------------------------------------------------------------------------
# Decode-step wrapper (only glue here: embedding gather, batch pad, slicing).
# -----------------------------------------------------------------------------
def final_decoder_step(y_t_1, s_t_1, encoder_outputs, encoder_feature,
                       enc_padding_mask, c_t_1, extra_zeros,
                       enc_batch_extend_vocab, coverage, step, int_t_1, prep):
    B, T, n2h = encoder_outputs.shape
    H, E, V = prep["H"], prep["E"], prep["V"]
    tv, v_ext_pad = prep["v_tile"], prep["v_ext_pad"]
    nvt = v_ext_pad // tv
    n_extra = 0 if extra_zeros is None else extra_zeros.shape[1]
    v_ext = V + n_extra

    # glue: embedding gather + batch padding to a sublane multiple of 8
    y_emb = prep["emb"][y_t_1]
    h0 = s_t_1[0].reshape(B, H)
    c0 = s_t_1[1].reshape(B, H)
    enc_feat = encoder_feature.reshape(B, T, n2h)
    mask = enc_padding_mask.astype(jnp.float32)
    ext_ids = enc_batch_extend_vocab.astype(jnp.int32)

    bp = (-B) % 8

    def padb(a):
        return jnp.pad(a, ((0, bp),) + ((0, 0),) * (a.ndim - 1)) if bp else a

    y_emb, c_t1_p, h0, c0 = map(padb, (y_emb, c_t_1, h0, c0))
    enc_out_p, enc_feat, mask, ext_ids = map(
        padb, (encoder_outputs, enc_feat, mask, ext_ids))
    Bp = B + bp

    def full(a):
        return pl.BlockSpec(a.shape, lambda j, _nd=a.ndim: (0,) * _nd)

    data = (y_emb, c_t1_p, h0, c0, enc_out_p, enc_feat, mask)
    small_w = (prep["wxc_c"], prep["wxc_e"], prep["bxc"], prep["wih"],
               prep["whh"], prep["blstm"], prep["wdp_h"], prep["wdp_c"],
               prep["bdp"], prep["wv"], prep["wpg_ct"], prep["wpg_h"],
               prep["wpg_c"], prep["wpg_x"], prep["bpg"], prep["wo1_h"],
               prep["wo1_ct"], prep["bo1"])

    a_in_specs = ([full(a) for a in data] + [full(w) for w in small_w]
                  + [pl.BlockSpec((H, tv), lambda j: (0, j)),
                     pl.BlockSpec((1, tv), lambda j: (0, j))])
    a_out_shape = (
        jax.ShapeDtypeStruct((Bp, H), jnp.float32),          # h
        jax.ShapeDtypeStruct((Bp, H), jnp.float32),          # c (cell)
        jax.ShapeDtypeStruct((Bp, 2 * H), jnp.float32),      # c_t (context)
        jax.ShapeDtypeStruct((Bp, T), jnp.float32),          # attn_dist
        jax.ShapeDtypeStruct((Bp, 1), jnp.float32),          # p_gen
        jax.ShapeDtypeStruct((Bp, T), jnp.float32),          # (1-p_gen)*attn
        jax.ShapeDtypeStruct((Bp, v_ext_pad), jnp.float32),  # staged logits
        jax.ShapeDtypeStruct((Bp, 1), jnp.float32),          # softmax shift
    )
    a_out_specs = (
        pl.BlockSpec((Bp, H), lambda j: (0, 0)),
        pl.BlockSpec((Bp, H), lambda j: (0, 0)),
        pl.BlockSpec((Bp, 2 * H), lambda j: (0, 0)),
        pl.BlockSpec((Bp, T), lambda j: (0, 0)),
        pl.BlockSpec((Bp, 1), lambda j: (0, 0)),
        pl.BlockSpec((Bp, T), lambda j: (0, 0)),
        pl.BlockSpec((Bp, tv), lambda j: (0, j)),
        pl.BlockSpec((Bp, 1), lambda j: (0, 0)),
    )

    h_new, c_new, ctx, attn, p_gen, attn_w, logits, shift = pl.pallas_call(
        _state_stats_kernel,
        grid=(nvt,),
        in_specs=a_in_specs,
        out_specs=a_out_specs,
        out_shape=a_out_shape,
        scratch_shapes=[pltpu.VMEM((Bp, H), jnp.float32),    # out1
                        pltpu.VMEM((Bp, 1), jnp.float32),    # p_gen
                        pltpu.VMEM((Bp, 1), jnp.float32),    # running max
                        pltpu.VMEM((Bp, 1), jnp.float32)],   # running sum
        compiler_params=pltpu.CompilerParams(
            dimension_semantics=("arbitrary",),
            vmem_limit_bytes=32 * 1024 * 1024),
    )(*data, *small_w, prep["wo2t"], prep["bo2"])

    final_pad = pl.pallas_call(
        _final_dist_kernel,
        grid=(nvt,),
        in_specs=[full(ext_ids), full(attn_w), full(shift),
                  pl.BlockSpec((Bp, tv), lambda j: (0, j))],
        out_specs=pl.BlockSpec((Bp, tv), lambda j: (0, j)),
        out_shape=jax.ShapeDtypeStruct((Bp, v_ext_pad), jnp.float32),
        compiler_params=pltpu.CompilerParams(
            dimension_semantics=("parallel",),
            vmem_limit_bytes=32 * 1024 * 1024),
    )(ext_ids, attn_w, shift, logits)

    final_dist = final_pad[:B, :v_ext]
    h_new, c_new, ctx = h_new[:B], c_new[:B], ctx[:B]
    attn, p_gen = attn[:B], p_gen[:B]
    s_t = (h_new.reshape(1, B, H), c_new.reshape(1, B, H))
    return (final_dist, s_t, ctx, attn, p_gen, coverage,
            h_new[:, None, :], int_t_1)


# -----------------------------------------------------------------------------
# Pure-JAX reference (mirrors the PyTorch forward, full f32).
# -----------------------------------------------------------------------------
def reference_step(y_t_1, s_t_1, enc_out, enc_feat_flat, mask, c_t_1,
                   extra_zeros, ext_ids, p):
    B, T, n = enc_out.shape
    H = n // 2
    y_emb = p["emb"][y_t_1]
    h0 = s_t_1[0].reshape(B, H)
    c0 = s_t_1[1].reshape(B, H)
    x = jnp.concatenate([c_t_1, y_emb], 1) @ p["Wxc"].T + p["bxc"]
    gates = x @ p["Wih"].T + p["bih"] + h0 @ p["Whh"].T + p["bhh"]
    i = jax.nn.sigmoid(gates[:, :H]); f = jax.nn.sigmoid(gates[:, H:2 * H])
    g = jnp.tanh(gates[:, 2 * H:3 * H]); o = jax.nn.sigmoid(gates[:, 3 * H:])
    c_new = f * c0 + i * g
    h_new = o * jnp.tanh(c_new)
    s_hat = jnp.concatenate([h_new, c_new], 1)
    dec_fea = s_hat @ p["Wdp"].T + p["bdp"]
    e = jnp.tanh(enc_feat_flat.reshape(B, T, n) + dec_fea[:, None, :])
    scores = (e.reshape(-1, n) @ p["Wv"].T).reshape(B, T)
    attn_ = jax.nn.softmax(scores, axis=1) * mask.astype(jnp.float32)
    attn = attn_ / jnp.sum(attn_, 1, keepdims=True)
    c_t = jnp.einsum("bt,btn->bn", attn, enc_out)
    p_gen = jax.nn.sigmoid(
        jnp.concatenate([c_t, s_hat, x], 1) @ p["Wpg"].T + p["bpg"])
    out = jnp.concatenate([h_new, c_t], 1) @ p["Wo1"].T + p["bo1"]
    logits = out @ p["Wo2"].T + p["bo2"]
    vocab = jax.nn.softmax(logits, axis=1)
    vocab_ = p_gen * vocab
    attn_w = (1 - p_gen) * attn
    vocab_ext = jnp.concatenate([vocab_, extra_zeros], 1)
    final = vocab_ext.at[jnp.arange(B)[:, None], ext_ids].add(attn_w)
    return final, h_new, c_new, c_t, attn, p_gen


# -----------------------------------------------------------------------------
if __name__ == "__main__":
    B, T, E, H, V, NEX = 2, 16, 32, 32, 300, 20
    key = jax.random.PRNGKey(0)
    ks = jax.random.split(key, 24)
    std, mag = 1e-1, 0.02

    params = {
        "emb": jax.random.normal(ks[0], (V, E), jnp.float32) * std,
        "Wxc": jax.random.normal(ks[1], (E, 2 * H + E), jnp.float32) * std,
        "bxc": jax.random.normal(ks[2], (E,), jnp.float32) * std,
        "Wih": jax.random.uniform(ks[3], (4 * H, E), jnp.float32, -mag, mag),
        "Whh": jax.random.uniform(ks[4], (4 * H, H), jnp.float32, -mag, mag),
        "bih": jnp.zeros((4 * H,), jnp.float32).at[H:2 * H].set(1.0),
        "bhh": jnp.zeros((4 * H,), jnp.float32).at[H:2 * H].set(1.0),
        "Wdp": jax.random.normal(ks[5], (2 * H, 2 * H), jnp.float32) * std,
        "bdp": jax.random.normal(ks[6], (2 * H,), jnp.float32) * std,
        "Wv": jax.random.normal(ks[7], (1, 2 * H), jnp.float32) * std,
        "Wpg": jax.random.normal(ks[8], (1, 4 * H + E), jnp.float32) * std,
        "bpg": jax.random.normal(ks[9], (1,), jnp.float32) * std,
        "Wo1": jax.random.normal(ks[10], (H, 3 * H), jnp.float32) * std,
        "bo1": jax.random.normal(ks[11], (H,), jnp.float32) * std,
        "Wo2": jax.random.normal(ks[12], (V, H), jnp.float32) * std,
        "bo2": jax.random.normal(ks[13], (V,), jnp.float32) * std,
    }

    y_t_1 = jax.random.randint(ks[14], (B,), 0, V)
    h0 = jax.random.normal(ks[15], (1, B, H), jnp.float32)
    c0 = jax.random.normal(ks[16], (1, B, H), jnp.float32)
    s_t_1 = (h0, c0)
    encoder_outputs = jax.random.normal(ks[17], (B, T, 2 * H), jnp.float32)
    encoder_feature = jax.random.normal(ks[18], (B * T, 2 * H), jnp.float32)
    lens = jnp.array([T, T - 3])
    enc_padding_mask = (jnp.arange(T)[None, :] < lens[:, None]).astype(jnp.float32)
    c_t_1 = jax.random.normal(ks[19], (B, 2 * H), jnp.float32)
    extra_zeros = jnp.zeros((B, NEX), jnp.float32)
    enc_batch_extend_vocab = jax.random.randint(ks[20], (B, T), 0, V + NEX)
    coverage = None                     # config.is_coverage = False
    step, int_t_1 = 1, jnp.zeros((B, H), jnp.float32)

    # one-time weight prep (bf16 Wo2 -> 2x MXU / half DMA on v6e/v7x)
    prep = prepare_params(params, max_extra_vocab=NEX, v_tile=128,
                          wo2_dtype=jnp.bfloat16)

    outs = final_decoder_step(
        y_t_1, s_t_1, encoder_outputs, encoder_feature, enc_padding_mask,
        c_t_1, extra_zeros, enc_batch_extend_vocab, coverage, step, int_t_1,
        prep)
    outs = jax.block_until_ready(outs)
    final_dist, s_t, ctx, attn_dist, p_gen, cov, h_dec, _ = outs

    ref = reference_step(y_t_1, s_t_1, encoder_outputs, encoder_feature,
                         enc_padding_mask, c_t_1, extra_zeros,
                         enc_batch_extend_vocab, params)
    ref_final, ref_h, ref_c, ref_ctx, ref_attn, ref_pgen = ref

    # tolerances: h/c are exact f32; attention/ctx/p_gen use approx reciprocal;
    # final_dist additionally carries bf16 Wo2 quantization (kept f32-accumulated).
    checks = [
        (s_t[0].reshape(B, H), ref_h, 2e-4, 2e-6),
        (s_t[1].reshape(B, H), ref_c, 2e-4, 2e-6),
        (ctx, ref_ctx, 1e-2, 1e-5),
        (attn_dist, ref_attn, 1e-2, 1e-6),
        (p_gen, ref_pgen, 1e-2, 1e-6),
        (final_dist, ref_final, 1e-2, 1e-4),
    ]
    for got, want, rt, at in checks:
        np.testing.assert_allclose(np.asarray(got), np.asarray(want),
                                   rtol=rt, atol=at)
    # final_dist is a proper distribution over the extended vocab
    np.testing.assert_allclose(np.asarray(final_dist).sum(-1),
                               np.ones((B,)), rtol=2e-3, atol=2e-3)
    print("KERNEL_OK")
</pallas_src>

<mosaic_0001>
module attributes {stable_mosaic.version = 11 : i64} {
  func.func @_state_stats_kernel(%arg0: i32, %arg1: memref<8x32xf32, #tpu.memory_space<vmem>>, %arg2: memref<8x64xf32, #tpu.memory_space<vmem>>, %arg3: memref<8x32xf32, #tpu.memory_space<vmem>>, %arg4: memref<8x32xf32, #tpu.memory_space<vmem>>, %arg5: memref<8x16x64xf32, #tpu.memory_space<vmem>>, %arg6: memref<8x16x64xf32, #tpu.memory_space<vmem>>, %arg7: memref<8x16xf32, #tpu.memory_space<vmem>>, %arg8: memref<64x32xf32, #tpu.memory_space<vmem>>, %arg9: memref<32x32xf32, #tpu.memory_space<vmem>>, %arg10: memref<1x32xf32, #tpu.memory_space<vmem>>, %arg11: memref<32x128xf32, #tpu.memory_space<vmem>>, %arg12: memref<32x128xf32, #tpu.memory_space<vmem>>, %arg13: memref<1x128xf32, #tpu.memory_space<vmem>>, %arg14: memref<32x64xf32, #tpu.memory_space<vmem>>, %arg15: memref<32x64xf32, #tpu.memory_space<vmem>>, %arg16: memref<1x64xf32, #tpu.memory_space<vmem>>, %arg17: memref<1x64xf32, #tpu.memory_space<vmem>>, %arg18: memref<1x64xf32, #tpu.memory_space<vmem>>, %arg19: memref<1x32xf32, #tpu.memory_space<vmem>>, %arg20: memref<1x32xf32, #tpu.memory_space<vmem>>, %arg21: memref<1x32xf32, #tpu.memory_space<vmem>>, %arg22: memref<1x1xf32, #tpu.memory_space<vmem>>, %arg23: memref<32x32xf32, #tpu.memory_space<vmem>>, %arg24: memref<64x32xf32, #tpu.memory_space<vmem>>, %arg25: memref<1x32xf32, #tpu.memory_space<vmem>>, %arg26: memref<32x128xbf16, #tpu.memory_space<vmem>>, %arg27: memref<1x128xf32, #tpu.memory_space<vmem>>, %arg28: memref<8x32xf32, #tpu.memory_space<vmem>>, %arg29: memref<8x32xf32, #tpu.memory_space<vmem>>, %arg30: memref<8x64xf32, #tpu.memory_space<vmem>>, %arg31: memref<8x16xf32, #tpu.memory_space<vmem>>, %arg32: memref<8x1xf32, #tpu.memory_space<vmem>>, %arg33: memref<8x16xf32, #tpu.memory_space<vmem>>, %arg34: memref<8x128xf32, #tpu.memory_space<vmem>>, %arg35: memref<8x1xf32, #tpu.memory_space<vmem>>, %arg36: memref<8x32xf32, #tpu.memory_space<vmem>>, %arg37: memref<8x1xf32, #tpu.memory_space<vmem>>, %arg38: memref<8x1xf32, #tpu.memory_space<vmem>>, %arg39: memref<8x1xf32, #tpu.memory_space<vmem>>) attributes {dimension_semantics = [#tpu.dimension_semantics<arbitrary>], iteration_bounds = array<i64: 3>, scalar_prefetch = 0 : i64, scratch_operands = 4 : i64, tpu.core_type = #tpu.core_type<tc>, window_params = [{pipeline_mode = #tpu.pipeline_mode<synchronous>, transform_indices = @transform_0, window_bounds = array<i64: 8, 32>}, {pipeline_mode = #tpu.pipeline_mode<synchronous>, transform_indices = @transform_1, window_bounds = array<i64: 8, 64>}, {pipeline_mode = #tpu.pipeline_mode<synchronous>, transform_indices = @transform_2, window_bounds = array<i64: 8, 32>}, {pipeline_mode = #tpu.pipeline_mode<synchronous>, transform_indices = @transform_3, window_bounds = array<i64: 8, 32>}, {pipeline_mode = #tpu.pipeline_mode<synchronous>, transform_indices = @transform_4, window_bounds = array<i64: 8, 16, 64>}, {pipeline_mode = #tpu.pipeline_mode<synchronous>, transform_indices = @transform_5, window_bounds = array<i64: 8, 16, 64>}, {pipeline_mode = #tpu.pipeline_mode<synchronous>, transform_indices = @transform_6, window_bounds = array<i64: 8, 16>}, {pipeline_mode = #tpu.pipeline_mode<synchronous>, transform_indices = @transform_7, window_bounds = array<i64: 64, 32>}, {pipeline_mode = #tpu.pipeline_mode<synchronous>, transform_indices = @transform_8, window_bounds = array<i64: 32, 32>}, {pipeline_mode = #tpu.pipeline_mode<synchronous>, transform_indices = @transform_9, window_bounds = array<i64: 1, 32>}, {pipeline_mode = #tpu.pipeline_mode<synchronous>, transform_indices = @transform_10, window_bounds = array<i64: 32, 128>}, {pipeline_mode = #tpu.pipeline_mode<synchronous>, transform_indices = @transform_11, window_bounds = array<i64: 32, 128>}, {pipeline_mode = #tpu.pipeline_mode<synchronous>, transform_indices = @transform_12, window_bounds = array<i64: 1, 128>}, {pipeline_mode = #tpu.pipeline_mode<synchronous>, transform_indices = @transform_13, window_bounds = array<i64: 32, 64>}, {pipeline_mode = #tpu.pipeline_mode<synchronous>, transform_indices = @transform_14, window_bounds = array<i64: 32, 64>}, {pipeline_mode = #tpu.pipeline_mode<synchronous>, transform_indices = @transform_15, window_bounds = array<i64: 1, 64>}, {pipeline_mode = #tpu.pipeline_mode<synchronous>, transform_indices = @transform_16, window_bounds = array<i64: 1, 64>}, {pipeline_mode = #tpu.pipeline_mode<synchronous>, transform_indices = @transform_17, window_bounds = array<i64: 1, 64>}, {pipeline_mode = #tpu.pipeline_mode<synchronous>, transform_indices = @transform_18, window_bounds = array<i64: 1, 32>}, {pipeline_mode = #tpu.pipeline_mode<synchronous>, transform_indices = @transform_19, window_bounds = array<i64: 1, 32>}, {pipeline_mode = #tpu.pipeline_mode<synchronous>, transform_indices = @transform_20, window_bounds = array<i64: 1, 32>}, {pipeline_mode = #tpu.pipeline_mode<synchronous>, transform_indices = @transform_21, window_bounds = array<i64: 1, 1>}, {pipeline_mode = #tpu.pipeline_mode<synchronous>, transform_indices = @transform_22, window_bounds = array<i64: 32, 32>}, {pipeline_mode = #tpu.pipeline_mode<synchronous>, transform_indices = @transform_23, window_bounds = array<i64: 64, 32>}, {pipeline_mode = #tpu.pipeline_mode<synchronous>, transform_indices = @transform_24, window_bounds = array<i64: 1, 32>}, {transform_indices = @transform_25, window_bounds = array<i64: 32, 128>}, {transform_indices = @transform_26, window_bounds = array<i64: 1, 128>}, {pipeline_mode = #tpu.pipeline_mode<synchronous>, transform_indices = @transform_27, window_bounds = array<i64: 8, 32>}, {pipeline_mode = #tpu.pipeline_mode<synchronous>, transform_indices = @transform_28, window_bounds = array<i64: 8, 32>}, {pipeline_mode = #tpu.pipeline_mode<synchronous>, transform_indices = @transform_29, window_bounds = array<i64: 8, 64>}, {pipeline_mode = #tpu.pipeline_mode<synchronous>, transform_indices = @transform_30, window_bounds = array<i64: 8, 16>}, {pipeline_mode = #tpu.pipeline_mode<synchronous>, transform_indices = @transform_31, window_bounds = array<i64: 8, 1>}, {pipeline_mode = #tpu.pipeline_mode<synchronous>, transform_indices = @transform_32, window_bounds = array<i64: 8, 16>}, {transform_indices = @transform_33, window_bounds = array<i64: 8, 128>}, {pipeline_mode = #tpu.pipeline_mode<synchronous>, transform_indices = @transform_34, window_bounds = array<i64: 8, 1>}]} {
    %c0_i32 = arith.constant 0 : i32
    %0 = arith.cmpi eq, %arg0, %c0_i32 : i32
    %1 = arith.extui %0 : i1 to i32
    %c0_i32_0 = arith.constant 0 : i32
    %2 = arith.cmpi ne, %1, %c0_i32_0 : i32
    scf.if %2 {
      %c0_19 = arith.constant 0 : index
      %c0_20 = arith.constant 0 : index
      %30 = vector.load %arg2[%c0_19, %c0_20] : memref<8x64xf32, #tpu.memory_space<vmem>>, vector<8x64xf32>
      %c0_21 = arith.constant 0 : index
      %c0_22 = arith.constant 0 : index
      %31 = vector.load %arg8[%c0_21, %c0_22] : memref<64x32xf32, #tpu.memory_space<vmem>>, vector<64x32xf32>
      %cst_23 = arith.constant dense<0.000000e+00> : vector<8x32xf32>
      %32 = tpu.matmul %30, %31, %cst_23 {dimension_numbers = #tpu.dot_dimension_numbers<[1], [0], [0], [1], [0, 0, 1, 1], [], []>} : vector<8x64xf32>, vector<64x32xf32>, vector<8x32xf32> -> vector<8x32xf32>
      %c0_24 = arith.constant 0 : index
      %c0_25 = arith.constant 0 : index
      %33 = vector.load %arg1[%c0_24, %c0_25] : memref<8x32xf32, #tpu.memory_space<vmem>>, vector<8x32xf32>
      %c0_26 = arith.constant 0 : index
      %c0_27 = arith.constant 0 : index
      %34 = vector.load %arg9[%c0_26, %c0_27] : memref<32x32xf32, #tpu.memory_space<vmem>>, vector<32x32xf32>
      %cst_28 = arith.constant dense<0.000000e+00> : vector<8x32xf32>
      %35 = tpu.matmul %33, %34, %cst_28 {dimension_numbers = #tpu.dot_dimension_numbers<[1], [0], [0], [1], [0, 0, 1, 1], [], []>} : vector<8x32xf32>, vector<32x32xf32>, vector<8x32xf32> -> vector<8x32xf32>
      %36 = arith.addf %32, %35 : vector<8x32xf32>
      %c0_29 = arith.constant 0 : index
      %c0_30 = arith.constant 0 : index
      %37 = vector.load %arg10[%c0_29, %c0_30] : memref<1x32xf32, #tpu.memory_space<vmem>>, vector<1x32xf32>
      %38 = vector.broadcast %37 : vector<1x32xf32> to vector<8x32xf32>
      %39 = arith.addf %36, %38 : vector<8x32xf32>
      %c0_31 = arith.constant 0 : index
      %c0_32 = arith.constant 0 : index
      %40 = vector.load %arg11[%c0_31, %c0_32] : memref<32x128xf32, #tpu.memory_space<vmem>>, vector<32x128xf32>
      %cst_33 = arith.constant dense<0.000000e+00> : vector<8x128xf32>
      %41 = tpu.matmul %39, %40, %cst_33 {dimension_numbers = #tpu.dot_dimension_numbers<[1], [0], [0], [1], [0, 0, 1, 1], [], []>} : vector<8x32xf32>, vector<32x128xf32>, vector<8x128xf32> -> vector<8x128xf32>
      %c0_34 = arith.constant 0 : index
      %c0_35 = arith.constant 0 : index
      %42 = vector.load %arg3[%c0_34, %c0_35] : memref<8x32xf32, #tpu.memory_space<vmem>>, vector<8x32xf32>
      %c0_36 = arith.constant 0 : index
      %c0_37 = arith.constant 0 : index
      %43 = vector.load %arg12[%c0_36, %c0_37] : memref<32x128xf32, #tpu.memory_space<vmem>>, vector<32x128xf32>
      %cst_38 = arith.constant dense<0.000000e+00> : vector<8x128xf32>
      %44 = tpu.matmul %42, %43, %cst_38 {dimension_numbers = #tpu.dot_dimension_numbers<[1], [0], [0], [1], [0, 0, 1, 1], [], []>} : vector<8x32xf32>, vector<32x128xf32>, vector<8x128xf32> -> vector<8x128xf32>
      %45 = arith.addf %41, %44 : vector<8x128xf32>
      %c0_39 = arith.constant 0 : index
      %c0_40 = arith.constant 0 : index
      %46 = vector.load %arg13[%c0_39, %c0_40] : memref<1x128xf32, #tpu.memory_space<vmem>>, vector<1x128xf32>
      %47 = vector.broadcast %46 : vector<1x128xf32> to vector<8x128xf32>
      %48 = arith.addf %45, %47 : vector<8x128xf32>
      %49 = vector.extract_strided_slice %48 {offsets = [0, 0], sizes = [8, 32], strides = [1, 1]} : vector<8x128xf32> to vector<8x32xf32>
      %50 = arith.negf %49 : vector<8x32xf32>
      %51 = math.exp %50 : vector<8x32xf32>
      %cst_41 = arith.constant 1.000000e+00 : f32
      %52 = vector.broadcast %cst_41 : f32 to vector<8x32xf32>
      %53 = arith.addf %52, %51 : vector<8x32xf32>
      %54 = arith.divf %52, %53 : vector<8x32xf32>
      %55 = vector.extract_strided_slice %48 {offsets = [0, 32], sizes = [8, 32], strides = [1, 1]} : vector<8x128xf32> to vector<8x32xf32>
      %56 = arith.negf %55 : vector<8x32xf32>
      %57 = math.exp %56 : vector<8x32xf32>
      %cst_42 = arith.constant 1.000000e+00 : f32
      %58 = vector.broadcast %cst_42 : f32 to vector<8x32xf32>
      %59 = arith.addf %58, %57 : vector<8x32xf32>
      %60 = arith.divf %58, %59 : vector<8x32xf32>
      %61 = vector.extract_strided_slice %48 {offsets = [0, 64], sizes = [8, 32], strides = [1, 1]} : vector<8x128xf32> to vector<8x32xf32>
      %62 = math.tanh %61 : vector<8x32xf32>
      %63 = vector.extract_strided_slice %48 {offsets = [0, 96], sizes = [8, 32], strides = [1, 1]} : vector<8x128xf32> to vector<8x32xf32>
      %64 = arith.negf %63 : vector<8x32xf32>
      %65 = math.exp %64 : vector<8x32xf32>
      %cst_43 = arith.constant 1.000000e+00 : f32
      %66 = vector.broadcast %cst_43 : f32 to vector<8x32xf32>
      %67 = arith.addf %66, %65 : vector<8x32xf32>
      %68 = arith.divf %66, %67 : vector<8x32xf32>
      %c0_44 = arith.constant 0 : index
      %c0_45 = arith.constant 0 : index
      %69 = vector.load %arg4[%c0_44, %c0_45] : memref<8x32xf32, #tpu.memory_space<vmem>>, vector<8x32xf32>
      %70 = arith.mulf %60, %69 : vector<8x32xf32>
      %71 = arith.mulf %54, %62 : vector<8x32xf32>
      %72 = arith.addf %70, %71 : vector<8x32xf32>
      %73 = math.tanh %72 : vector<8x32xf32>
      %74 = arith.mulf %68, %73 : vector<8x32xf32>
      %c0_46 = arith.constant 0 : index
      %c0_47 = arith.constant 0 : index
      %75 = vector.load %arg14[%c0_46, %c0_47] : memref<32x64xf32, #tpu.memory_space<vmem>>, vector<32x64xf32>
      %cst_48 = arith.constant dense<0.000000e+00> : vector<8x64xf32>
      %76 = tpu.matmul %74, %75, %cst_48 {dimension_numbers = #tpu.dot_dimension_numbers<[1], [0], [0], [1], [0, 0, 1, 1], [], []>} : vector<8x32xf32>, vector<32x64xf32>, vector<8x64xf32> -> vector<8x64xf32>
      %c0_49 = arith.constant 0 : index
      %c0_50 = arith.constant 0 : index
      %77 = vector.load %arg15[%c0_49, %c0_50] : memref<32x64xf32, #tpu.memory_space<vmem>>, vector<32x64xf32>
      %cst_51 = arith.constant dense<0.000000e+00> : vector<8x64xf32>
      %78 = tpu.matmul %72, %77, %cst_51 {dimension_numbers = #tpu.dot_dimension_numbers<[1], [0], [0], [1], [0, 0, 1, 1], [], []>} : vector<8x32xf32>, vector<32x64xf32>, vector<8x64xf32> -> vector<8x64xf32>
      %79 = arith.addf %76, %78 : vector<8x64xf32>
      %c0_52 = arith.constant 0 : index
      %c0_53 = arith.constant 0 : index
      %80 = vector.load %arg16[%c0_52, %c0_53] : memref<1x64xf32, #tpu.memory_space<vmem>>, vector<1x64xf32>
      %81 = vector.broadcast %80 : vector<1x64xf32> to vector<8x64xf32>
      %82 = arith.addf %79, %81 : vector<8x64xf32>
      %c0_54 = arith.constant 0 : index
      %c0_55 = arith.constant 0 : index
      %c0_56 = arith.constant 0 : index
      %83 = vector.load %arg6[%c0_54, %c0_55, %c0_56] : memref<8x16x64xf32, #tpu.memory_space<vmem>>, vector<8x16x64xf32>
      %84 = vector.shape_cast %82 : vector<8x64xf32> to vector<8x1x64xf32>
      %85 = vector.broadcast %84 : vector<8x1x64xf32> to vector<8x16x64xf32>
      %86 = arith.addf %83, %85 : vector<8x16x64xf32>
      %87 = math.tanh %86 : vector<8x16x64xf32>
      %c0_57 = arith.constant 0 : index
      %c0_58 = arith.constant 0 : index
      %88 = vector.load %arg17[%c0_57, %c0_58] : memref<1x64xf32, #tpu.memory_space<vmem>>, vector<1x64xf32>
      %89 = vector.shape_cast %88 : vector<1x64xf32> to vector<1x1x64xf32>
      %90 = vector.broadcast %89 : vector<1x1x64xf32> to vector<8x16x64xf32>
      %91 = arith.mulf %87, %90 : vector<8x16x64xf32>
      %cst_59 = arith.constant dense<0.000000e+00> : vector<8x16xf32>
      %92 = vector.multi_reduction <add>, %91, %cst_59 [2] : vector<8x16x64xf32> to vector<8x16xf32>
      %c0_60 = arith.constant 0 : index
      %c0_61 = arith.constant 0 : index
      %93 = vector.load %arg7[%c0_60, %c0_61] : memref<8x16xf32, #tpu.memory_space<vmem>>, vector<8x16xf32>
      %cst_62 = arith.constant 5.000000e-01 : f32
      %94 = vector.broadcast %cst_62 : f32 to vector<8x16xf32>
      %95 = arith.cmpf ogt, %93, %94 : vector<8x16xf32>
      %cst_63 = arith.constant -1.000000e+30 : f32
      %96 = vector.broadcast %cst_63 : f32 to vector<8x16xf32>
      %97 = arith.select %95, %92, %96 : vector<8x16xi1>, vector<8x16xf32>
      %cst_64 = arith.constant dense<0xFF800000> : vector<8xf32>
      %98 = vector.multi_reduction <maximumf>, %97, %cst_64 [1] : vector<8x16xf32> to vector<8xf32>
      %99 = vector.shape_cast %98 : vector<8xf32> to vector<8x1xf32>
      %100 = vector.broadcast %99 : vector<8x1xf32> to vector<8x16xf32>
      %101 = arith.subf %97, %100 : vector<8x16xf32>
      %102 = math.exp %101 : vector<8x16xf32>
      %cst_65 = arith.constant dense<0.000000e+00> : vector<8xf32>
      %103 = vector.multi_reduction <add>, %102, %cst_65 [1] : vector<8x16xf32> to vector<8xf32>
      %104 = vector.shape_cast %103 : vector<8xf32> to vector<8x1xf32>
      %105 = tpu.reciprocal %104 {approx = true} : vector<8x1xf32> -> vector<8x1xf32>
      %106 = vector.broadcast %105 : vector<8x1xf32> to vector<8x16xf32>
      %107 = arith.mulf %102, %106 : vector<8x16xf32>
      %108 = vector.shape_cast %107 : vector<8x16xf32> to vector<8x1x16xf32>
      %c0_66 = arith.constant 0 : index
      %c0_67 = arith.constant 0 : index
      %c0_68 = arith.constant 0 : index
      %109 = vector.load %arg5[%c0_66, %c0_67, %c0_68] : memref<8x16x64xf32, #tpu.memory_space<vmem>>, vector<8x16x64xf32>
      "tpu.trace_start"() <{level = 10 : i32, message = "bqt,btn->bqn"}> : () -> ()
      %cst_69 = arith.constant dense<0.000000e+00> : vector<8x1x64xf32>
      %110 = tpu.matmul %108, %109, %cst_69 {dimension_numbers = #tpu.dot_dimension_numbers<[2], [1], [1], [2], [0, 0, 0, 1, 1, 2], [0], [0]>} : vector<8x1x16xf32>, vector<8x16x64xf32>, vector<8x1x64xf32> -> vector<8x1x64xf32>
      "tpu.trace_stop"() : () -> ()
      %111 = vector.shape_cast %110 : vector<8x1x64xf32> to vector<8x64xf32>
      %c0_70 = arith.constant 0 : index
      %c0_71 = arith.constant 0 : index
      %112 = vector.load %arg18[%c0_70, %c0_71] : memref<1x64xf32, #tpu.memory_space<vmem>>, vector<1x64xf32>
      %113 = vector.broadcast %112 : vector<1x64xf32> to vector<8x64xf32>
      %114 = arith.mulf %111, %113 : vector<8x64xf32>
      %cst_72 = arith.constant dense<0.000000e+00> : vector<8xf32>
      %115 = vector.multi_reduction <add>, %114, %cst_72 [1] : vector<8x64xf32> to vector<8xf32>
      %116 = vector.shape_cast %115 : vector<8xf32> to vector<8x1xf32>
      %c0_73 = arith.constant 0 : index
      %c0_74 = arith.constant 0 : index
      %117 = vector.load %arg19[%c0_73, %c0_74] : memref<1x32xf32, #tpu.memory_space<vmem>>, vector<1x32xf32>
      %118 = vector.broadcast %117 : vector<1x32xf32> to vector<8x32xf32>
      %119 = arith.mulf %74, %118 : vector<8x32xf32>
      %cst_75 = arith.constant dense<0.000000e+00> : vector<8xf32>
      %120 = vector.multi_reduction <add>, %119, %cst_75 [1] : vector<8x32xf32> to vector<8xf32>
      %121 = vector.shape_cast %120 : vector<8xf32> to vector<8x1xf32>
      %122 = arith.addf %116, %121 : vector<8x1xf32>
      %c0_76 = arith.constant 0 : index
      %c0_77 = arith.constant 0 : index
      %123 = vector.load %arg20[%c0_76, %c0_77] : memref<1x32xf32, #tpu.memory_space<vmem>>, vector<1x32xf32>
      %124 = vector.broadcast %123 : vector<1x32xf32> to vector<8x32xf32>
      %125 = arith.mulf %72, %124 : vector<8x32xf32>
      %cst_78 = arith.constant dense<0.000000e+00> : vector<8xf32>
      %126 = vector.multi_reduction <add>, %125, %cst_78 [1] : vector<8x32xf32> to vector<8xf32>
      %127 = vector.shape_cast %126 : vector<8xf32> to vector<8x1xf32>
      %128 = arith.addf %122, %127 : vector<8x1xf32>
      %c0_79 = arith.constant 0 : index
      %c0_80 = arith.constant 0 : index
      %129 = vector.load %arg21[%c0_79, %c0_80] : memref<1x32xf32, #tpu.memory_space<vmem>>, vector<1x32xf32>
      %130 = vector.broadcast %129 : vector<1x32xf32> to vector<8x32xf32>
      %131 = arith.mulf %39, %130 : vector<8x32xf32>
      %cst_81 = arith.constant dense<0.000000e+00> : vector<8xf32>
      %132 = vector.multi_reduction <add>, %131, %cst_81 [1] : vector<8x32xf32> to vector<8xf32>
      %133 = vector.shape_cast %132 : vector<8xf32> to vector<8x1xf32>
      %134 = arith.addf %128, %133 : vector<8x1xf32>
      %c0_82 = arith.constant 0 : index
      %c0_83 = arith.constant 0 : index
      %135 = vector.load %arg22[%c0_82, %c0_83] : memref<1x1xf32, #tpu.memory_space<vmem>>, vector<1x1xf32>
      %136 = vector.broadcast %135 : vector<1x1xf32> to vector<8x1xf32>
      %137 = arith.addf %134, %136 : vector<8x1xf32>
      %138 = arith.negf %137 : vector<8x1xf32>
      %139 = math.exp %138 : vector<8x1xf32>
      %cst_84 = arith.constant 1.000000e+00 : f32
      %140 = vector.broadcast %cst_84 : f32 to vector<8x1xf32>
      %141 = arith.addf %140, %139 : vector<8x1xf32>
      %142 = arith.divf %140, %141 : vector<8x1xf32>
      %c0_85 = arith.constant 0 : index
      %c0_86 = arith.constant 0 : index
      %143 = vector.load %arg23[%c0_85, %c0_86] : memref<32x32xf32, #tpu.memory_space<vmem>>, vector<32x32xf32>
      %cst_87 = arith.constant dense<0.000000e+00> : vector<8x32xf32>
      %144 = tpu.matmul %74, %143, %cst_87 {dimension_numbers = #tpu.dot_dimension_numbers<[1], [0], [0], [1], [0, 0, 1, 1], [], []>} : vector<8x32xf32>, vector<32x32xf32>, vector<8x32xf32> -> vector<8x32xf32>
      %c0_88 = arith.constant 0 : index
      %c0_89 = arith.constant 0 : index
      %145 = vector.load %arg24[%c0_88, %c0_89] : memref<64x32xf32, #tpu.memory_space<vmem>>, vector<64x32xf32>
      %cst_90 = arith.constant dense<0.000000e+00> : vector<8x32xf32>
      %146 = tpu.matmul %111, %145, %cst_90 {dimension_numbers = #tpu.dot_dimension_numbers<[1], [0], [0], [1], [0, 0, 1, 1], [], []>} : vector<8x64xf32>, vector<64x32xf32>, vector<8x32xf32> -> vector<8x32xf32>
      %147 = arith.addf %144, %146 : vector<8x32xf32>
      %c0_91 = arith.constant 0 : index
      %c0_92 = arith.constant 0 : index
      %148 = vector.load %arg25[%c0_91, %c0_92] : memref<1x32xf32, #tpu.memory_space<vmem>>, vector<1x32xf32>
      %149 = vector.broadcast %148 : vector<1x32xf32> to vector<8x32xf32>
      %150 = arith.addf %147, %149 : vector<8x32xf32>
      %c0_93 = arith.constant 0 : index
      %c0_94 = arith.constant 0 : index
      %151 = vector.load %arg28[%c0_93, %c0_94] : memref<8x32xf32, #tpu.memory_space<vmem>>, vector<8x32xf32>
      tpu.vector_store %arg28[%c0_93, %c0_94], %74 {strides = array<i32>} : memref<8x32xf32, #tpu.memory_space<vmem>>, vector<8x32xf32>,
      %c0_95 = arith.constant 0 : index
      %c0_96 = arith.constant 0 : index
      %152 = vector.load %arg29[%c0_95, %c0_96] : memref<8x32xf32, #tpu.memory_space<vmem>>, vector<8x32xf32>
      tpu.vector_store %arg29[%c0_95, %c0_96], %72 {strides = array<i32>} : memref<8x32xf32, #tpu.memory_space<vmem>>, vector<8x32xf32>,
      %c0_97 = arith.constant 0 : index
      %c0_98 = arith.constant 0 : index
      %153 = vector.load %arg30[%c0_97, %c0_98] : memref<8x64xf32, #tpu.memory_space<vmem>>, vector<8x64xf32>
      tpu.vector_store %arg30[%c0_97, %c0_98], %111 {strides = array<i32>} : memref<8x64xf32, #tpu.memory_space<vmem>>, vector<8x64xf32>,
      %c0_99 = arith.constant 0 : index
      %c0_100 = arith.constant 0 : index
      %154 = vector.load %arg31[%c0_99, %c0_100] : memref<8x16xf32, #tpu.memory_space<vmem>>, vector<8x16xf32>
      tpu.vector_store %arg31[%c0_99, %c0_100], %107 {strides = array<i32>} : memref<8x16xf32, #tpu.memory_space<vmem>>, vector<8x16xf32>,
      %c0_101 = arith.constant 0 : index
      %c0_102 = arith.constant 0 : index
      %155 = vector.load %arg32[%c0_101, %c0_102] : memref<8x1xf32, #tpu.memory_space<vmem>>, vector<8x1xf32>
      tpu.vector_store %arg32[%c0_101, %c0_102], %142 {strides = array<i32>} : memref<8x1xf32, #tpu.memory_space<vmem>>, vector<8x1xf32>,
      %cst_103 = arith.constant 1.000000e+00 : f32
      %156 = vector.broadcast %cst_103 : f32 to vector<8x1xf32>
      %157 = arith.subf %156, %142 : vector<8x1xf32>
      %158 = vector.broadcast %157 : vector<8x1xf32> to vector<8x16xf32>
      %159 = arith.mulf %158, %107 : vector<8x16xf32>
      %c0_104 = arith.constant 0 : index
      %c0_105 = arith.constant 0 : index
      %160 = vector.load %arg33[%c0_104, %c0_105] : memref<8x16xf32, #tpu.memory_space<vmem>>, vector<8x16xf32>
      tpu.vector_store %arg33[%c0_104, %c0_105], %159 {strides = array<i32>} : memref<8x16xf32, #tpu.memory_space<vmem>>, vector<8x16xf32>,
      %c0_106 = arith.constant 0 : index
      %c0_107 = arith.constant 0 : index
      %161 = vector.load %arg36[%c0_106, %c0_107] : memref<8x32xf32, #tpu.memory_space<vmem>>, vector<8x32xf32>
      tpu.vector_store %arg36[%c0_106, %c0_107], %150 {strides = array<i32>} : memref<8x32xf32, #tpu.memory_space<vmem>>, vector<8x32xf32>,
      %c0_108 = arith.constant 0 : index
      %c0_109 = arith.constant 0 : index
      %162 = vector.load %arg37[%c0_108, %c0_109] : memref<8x1xf32, #tpu.memory_space<vmem>>, vector<8x1xf32>
      tpu.vector_store %arg37[%c0_108, %c0_109], %142 {strides = array<i32>} : memref<8x1xf32, #tpu.memory_space<vmem>>, vector<8x1xf32>,
      %cst_110 = arith.constant -1.000000e+30 : f32
      %163 = vector.broadcast %cst_110 : f32 to vector<8x1xf32>
      %c0_111 = arith.constant 0 : index
      %c0_112 = arith.constant 0 : index
      %164 = vector.load %arg38[%c0_111, %c0_112] : memref<8x1xf32, #tpu.memory_space<vmem>>, vector<8x1xf32>
      tpu.vector_store %arg38[%c0_111, %c0_112], %163 {strides = array<i32>} : memref<8x1xf32, #tpu.memory_space<vmem>>, vector<8x1xf32>,
      %cst_113 = arith.constant 0.000000e+00 : f32
      %165 = vector.broadcast %cst_113 : f32 to vector<8x1xf32>
      %c0_114 = arith.constant 0 : index
      %c0_115 = arith.constant 0 : index
      %166 = vector.load %arg39[%c0_114, %c0_115] : memref<8x1xf32, #tpu.memory_space<vmem>>, vector<8x1xf32>
      tpu.vector_store %arg39[%c0_114, %c0_115], %165 {strides = array<i32>} : memref<8x1xf32, #tpu.memory_space<vmem>>, vector<8x1xf32>,
    } else {
    }
    %c0 = arith.constant 0 : index
    %c0_1 = arith.constant 0 : index
    %3 = vector.load %arg26[%c0, %c0_1] : memref<32x128xbf16, #tpu.memory_space<vmem>>, vector<32x128xbf16>
    %c0_2 = arith.constant 0 : index
    %c0_3 = arith.constant 0 : index
    %4 = vector.load %arg36[%c0_2, %c0_3] : memref<8x32xf32, #tpu.memory_space<vmem>>, vector<8x32xf32>
    %5 = arith.truncf %4 : vector<8x32xf32> to vector<8x32xbf16>
    %cst = arith.constant dense<0.000000e+00> : vector<8x128xf32>
    %6 = tpu.matmul %5, %3, %cst {dimension_numbers = #tpu.dot_dimension_numbers<[1], [0], [0], [1], [0, 0, 1, 1], [], []>} : vector<8x32xbf16>, vector<32x128xbf16>, vector<8x128xf32> -> vector<8x128xf32>
    %c0_4 = arith.constant 0 : index
    %c0_5 = arith.constant 0 : index
    %7 = vector.load %arg27[%c0_4, %c0_5] : memref<1x128xf32, #tpu.memory_space<vmem>>, vector<1x128xf32>
    %8 = vector.broadcast %7 : vector<1x128xf32> to vector<8x128xf32>
    %9 = arith.addf %6, %8 : vector<8x128xf32>
    %c0_6 = arith.constant 0 : index
    %c0_7 = arith.constant 0 : index
    %10 = vector.load %arg34[%c0_6, %c0_7] : memref<8x128xf32, #tpu.memory_space<vmem>>, vector<8x128xf32>
    tpu.vector_store %arg34[%c0_6, %c0_7], %9 {strides = array<i32>} : memref<8x128xf32, #tpu.memory_space<vmem>>, vector<8x128xf32>,
    %c0_8 = arith.constant 0 : index
    %c0_9 = arith.constant 0 : index
    %11 = vector.load %arg38[%c0_8, %c0_9] : memref<8x1xf32, #tpu.memory_space<vmem>>, vector<8x1xf32>
    %cst_10 = arith.constant dense<0xFF800000> : vector<8xf32>
    %12 = vector.multi_reduction <maximumf>, %9, %cst_10 [1] : vector<8x128xf32> to vector<8xf32>
    %13 = vector.shape_cast %12 : vector<8xf32> to vector<8x1xf32>
    %14 = arith.maximumf %11, %13 : vector<8x1xf32>
    %c0_11 = arith.constant 0 : index
    %c0_12 = arith.constant 0 : index
    %15 = vector.load %arg39[%c0_11, %c0_12] : memref<8x1xf32, #tpu.memory_space<vmem>>, vector<8x1xf32>
    %16 = arith.subf %11, %14 : vector<8x1xf32>
    %17 = math.exp %16 : vector<8x1xf32>
    %18 = arith.mulf %15, %17 : vector<8x1xf32>
    %19 = vector.broadcast %14 : vector<8x1xf32> to vector<8x128xf32>
    %20 = arith.subf %9, %19 : vector<8x128xf32>
    %21 = math.exp %20 : vector<8x128xf32>
    %cst_13 = arith.constant dense<0.000000e+00> : vector<8xf32>
    %22 = vector.multi_reduction <add>, %21, %cst_13 [1] : vector<8x128xf32> to vector<8xf32>
    %23 = vector.shape_cast %22 : vector<8xf32> to vector<8x1xf32>
    %24 = arith.addf %18, %23 : vector<8x1xf32>
    %c0_14 = arith.constant 0 : index
    %c0_15 = arith.constant 0 : index
    %25 = vector.load %arg39[%c0_14, %c0_15] : memref<8x1xf32, #tpu.memory_space<vmem>>, vector<8x1xf32>
    tpu.vector_store %arg39[%c0_14, %c0_15], %24 {strides = array<i32>} : memref<8x1xf32, #tpu.memory_space<vmem>>, vector<8x1xf32>,
    %c0_16 = arith.constant 0 : index
    %c0_17 = arith.constant 0 : index
    %26 = vector.load %arg38[%c0_16, %c0_17] : memref<8x1xf32, #tpu.memory_space<vmem>>, vector<8x1xf32>
    tpu.vector_store %arg38[%c0_16, %c0_17], %14 {strides = array<i32>} : memref<8x1xf32, #tpu.memory_space<vmem>>, vector<8x1xf32>,
    %c2_i32 = arith.constant 2 : i32
    %27 = arith.cmpi eq, %arg0, %c2_i32 : i32
    %28 = arith.extui %27 : i1 to i32
    %c0_i32_18 = arith.constant 0 : i32
    %29 = arith.cmpi ne, %28, %c0_i32_18 : i32
    scf.if %29 {
      %c0_19 = arith.constant 0 : index
      %c0_20 = arith.constant 0 : index
      %30 = vector.load %arg38[%c0_19, %c0_20] : memref<8x1xf32, #tpu.memory_space<vmem>>, vector<8x1xf32>
      %c0_21 = arith.constant 0 : index
      %c0_22 = arith.constant 0 : index
      %31 = vector.load %arg39[%c0_21, %c0_22] : memref<8x1xf32, #tpu.memory_space<vmem>>, vector<8x1xf32>
      %32 = math.log %31 : vector<8x1xf32>
      %33 = arith.addf %30, %32 : vector<8x1xf32>
      %c0_23 = arith.constant 0 : index
      %c0_24 = arith.constant 0 : index
      %34 = vector.load %arg37[%c0_23, %c0_24] : memref<8x1xf32, #tpu.memory_space<vmem>>, vector<8x1xf32>
      %35 = math.log %34 : vector<8x1xf32>
      %36 = arith.subf %33, %35 : vector<8x1xf32>
      %c0_25 = arith.constant 0 : index
      %c0_26 = arith.constant 0 : index
      %37 = vector.load %arg35[%c0_25, %c0_26] : memref<8x1xf32, #tpu.memory_space<vmem>>, vector<8x1xf32>
      tpu.vector_store %arg35[%c0_25, %c0_26], %36 {strides = array<i32>} : memref<8x1xf32, #tpu.memory_space<vmem>>, vector<8x1xf32>,
    } else {
    }
    return
  }
  func.func @transform_0(%arg0: i32) -> (i32, i32) {
    %c0_i32 = arith.constant 0 : i32
    %c0_i32_0 = arith.constant 0 : i32
    %c0_i32_1 = arith.constant 0 : i32
    return %c0_i32, %c0_i32_0 : i32, i32
  }
  func.func @transform_1(%arg0: i32) -> (i32, i32) {
    %c0_i32 = arith.constant 0 : i32
    %c0_i32_0 = arith.constant 0 : i32
    %c0_i32_1 = arith.constant 0 : i32
    return %c0_i32, %c0_i32_0 : i32, i32
  }
  func.func @transform_2(%arg0: i32) -> (i32, i32) {
    %c0_i32 = arith.constant 0 : i32
    %c0_i32_0 = arith.constant 0 : i32
    %c0_i32_1 = arith.constant 0 : i32
    return %c0_i32, %c0_i32_0 : i32, i32
  }
  func.func @transform_3(%arg0: i32) -> (i32, i32) {
    %c0_i32 = arith.constant 0 : i32
    %c0_i32_0 = arith.constant 0 : i32
    %c0_i32_1 = arith.constant 0 : i32
    return %c0_i32, %c0_i32_0 : i32, i32
  }
  func.func @transform_4(%arg0: i32) -> (i32, i32, i32) {
    %c0_i32 = arith.constant 0 : i32
    %c0_i32_0 = arith.constant 0 : i32
    %c0_i32_1 = arith.constant 0 : i32
    %c0_i32_2 = arith.constant 0 : i32
    return %c0_i32, %c0_i32_0, %c0_i32_1 : i32, i32, i32
  }
  func.func @transform_5(%arg0: i32) -> (i32, i32, i32) {
    %c0_i32 = arith.constant 0 : i32
    %c0_i32_0 = arith.constant 0 : i32
    %c0_i32_1 = arith.constant 0 : i32
    %c0_i32_2 = arith.constant 0 : i32
    return %c0_i32, %c0_i32_0, %c0_i32_1 : i32, i32, i32
  }
  func.func @transform_6(%arg0: i32) -> (i32, i32) {
    %c0_i32 = arith.constant 0 : i32
    %c0_i32_0 = arith.constant 0 : i32
    %c0_i32_1 = arith.constant 0 : i32
    return %c0_i32, %c0_i32_0 : i32, i32
  }
  func.func @transform_7(%arg0: i32) -> (i32, i32) {
    %c0_i32 = arith.constant 0 : i32
    %c0_i32_0 = arith.constant 0 : i32
    %c0_i32_1 = arith.constant 0 : i32
    return %c0_i32, %c0_i32_0 : i32, i32
  }
  func.func @transform_8(%arg0: i32) -> (i32, i32) {
    %c0_i32 = arith.constant 0 : i32
    %c0_i32_0 = arith.constant 0 : i32
    %c0_i32_1 = arith.constant 0 : i32
    return %c0_i32, %c0_i32_0 : i32, i32
  }
  func.func @transform_9(%arg0: i32) -> (i32, i32) {
    %c0_i32 = arith.constant 0 : i32
    %c0_i32_0 = arith.constant 0 : i32
    %c0_i32_1 = arith.constant 0 : i32
    return %c0_i32, %c0_i32_0 : i32, i32
  }
  func.func @transform_10(%arg0: i32) -> (i32, i32) {
    %c0_i32 = arith.constant 0 : i32
    %c0_i32_0 = arith.constant 0 : i32
    %c0_i32_1 = arith.constant 0 : i32
    return %c0_i32, %c0_i32_0 : i32, i32
  }
  func.func @transform_11(%arg0: i32) -> (i32, i32) {
    %c0_i32 = arith.constant 0 : i32
    %c0_i32_0 = arith.constant 0 : i32
    %c0_i32_1 = arith.constant 0 : i32
    return %c0_i32, %c0_i32_0 : i32, i32
  }
  func.func @transform_12(%arg0: i32) -> (i32, i32) {
    %c0_i32 = arith.constant 0 : i32
    %c0_i32_0 = arith.constant 0 : i32
    %c0_i32_1 = arith.constant 0 : i32
    return %c0_i32, %c0_i32_0 : i32, i32
  }
  func.func @transform_13(%arg0: i32) -> (i32, i32) {
    %c0_i32 = arith.constant 0 : i32
    %c0_i32_0 = arith.constant 0 : i32
    %c0_i32_1 = arith.constant 0 : i32
    return %c0_i32, %c0_i32_0 : i32, i32
  }
  func.func @transform_14(%arg0: i32) -> (i32, i32) {
    %c0_i32 = arith.constant 0 : i32
    %c0_i32_0 = arith.constant 0 : i32
    %c0_i32_1 = arith.constant 0 : i32
    return %c0_i32, %c0_i32_0 : i32, i32
  }
  func.func @transform_15(%arg0: i32) -> (i32, i32) {
    %c0_i32 = arith.constant 0 : i32
    %c0_i32_0 = arith.constant 0 : i32
    %c0_i32_1 = arith.constant 0 : i32
    return %c0_i32, %c0_i32_0 : i32, i32
  }
  func.func @transform_16(%arg0: i32) -> (i32, i32) {
    %c0_i32 = arith.constant 0 : i32
    %c0_i32_0 = arith.constant 0 : i32
    %c0_i32_1 = arith.constant 0 : i32
    return %c0_i32, %c0_i32_0 : i32, i32
  }
  func.func @transform_17(%arg0: i32) -> (i32, i32) {
    %c0_i32 = arith.constant 0 : i32
    %c0_i32_0 = arith.constant 0 : i32
    %c0_i32_1 = arith.constant 0 : i32
    return %c0_i32, %c0_i32_0 : i32, i32
  }
  func.func @transform_18(%arg0: i32) -> (i32, i32) {
    %c0_i32 = arith.constant 0 : i32
    %c0_i32_0 = arith.constant 0 : i32
    %c0_i32_1 = arith.constant 0 : i32
    return %c0_i32, %c0_i32_0 : i32, i32
  }
  func.func @transform_19(%arg0: i32) -> (i32, i32) {
    %c0_i32 = arith.constant 0 : i32
    %c0_i32_0 = arith.constant 0 : i32
    %c0_i32_1 = arith.constant 0 : i32
    return %c0_i32, %c0_i32_0 : i32, i32
  }
  func.func @transform_20(%arg0: i32) -> (i32, i32) {
    %c0_i32 = arith.constant 0 : i32
    %c0_i32_0 = arith.constant 0 : i32
    %c0_i32_1 = arith.constant 0 : i32
    return %c0_i32, %c0_i32_0 : i32, i32
  }
  func.func @transform_21(%arg0: i32) -> (i32, i32) {
    %c0_i32 = arith.constant 0 : i32
    %c0_i32_0 = arith.constant 0 : i32
    %c0_i32_1 = arith.constant 0 : i32
    return %c0_i32, %c0_i32_0 : i32, i32
  }
  func.func @transform_22(%arg0: i32) -> (i32, i32) {
    %c0_i32 = arith.constant 0 : i32
    %c0_i32_0 = arith.constant 0 : i32
    %c0_i32_1 = arith.constant 0 : i32
    return %c0_i32, %c0_i32_0 : i32, i32
  }
  func.func @transform_23(%arg0: i32) -> (i32, i32) {
    %c0_i32 = arith.constant 0 : i32
    %c0_i32_0 = arith.constant 0 : i32
    %c0_i32_1 = arith.constant 0 : i32
    return %c0_i32, %c0_i32_0 : i32, i32
  }
  func.func @transform_24(%arg0: i32) -> (i32, i32) {
    %c0_i32 = arith.constant 0 : i32
    %c0_i32_0 = arith.constant 0 : i32
    %c0_i32_1 = arith.constant 0 : i32
    return %c0_i32, %c0_i32_0 : i32, i32
  }
  func.func @transform_25(%arg0: i32) -> (i32, i32) {
    %c0_i32 = arith.constant 0 : i32
    %c0_i32_0 = arith.constant 0 : i32
    return %c0_i32, %arg0 : i32, i32
  }
  func.func @transform_26(%arg0: i32) -> (i32, i32) {
    %c0_i32 = arith.constant 0 : i32
    %c0_i32_0 = arith.constant 0 : i32
    return %c0_i32, %arg0 : i32, i32
  }
  func.func @transform_27(%arg0: i32) -> (i32, i32) {
    %c0_i32 = arith.constant 0 : i32
    %c0_i32_0 = arith.constant 0 : i32
    %c0_i32_1 = arith.constant 0 : i32
    return %c0_i32, %c0_i32_0 : i32, i32
  }
  func.func @transform_28(%arg0: i32) -> (i32, i32) {
    %c0_i32 = arith.constant 0 : i32
    %c0_i32_0 = arith.constant 0 : i32
    %c0_i32_1 = arith.constant 0 : i32
    return %c0_i32, %c0_i32_0 : i32, i32
  }
  func.func @transform_29(%arg0: i32) -> (i32, i32) {
    %c0_i32 = arith.constant 0 : i32
    %c0_i32_0 = arith.constant 0 : i32
    %c0_i32_1 = arith.constant 0 : i32
    return %c0_i32, %c0_i32_0 : i32, i32
  }
  func.func @transform_30(%arg0: i32) -> (i32, i32) {
    %c0_i32 = arith.constant 0 : i32
    %c0_i32_0 = arith.constant 0 : i32
    %c0_i32_1 = arith.constant 0 : i32
    return %c0_i32, %c0_i32_0 : i32, i32
  }
  func.func @transform_31(%arg0: i32) -> (i32, i32) {
    %c0_i32 = arith.constant 0 : i32
    %c0_i32_0 = arith.constant 0 : i32
    %c0_i32_1 = arith.constant 0 : i32
    return %c0_i32, %c0_i32_0 : i32, i32
  }
  func.func @transform_32(%arg0: i32) -> (i32, i32) {
    %c0_i32 = arith.constant 0 : i32
    %c0_i32_0 = arith.constant 0 : i32
    %c0_i32_1 = arith.constant 0 : i32
    return %c0_i32, %c0_i32_0 : i32, i32
  }
  func.func @transform_33(%arg0: i32) -> (i32, i32) {
    %c0_i32 = arith.constant 0 : i32
    %c0_i32_0 = arith.constant 0 : i32
    return %c0_i32, %arg0 : i32, i32
  }
  func.func @transform_34(%arg0: i32) -> (i32, i32) {
    %c0_i32 = arith.constant 0 : i32
    %c0_i32_0 = arith.constant 0 : i32
    %c0_i32_1 = arith.constant 0 : i32
    return %c0_i32, %c0_i32_0 : i32, i32
  }
}

</mosaic_0001>

<bundles_post_ra>
// kernel: tpu_custom_call.1
= control target key start
LH: loop header
LB: loop body
LE: loop exit
PB: predicated region body
PF: predicated region fallthrough
CT: control target
= control target key end

     0   :  { %s5201_s6 = smov 1   ;;  %s5202_s10 = smov 2   ;;  %s6231_s0 = inlined_call_operand.smem [shape: u32[35], index: -1, kind: input, shape index: {}] }
   0x1   :  { %s5281_s5 = sld [smem:[%s6231_s0]]   ;;  %s5203_s14 = smov 3  }
   0x2   :  { %s5286_s9 = sld [smem:[%s6231_s0 + %s5201_s6]]   ;;  %s5204_s18 = smov 4  }
   0x3   :  { %s5291_s13 = sld [smem:[%s6231_s0 + %s5202_s10]]   ;;  %s5205_s22 = smov 5  }
   0x4   :  { %s5296_s17 = sld [smem:[%s6231_s0 + %s5203_s14]]   ;;  %s5206_s26 = smov 6  }
   0x5   :  { %s5301_s21 = sld [smem:[%s6231_s0 + %s5204_s18]]   ;;  %s5207_s30 = smov 7  }
   0x6   :  { %s5306_s25 = sld [smem:[%s6231_s0 + %s5205_s22]]   ;;  %s5208_s4 = smov 8  }
   0x7   :  { %6273 = sst [smem:[#allocation60_spill]] %s5281_s5  ;;  %s5209_s10 = smov 9  }
   0x8   :  { %6274 = sst [smem:[#allocation61_spill]] %s5286_s9  ;;  %s5210_s15 = smov 10  }
   0x9   :  { %6275 = sst [smem:[#allocation62_spill]] %s5291_s13  ;;  %s5211_s20 = smov 11  }
   0xa   :  { %6276 = sst [smem:[#allocation63_spill]] %s5296_s17  ;;  %s5213_s1 = smov 13  }
   0xb   :  { %6277 = sst [smem:[#allocation64_spill]] %s5301_s21  ;;  %s5214_s7 = smov 14  }
   0xc   :  { %s5311_s29 = sld [smem:[%s6231_s0 + %s5206_s26]]   ;;  %s5212_s26 = smov 12  }
   0xd   :  { %s5316_s3 = sld [smem:[%s6231_s0 + %s5207_s30]]   ;;  %s5216_s22 = smov 16  }
   0xe   :  { %s5321_s8 = sld [smem:[%s6231_s0 + %s5208_s4]]   ;;  %s5217_s28 = smov 17  }
   0xf   :  { %s5326_s14 = sld [smem:[%s6231_s0 + %s5209_s10]]   ;;  %s5222_s10 = smov 22  }
  0x10   :  { %s5331_s19 = sld [smem:[%s6231_s0 + %s5210_s15]]   ;;  %s5215_s15 = smov 15  }
  0x11   :  { %s5336_s24 = sld [smem:[%s6231_s0 + %s5211_s20]]   ;;  %s5223_s16 = smov 23  }
  0x12   :  { %s5341_s30 = sld [smem:[%s6231_s0 + %s5212_s26]]   ;;  %s5224_s23 = smov 24  }
  0x13   :  { %6278 = sst [smem:[#allocation65_spill]] %s5316_s3 }
  0x14   :  { %6279 = sst [smem:[#allocation66_spill]] %s5321_s8 }
  0x15   :  { %6280 = sst [smem:[#allocation67_spill]] %s5326_s14 }
  0x16   :  { %s5346_s6 = sld [smem:[%s6231_s0 + %s5213_s1]]   ;;  %s5225_s1 = smov 25  }
  0x17   :  { %s5351_s12 = sld [smem:[%s6231_s0 + %s5214_s7]]   ;;  %s5218_s7 = smov 18  }
  0x18   :  { %6281 = sst [smem:[#allocation68_spill]] %s5341_s30 }
  0x19   :  { %s5356_s20 = sld [smem:[%s6231_s0 + %s5215_s15]]   ;;  %s5219_s15 = smov 19  }
  0x1a   :  { %s5361_s27 = sld [smem:[%s6231_s0 + %s5216_s22]]   ;;  %s5220_s22 = smov 20  }
  0x1b   :  { %s5366_s4 = sld [smem:[%s6231_s0 + %s5217_s28]]   ;;  %s5221_s28 = smov 21  }
  0x1c   :  { %6282 = sst [smem:[#allocation69_spill]] %s5346_s6 }
  0x1d   :  { %6283 = sst [smem:[#allocation70_spill]] %s5351_s12 }
  0x1e   :  { %s5371_s21 = sld [smem:[%s6231_s0 + %s5218_s7]]   ;;  %s5230_s7 = smov 30  }
  0x1f   :  { %6284 = sst [smem:[#allocation71_spill]] %s5356_s20 }
  0x20   :  { %s5376_s6 = sld [smem:[%s6231_s0 + %s5219_s15]]  }
  0x21   :  { %6285 = sst [smem:[#allocation72_spill]] %s5366_s4 }
  0x22   :  { %s5381_s3 = sld [smem:[%s6231_s0 + %s5220_s22]]  }
  0x23   :  { %s3653_s4 = sld [smem:[%s6231_s0 + %s5221_s28]]  }
  0x24   :  { %s5389_s20 = sld [smem:[%s6231_s0 + %s5222_s10]]   ;;  %s5226_s10 = smov 26  }
  0x25   :  { %s5404_s30 = sld [smem:[%s6231_s0 + %s5225_s1]]   ;;  %s5229_s1 = smov 29  }
  0x26   :  { %6286 = sst [smem:[#allocation73_spill]] %s5376_s6 }
  0x27   :  { %s5394_s6 = sld [smem:[%s6231_s0 + %s5223_s16]]   ;;  %s5227_s16 = smov 27  }
  0x28   :  { %6287 = sst [smem:[#allocation74_spill]] %s5381_s3 }
  0x29   :  { %s5399_s3 = sld [smem:[%s6231_s0 + %s5224_s23]]   ;;  %v75_v0 = vstv %s3653_s4  ;;  %s5228_s23 = smov 28  }
  0x2a   :  { %6288 = sst [smem:[#allocation75_spill]] %s5389_s20  ;;  %76 = vst [vmem:[#allocation6] sm:$0x1] %v75_v0  ;;  %s5231_s4 = smov 31  }
  0x2b   :  { %s5409_s20 = sld [smem:[%s6231_s0 + %s5226_s10]]  }
  0x2c   :  { %s5419_s28 = sld [smem:[%s6231_s0 + %s5228_s23]]   ;;  %s5232_s23 = smov 32  }
  0x2d   :  { %6289 = sst [smem:[#allocation76_spill]] %s5394_s6 }
  0x2e   :  { %s5414_s6 = sld [smem:[%s6231_s0 + %s5227_s16]]  }
  0x2f   :  { %6290 = sst [smem:[#allocation77_spill]] %s5399_s3  ;;  %s5233_s3 = smov 33  }
  0x30   :  { %s5424_s10 = sld [smem:[%s6231_s0 + %s5229_s1]]  }
  0x31   :  { %6291 = sst [smem:[#allocation78_spill]] %s5409_s20  ;;  %s5234_s20 = smov 34  }
  0x32   :  { %6293 = sst [smem:[#allocation80_spill]] %s5419_s28 }
  0x33   :  { %s5429_s16 = sld [smem:[%s6231_s0 + %s5230_s7]]  }
  0x34   :  { %6292 = sst [smem:[#allocation79_spill]] %s5414_s6 }
  0x35   :  { %s5434_s22 = sld [smem:[%s6231_s0 + %s5231_s4]]  }
  0x36   :  { %6294 = sst [smem:[#allocation81_spill]] %s5424_s10 }
  0x37   :  { %s5439_s28 = sld [smem:[%s6231_s0 + %s5232_s23]]  }
  0x38   :  { %s5444_s10 = sld [smem:[%s6231_s0 + %s5233_s3]]  }
  0x39   :  { %6295 = sst [smem:[#allocation82_spill]] %s5429_s16 }
  0x3a   :  { %s5449_s16 = sld [smem:[%s6231_s0 + %s5234_s20]]  }
  0x3d   :  { %6296 = sst [smem:[#allocation83_spill]] %s5439_s28 }
  0x3e   :  { %77 = vsyncpa [#allocation8], 0 }
  0x3f   :  { %78 = vsyncpa [#allocation11], 0 }
  0x40   :  { %79 = vsyncpa [#allocation14], 0 }
  0x41   :  { %80 = vsyncpa [#allocation17], 0 }
  0x42   :  { %81 = vsyncpa [#allocation20], 0 }
  0x43   :  { %82 = vsyncpa [#allocation23], 0 }
  0x44   :  { %83 = vsyncpa [#allocation26], 0 }
  0x45   :  { %84 = vsyncpa [#allocation29], 0 }
  0x46   :  { %85 = vsyncpa [#allocation32], 0 }
  0x47   :  { %86 = vsyncpa [#allocation35], 0 }
  0x48   :  { %87 = vsyncpa [#allocation9], 0 }
  0x49   :  { %88 = vsyncpa [#allocation39], 0 }
  0x4a   :  { %89 = vsyncpa [#allocation42], 0 }
  0x4b   :  { %90 = vsyncpa [#allocation45], 0 }
  0x4c   :  { %92 = vsyncpa [#allocation45 + $0x1], 0  ;;  %s5451_s6 = smov 0   ;;  %s5453_s4 = smov 0  }
  0x4d   :  { %s5455_s0 = smov 0   ;;  %s5457_s15 = smov 0  }
  0x4e LB: > { %s6297_s13 = sld [smem:[#allocation62_spill]]  ;;  %s6299_s8 = sld [smem:[#allocation66_spill]]  ;;  %s5195_s0 = sphi %s5455_s0, %s6387_s0   ;;  %s5191_s4 = sphi %s5453_s4, %s6386_s4   ;;  %s5187_s6 = sphi %s5451_s6, %s6385_s6   ;;  %s5199_s15 = sphi %s5457_s15, %s6383_s15  }
  0x4f   : > { %s6298_s12 = sld [smem:[#allocation70_spill]]  ;;  %s6300_s5 = sld [smem:[#allocation60_spill]] }
  0x50   : > { %s6301_s14 = sld [smem:[#allocation67_spill]]  ;;  %s6302_s17 = sld [smem:[#allocation63_spill]] }
  0x51   : > { %s6303_s9 = sld [smem:[#allocation61_spill]]  ;;  %6304 = sst [smem:[#allocation84_spill]] %s5187_s6 }
  0x52   : > { %s5472_s18 = sadd.s32 4294967295, %s5199_s15   ;;  %s3668_s23 = sadd.s32 4294967294, %s5199_s15  }
  0x53   : > { %s5476_s26 = sadd.s32 1, %s5199_s15   ;;  %s630_s3 = sadd.s32 1, %s5195_s0 }
  0x54   : > { %6305 = sst [smem:[#allocation85_spill]] %s5476_s26  ;;  %s627_s1 = ssub.s32 %s5199_s15, %s5476_s26 }
  0x55   : > { %p637_p0 = scmp.ne.s32.totalorder %s5195_s0, %s5191_s4  ;;  %p628_p1 = scmp.eq.s32.totalorder %s627_s1, 0 }
  0x56   : > { %p638_p2 = scmp.eq.s32.totalorder %s5199_s15, 0  ;;  %p6253_p3 = scmp.eq.s32.totalorder %s5472_s18, 2 }
  0x57   : > { %p824_p4 = scmp.ne.s32.totalorder %s5191_s4, %s5187_s6  ;;  %p825_p7 = scmp.eq.s32.totalorder %s3668_s23, 2 }
  0x58   : > { %s5488_s2 = scalar_select %p628_p1, %s5195_s0, %s630_s3  }
  0x59   : > { %p5490_p5 = por %p638_p2, %p637_p0  ;;  %p5496_p6 = por %p6253_p3, %p637_p0 }
  0x5a   : > { %6306 = sst [smem:[#allocation86_spill]] %s5488_s2  ;;  %p3669_p8 = scmp.ge.s32.totalorder %s5199_s15, 1 }
  0x5b   : > { %s6307_s20 = scalar_select %p5490_p5, 1, 0 }
  0x5c   : > { %s6308_s7 = scalar_select %p5496_p6, 1, 0 }
  0x5d   : > { %p853_p9 = scmp.lt.s32.totalorder %s5199_s15, 4  ;;  %p5503_p11 = por %p825_p7, %p824_p4 }
  0x5e   : > { %6309 = sst [smem:[#allocation87_spill]] %s6308_s7  ;;  %p6254_p12 = scmp.eq.s32.totalorder %s5472_s18, 0 }
  0x5f   : > { %s6310_s11 = scalar_select %p5503_p11, 1, 0 }
  0x60   : > { %p5508_p13 = pnand %p3669_p8, %p853_p9  ;;  %s5235_s1 = smov [#allocation10]  }
  0x61   : > { %6311 = sst [smem:[#allocation88_spill]] %s6310_s11  ;;  %s877_s2 = sshll.u32 %s5235_s1, 4  ;;  %s878_s2 = int_to_ptr.vmem [resolvable:$true] %s877_s2 }
  0x62   : > { %s6312_s3 = scalar_select %p5508_p13, 1, 0 }
  0x63   : > { %p4181_p0 = pneg %p5508_p13  ;;  %s5236_s23 = smov [#allocation13]  }
  0x64   : > { %s899_s26 = sshll.u32 %s5236_s23, 4  ;;  %s5237_s11 = smov [#allocation16]   ;;  %s5520_s26 = int_to_ptr.vmem [resolvable:$true] %s899_s26 }
  0x65   : > { %p5516_p1 = pnand %p6254_p12, %p4181_p0  ;;  %s926_s7 = sshll.u32 %s5237_s11, 4  ;;  %s5522_s7 = int_to_ptr.vmem [resolvable:$true] %s926_s7 }
  0x66   : > { %s4451_s28 = scalar_lea.hbm %s6303_s9, 128 }
  0x67   : > { %p4452_p2 = scmp.ne.s32.totalorder %s6303_s9, %s4451_s28  ;;  %p5528_p4 = pneg %p5516_p1 }
  0x68   : > { %p4458_p9 = scmp.lt.u32.totalorder %s4451_s28, %s6303_s9 }
  0x69   : > { %p4454_p7 = pnand %p5528_p4, %p4452_p2 }
  0x6b   : > { %p4455_p8 = pneg %p4454_p7 }
  0x6d   : > { %p4460_p0 = pnand %p4458_p9, %p4455_p8 }
  0x6f   : > { %4463 = shalt.err (!%p4460_p0)
}
  0x70   : > { %s4464_s23 = scalar_lea.vmem %s878_s2, 128  ;;  %p4472_p11 = scmp.lt.s32.totalorder %s878_s2, %s878_s2 }
  0x71   : > { %p4465_p3 = scmp.ne.s32.totalorder %s878_s2, %s4464_s23  ;;  %p4473_p6 = scmp.lt.s32.totalorder %s4464_s23, %s4464_s23 }
  0x73   : > { %p4467_p10 = pnand %p4465_p3, %p5528_p4  ;;  %p4474_p13 = por %p4473_p6, %p4472_p11 }
  0x75   : > { %p4468_p12 = pneg %p4467_p10 }
  0x77   : > { %p4475_p5 = pnand %p4474_p13, %p4468_p12 }
  0x79   : > { %4478 = shalt.err (!%p4475_p5)
}
  0x7a   : > { %4187 = dma.hbm_to_vmem [thread:$0]  (!%p5516_p1), %s6303_s9, 128, %s878_s2, [#allocation11]  }
  0x7b   : > { %s4479_s28 = scalar_lea.hbm %s6302_s17, 128 }
  0x7c   : > { %p4480_p2 = scmp.ne.s32.totalorder %s6302_s17, %s4479_s28  ;;  %p4486_p3 = scmp.lt.u32.totalorder %s4479_s28, %s6302_s17 }
  0x7e   : > { %p4482_p7 = pnand %p4480_p2, %p5528_p4 }
  0x80   : > { %p4483_p8 = pneg %p4482_p7 }
  0x82   : > { %p4488_p10 = pnand %p4486_p3, %p4483_p8 }
  0x84   : > { %4491 = shalt.err (!%p4488_p10)
}
  0x85   : > { %s4492_s11 = scalar_lea.vmem %s5520_s26, 128  ;;  %p4500_p12 = scmp.lt.s32.totalorder %s5520_s26, %s5520_s26 }
  0x86   : > { %p4493_p5 = scmp.ne.s32.totalorder %s5520_s26, %s4492_s11  ;;  %p4501_p13 = scmp.lt.s32.totalorder %s4492_s11, %s4492_s11 }
  0x88   : > { %p4495_p6 = pnand %p4493_p5, %p5528_p4  ;;  %p4502_p9 = por %p4501_p13, %p4500_p12 }
  0x8a   : > { %p4496_p11 = pneg %p4495_p6 }
  0x8c   : > { %p4503_p0 = pnand %p4502_p9, %p4496_p11 }
  0x8e   : > { %4506 = shalt.err (!%p4503_p0)
}
  0x8f   : > { %4193 = dma.hbm_to_vmem [thread:$0]  (!%p5516_p1), %s6302_s17, 128, %s5520_s26, [#allocation14]  }
  0x90   : > { %s4507_s2 = scalar_lea.hbm %s5311_s29, 128 }
  0x91   : > { %p4508_p2 = scmp.ne.s32.totalorder %s5311_s29, %s4507_s2  ;;  %p4514_p3 = scmp.lt.u32.totalorder %s4507_s2, %s5311_s29 }
  0x93   : > { %p4510_p7 = pnand %p4508_p2, %p5528_p4 }
  0x95   : > { %p4511_p8 = pneg %p4510_p7 }
  0x97   : > { %p4516_p10 = pnand %p4514_p3, %p4511_p8 }
  0x99   : > { %4519 = shalt.err (!%p4516_p10)
}
  0x9a   : > { %s4520_s23 = scalar_lea.vmem %s5522_s7, 128  ;;  %p4528_p12 = scmp.lt.s32.totalorder %s5522_s7, %s5522_s7 }
  0x9b   : > { %p4521_p5 = scmp.ne.s32.totalorder %s5522_s7, %s4520_s23  ;;  %p4529_p13 = scmp.lt.s32.totalorder %s4520_s23, %s4520_s23 }
  0x9d   : > { %p4523_p6 = pnand %p4521_p5, %p5528_p4  ;;  %p4530_p9 = por %p4529_p13, %p4528_p12 }
  0x9f   : > { %p4524_p11 = pneg %p4523_p6 }
  0xa1   : > { %p4531_p0 = pnand %p4530_p9, %p4524_p11 }
  0xa3   : > { %4534 = shalt.err (!%p4531_p0)
}
  0xa4   : > { %4199 = dma.hbm_to_vmem [thread:$0]  (!%p5516_p1), %s5311_s29, 128, %s5522_s7, [#allocation17]  }
  0xa5   : > { %s5238_s26 = smov [#allocation19]   ;;  %s4535_s11 = scalar_lea.hbm %s6301_s14, 16 }
  0xa6   : > { %s953_s28 = sshll.u32 %s5238_s26, 4  ;;  %p4536_p2 = scmp.ne.s32.totalorder %s6301_s14, %s4535_s11  ;;  %s954_s28 = int_to_ptr.vmem [resolvable:$true] %s953_s28 }
  0xa7   : > { %p4542_p3 = scmp.lt.u32.totalorder %s4535_s11, %s6301_s14 }
  0xa8   : > { %p4538_p7 = pnand %p4536_p2, %p5528_p4 }
  0xaa   : > { %p4539_p8 = pneg %p4538_p7 }
  0xac   : > { %p4544_p10 = pnand %p4542_p3, %p4539_p8 }
  0xae   : > { %4547 = shalt.err (!%p4544_p10)
}
  0xaf   : > { %s4548_s2 = scalar_lea.vmem %s954_s28, 16  ;;  %s4555_s23 = scalar_lea.vmem %s954_s28, 32 }
  0xb0   : > { %p4549_p5 = scmp.ne.s32.totalorder %s954_s28, %s4548_s2  ;;  %p4556_p12 = scmp.lt.s32.totalorder %s954_s28, %s954_s28 }
  0xb1   : > { %p4557_p13 = scmp.lt.s32.totalorder %s4555_s23, %s4548_s2 }
  0xb2   : > { %p4551_p6 = pnand %p4549_p5, %p5528_p4 }
  0xb3   : > { %p4558_p9 = por %p4557_p13, %p4556_p12 }
  0xb4   : > { %p4552_p11 = pneg %p4551_p6 }
  0xb6   : > { %p4559_p0 = pnand %p4558_p9, %p4552_p11 }
  0xb8   : > { %4562 = shalt.err (!%p4559_p0)
}
  0xb9   : > { %4205 = dma.hbm_to_vmem [thread:$0]  (!%p5516_p1), %s6301_s14, 16, %s954_s28, [#allocation20]  }
  0xba   : > { %s5239_s7 = smov [#allocation22]   ;;  %s5240_s11 = smov [#allocation25]  }
  0xbb   : > { %s976_s26 = sshll.u32 %s5239_s7, 4  ;;  %s1003_s9 = sshll.u32 %s5240_s11, 4  ;;  %s977_s26 = int_to_ptr.vmem [resolvable:$true] %s976_s26  ;;  %s5580_s9 = int_to_ptr.vmem [resolvable:$true] %s1003_s9 }
  0xbc   : > { %s4563_s17 = scalar_lea.hbm %s5336_s24, 512 }
  0xbd   : > { %p4564_p2 = scmp.ne.s32.totalorder %s5336_s24, %s4563_s17  ;;  %p4570_p3 = scmp.lt.u32.totalorder %s4563_s17, %s5336_s24 }
  0xbf   : > { %p4566_p7 = pnand %p4564_p2, %p5528_p4 }
  0xc1   : > { %p4567_p8 = pneg %p4566_p7 }
  0xc3   : > { %p4572_p10 = pnand %p4570_p3, %p4567_p8 }
  0xc5   : > { %4575 = shalt.err (!%p4572_p10)
}
  0xc6   : > { %s4576_s2 = scalar_lea.vmem %s977_s26, 512  ;;  %p4584_p12 = scmp.lt.s32.totalorder %s977_s26, %s977_s26 }
  0xc7   : > { %p4577_p5 = scmp.ne.s32.totalorder %s977_s26, %s4576_s2  ;;  %p4585_p13 = scmp.lt.s32.totalorder %s4576_s2, %s4576_s2 }
  0xc9   : > { %p4579_p6 = pnand %p4577_p5, %p5528_p4  ;;  %p4586_p9 = por %p4585_p13, %p4584_p12 }
  0xcb   : > { %p4580_p11 = pneg %p4579_p6 }
  0xcd   : > { %p4587_p0 = pnand %p4586_p9, %p4580_p11 }
  0xcf   : > { %4590 = shalt.err (!%p4587_p0)
}
  0xd0   : > { %s5241_s28 = smov 128   ;;  %s5242_s17 = smov 8  }
  0xd1   : > { %4211 = dma.hbm_to_vmem [thread:$0]  (!%p5516_p1), %s5336_s24, 512, %s977_s26, [#allocation23], %s5241_s28, %s5241_s28, %s5242_s17  }
  0xd2   : > { %s4591_s23 = scalar_lea.hbm %s6298_s12, 512 }
  0xd3   : > { %p4592_p2 = scmp.ne.s32.totalorder %s6298_s12, %s4591_s23  ;;  %p4598_p3 = scmp.lt.u32.totalorder %s4591_s23, %s6298_s12 }
  0xd5   : > { %p4594_p7 = pnand %p4592_p2, %p5528_p4 }
  0xd7   : > { %p4595_p8 = pneg %p4594_p7 }
  0xd9   : > { %p4600_p10 = pnand %p4598_p3, %p4595_p8 }
  0xdb   : > { %4603 = shalt.err (!%p4600_p10)
}
  0xdc   : > { %s4604_s7 = scalar_lea.vmem %s5580_s9, 512  ;;  %p4612_p12 = scmp.lt.s32.totalorder %s5580_s9, %s5580_s9 }
  0xdd   : > { %p4605_p5 = scmp.ne.s32.totalorder %s5580_s9, %s4604_s7  ;;  %p4613_p13 = scmp.lt.s32.totalorder %s4604_s7, %s4604_s7 }
  0xdf   : > { %p4607_p6 = pnand %p4605_p5, %p5528_p4  ;;  %p4614_p9 = por %p4613_p13, %p4612_p12 }
  0xe1   : > { %p4608_p11 = pneg %p4607_p6 }
  0xe3   : > { %p4615_p0 = pnand %p4614_p9, %p4608_p11 }
  0xe5   : > { %4618 = shalt.err (!%p4615_p0)
}
  0xe6   : > { %4217 = dma.hbm_to_vmem [thread:$0]  (!%p5516_p1), %s6298_s12, 512, %s5580_s9, [#allocation26], %s5241_s28, %s5241_s28, %s5242_s17  }
  0xe7   : > { %s5243_s26 = smov [#allocation28]   ;;  %s5244_s2 = smov [#allocation31]  }
  0xe8   : > { %s1028_s11 = sshll.u32 %s5243_s26, 4  ;;  %s1050_s23 = sshll.u32 %s5244_s2, 4  ;;  %s1029_s11 = int_to_ptr.vmem [resolvable:$true] %s1028_s11  ;;  %s5613_s23 = int_to_ptr.vmem [resolvable:$true] %s1050_s23 }
  0xe9   : > { %s4619_s7 = scalar_lea.hbm %s5361_s27, 16 }
  0xea   : > { %p4620_p2 = scmp.ne.s32.totalorder %s5361_s27, %s4619_s7  ;;  %p4626_p3 = scmp.lt.u32.totalorder %s4619_s7, %s5361_s27 }
  0xec   : > { %p4622_p7 = pnand %p4620_p2, %p5528_p4 }
  0xee   : > { %p4623_p8 = pneg %p4622_p7 }
  0xf0   : > { %p4628_p10 = pnand %p4626_p3, %p4623_p8 }
  0xf2   : > { %4631 = shalt.err (!%p4628_p10)
}
  0xf3   : > { %s4632_s14 = scalar_lea.vmem %s1029_s11, 16  ;;  %s4639_s9 = scalar_lea.vmem %s1029_s11, 32 }
  0xf4   : > { %p4633_p5 = scmp.ne.s32.totalorder %s1029_s11, %s4632_s14  ;;  %p4640_p12 = scmp.lt.s32.totalorder %s1029_s11, %s1029_s11 }
  0xf5   : > { %p4641_p13 = scmp.lt.s32.totalorder %s4639_s9, %s4632_s14 }
  0xf6   : > { %p4635_p6 = pnand %p4633_p5, %p5528_p4 }
  0xf7   : > { %p4642_p9 = por %p4641_p13, %p4640_p12 }
  0xf8   : > { %p4636_p11 = pneg %p4635_p6 }
  0xfa   : > { %p4643_p0 = pnand %p4642_p9, %p4636_p11 }
  0xfc   : > { %4646 = shalt.err (!%p4643_p0)
}
  0xfd   : > { %4223 = dma.hbm_to_vmem [thread:$0]  (!%p5516_p1), %s5361_s27, 16, %s1029_s11, [#allocation29]  }
  0xfe   : > { %s4647_s26 = scalar_lea.hbm %s5371_s21, 16 }
  0xff   : > { %p4648_p2 = scmp.ne.s32.totalorder %s5371_s21, %s4647_s26  ;;  %p4654_p3 = scmp.lt.u32.totalorder %s4647_s26, %s5371_s21 }
 0x101   : > { %p4650_p7 = pnand %p4648_p2, %p5528_p4 }
 0x103   : > { %p4651_p8 = pneg %p4650_p7 }
 0x105   : > { %p4656_p10 = pnand %p4654_p3, %p4651_p8 }
 0x107   : > { %4659 = shalt.err (!%p4656_p10)
}
 0x108   : > { %s4660_s14 = scalar_lea.vmem %s5613_s23, 16  ;;  %s4667_s2 = scalar_lea.vmem %s5613_s23, 32 }
 0x109   : > { %p4661_p5 = scmp.ne.s32.totalorder %s5613_s23, %s4660_s14  ;;  %p4668_p12 = scmp.lt.s32.totalorder %s5613_s23, %s5613_s23 }
 0x10a   : > { %p4669_p13 = scmp.lt.s32.totalorder %s4667_s2, %s4660_s14 }
 0x10b   : > { %p4663_p6 = pnand %p4661_p5, %p5528_p4 }
 0x10c   : > { %p4670_p9 = por %p4669_p13, %p4668_p12 }
 0x10d   : > { %p4664_p11 = pneg %p4663_p6 }
 0x10f   : > { %p4671_p0 = pnand %p4670_p9, %p4664_p11 }
 0x111   : > { %4674 = shalt.err (!%p4671_p0)
}
 0x112   : > { %4229 = dma.hbm_to_vmem [thread:$0]  (!%p5516_p1), %s5371_s21, 16, %s5613_s23, [#allocation32]  }
 0x113   : > { %s5245_s11 = smov [#allocation7]   ;;  %s5246_s9 = smov [#allocation12]  }
 0x114   : > { %s866_s7 = sshll.u32 %s5245_s11, 4  ;;  %s888_s26 = sshll.u32 %s5246_s9, 4  ;;  %s867_s7 = int_to_ptr.vmem [resolvable:$true] %s866_s7  ;;  %s5641_s26 = int_to_ptr.vmem [resolvable:$true] %s888_s26 }
 0x115   : > { %s4675_s14 = scalar_lea.hbm %s6300_s5, 128 }
 0x116   : > { %p4676_p2 = scmp.ne.s32.totalorder %s6300_s5, %s4675_s14  ;;  %p4682_p3 = scmp.lt.u32.totalorder %s4675_s14, %s6300_s5 }
 0x118   : > { %p4678_p7 = pnand %p4676_p2, %p5528_p4 }
 0x11a   : > { %p4679_p8 = pneg %p4678_p7 }
 0x11c   : > { %p4684_p10 = pnand %p4682_p3, %p4679_p8 }
 0x11e   : > { %4687 = shalt.err (!%p4684_p10)
}
 0x11f   : > { %s4688_s2 = scalar_lea.vmem %s867_s7, 128  ;;  %p4696_p12 = scmp.lt.s32.totalorder %s867_s7, %s867_s7 }
 0x120   : > { %p4689_p5 = scmp.ne.s32.totalorder %s867_s7, %s4688_s2  ;;  %p4697_p13 = scmp.lt.s32.totalorder %s4688_s2, %s4688_s2 }
 0x122   : > { %p4691_p6 = pnand %p4689_p5, %p5528_p4  ;;  %p4698_p9 = por %p4697_p13, %p4696_p12 }
 0x124   : > { %p4692_p11 = pneg %p4691_p6 }
 0x126   : > { %p4699_p0 = pnand %p4698_p9, %p4692_p11 }
 0x128   : > { %4702 = shalt.err (!%p4699_p0)
}
 0x129   : > { %4184 = dma.hbm_to_vmem [thread:$0]  (!%p5516_p1), %s6300_s5, 128, %s867_s7, [#allocation8]  }
 0x12a   : > { %s4703_s23 = scalar_lea.hbm %s6297_s13, 128 }
 0x12b   : > { %p4704_p2 = scmp.ne.s32.totalorder %s6297_s13, %s4703_s23  ;;  %p4710_p3 = scmp.lt.u32.totalorder %s4703_s23, %s6297_s13 }
 0x12d   : > { %p4706_p7 = pnand %p4704_p2, %p5528_p4 }
 0x12f   : > { %p4707_p8 = pneg %p4706_p7 }
 0x131   : > { %p4712_p10 = pnand %p4710_p3, %p4707_p8 }
 0x133   : > { %4715 = shalt.err (!%p4712_p10)
}
 0x134   : > { %s4716_s11 = scalar_lea.vmem %s5641_s26, 128  ;;  %p4724_p12 = scmp.lt.s32.totalorder %s5641_s26, %s5641_s26 }
 0x135   : > { %p4717_p5 = scmp.ne.s32.totalorder %s5641_s26, %s4716_s11  ;;  %p4725_p13 = scmp.lt.s32.totalorder %s4716_s11, %s4716_s11 }
 0x137   : > { %p4719_p6 = pnand %p4717_p5, %p5528_p4  ;;  %p4726_p9 = por %p4725_p13, %p4724_p12 }
 0x139   : > { %p4720_p11 = pneg %p4719_p6 }
 0x13b   : > { %p4727_p0 = pnand %p4726_p9, %p4720_p11 }
 0x13d   : > { %4730 = shalt.err (!%p4727_p0)
}
 0x13e   : > { %4190 = dma.hbm_to_vmem [thread:$0]  (!%p5516_p1), %s6297_s13, 128, %s5641_s26, [#allocation11]  }
 0x13f   : > { %s5247_s7 = smov [#allocation15]   ;;  %s5248_s14 = smov [#allocation18]  }
 0x140   : > { %s912_s9 = sshll.u32 %s5247_s7, 4  ;;  %s939_s2 = sshll.u32 %s5248_s14, 4  ;;  %s913_s9 = int_to_ptr.vmem [resolvable:$true] %s912_s9  ;;  %s5668_s2 = int_to_ptr.vmem [resolvable:$true] %s939_s2 }
 0x141   : > { %s4731_s23 = scalar_lea.hbm %s5306_s25, 2048 }
 0x142   : > { %p4732_p2 = scmp.ne.s32.totalorder %s5306_s25, %s4731_s23  ;;  %p4738_p3 = scmp.lt.u32.totalorder %s4731_s23, %s5306_s25 }
 0x144   : > { %p4734_p7 = pnand %p4732_p2, %p5528_p4 }
 0x146   : > { %p4735_p8 = pneg %p4734_p7 }
 0x148   : > { %p4740_p10 = pnand %p4738_p3, %p4735_p8 }
 0x14a   : > { %4743 = shalt.err (!%p4740_p10)
}
 0x14b   : > { %s4744_s11 = scalar_lea.vmem %s913_s9, 2048  ;;  %p4752_p12 = scmp.lt.s32.totalorder %s913_s9, %s913_s9 }
 0x14c   : > { %p4745_p5 = scmp.ne.s32.totalorder %s913_s9, %s4744_s11  ;;  %p4753_p13 = scmp.lt.s32.totalorder %s4744_s11, %s4744_s11 }
 0x14e   : > { %p4747_p6 = pnand %p4745_p5, %p5528_p4  ;;  %p4754_p9 = por %p4753_p13, %p4752_p12 }
 0x150   : > { %p4748_p11 = pneg %p4747_p6 }
 0x152   : > { %p4755_p0 = pnand %p4754_p9, %p4748_p11 }
 0x154   : > { %4758 = shalt.err (!%p4755_p0)
}
 0x155   : > { %4196 = dma.hbm_to_vmem [thread:$0]  (!%p5516_p1), %s5306_s25, 2048, %s913_s9, [#allocation14], %s5241_s28, %s5241_s28, %s5242_s17  }
 0x156   : > { %s4759_s26 = scalar_lea.hbm %s6299_s8, 512 }
 0x157   : > { %p4760_p2 = scmp.ne.s32.totalorder %s6299_s8, %s4759_s26  ;;  %p4766_p3 = scmp.lt.u32.totalorder %s4759_s26, %s6299_s8 }
 0x159   : > { %p4762_p7 = pnand %p4760_p2, %p5528_p4 }
 0x15b   : > { %p4763_p8 = pneg %p4762_p7 }
 0x15d   : > { %p4768_p10 = pnand %p4766_p3, %p4763_p8 }
 0x15f   : > { %4771 = shalt.err (!%p4768_p10)
}
 0x160   : > { %s4772_s7 = scalar_lea.vmem %s5668_s2, 512  ;;  %p4780_p12 = scmp.lt.s32.totalorder %s5668_s2, %s5668_s2 }
 0x161   : > { %p4773_p5 = scmp.ne.s32.totalorder %s5668_s2, %s4772_s7  ;;  %p4781_p13 = scmp.lt.s32.totalorder %s4772_s7, %s4772_s7 }
 0x163   : > { %p4775_p6 = pnand %p4773_p5, %p5528_p4  ;;  %p4782_p9 = por %p4781_p13, %p4780_p12 }
 0x165   : > { %p4776_p11 = pneg %p4775_p6 }
 0x167   : > { %p4783_p0 = pnand %p4782_p9, %p4776_p11 }
 0x169   : > { %4786 = shalt.err (!%p4783_p0)
}
 0x16a   : > { %4202 = dma.hbm_to_vmem [thread:$0]  (!%p5516_p1), %s6299_s8, 512, %s5668_s2, [#allocation17], %s5241_s28, %s5241_s28, %s5242_s17  }
 0x16b   : > { %s5249_s9 = smov [#allocation21]   ;;  %s5250_s23 = smov [#allocation24]  }
 0x16c   : > { %s963_s14 = sshll.u32 %s5249_s9, 4  ;;  %s990_s11 = sshll.u32 %s5250_s23, 4  ;;  %s964_s14 = int_to_ptr.vmem [resolvable:$true] %s963_s14  ;;  %s5701_s11 = int_to_ptr.vmem [resolvable:$true] %s990_s11 }
 0x16d   : > { %s4787_s26 = scalar_lea.hbm %s5331_s19, 512 }
 0x16e   : > { %p4788_p2 = scmp.ne.s32.totalorder %s5331_s19, %s4787_s26  ;;  %p4794_p3 = scmp.lt.u32.totalorder %s4787_s26, %s5331_s19 }
 0x170   : > { %p4790_p7 = pnand %p4788_p2, %p5528_p4 }
 0x172   : > { %p4791_p8 = pneg %p4790_p7 }
 0x174   : > { %p4796_p10 = pnand %p4794_p3, %p4791_p8 }
 0x176   : > { %4799 = shalt.err (!%p4796_p10)
}
 0x177   : > { %s4800_s7 = scalar_lea.vmem %s964_s14, 512  ;;  %p4808_p12 = scmp.lt.s32.totalorder %s964_s14, %s964_s14 }
 0x178   : > { %p4801_p5 = scmp.ne.s32.totalorder %s964_s14, %s4800_s7  ;;  %p4809_p13 = scmp.lt.s32.totalorder %s4800_s7, %s4800_s7 }
 0x17a   : > { %p4803_p6 = pnand %p4801_p5, %p5528_p4  ;;  %p4810_p9 = por %p4809_p13, %p4808_p12 }
 0x17c   : > { %p4804_p11 = pneg %p4803_p6 }
 0x17e   : > { %p4811_p0 = pnand %p4810_p9, %p4804_p11 }
 0x180   : > { %4814 = shalt.err (!%p4811_p0)
}
 0x181   : > { %s6315_s2 = sld [smem:[#allocation68_spill]] }
 0x182   : > { %4208 = dma.hbm_to_vmem [thread:$0]  (!%p5516_p1), %s5331_s19, 512, %s964_s14, [#allocation20], %s5241_s28, %s5241_s28, %s5242_s17  }
 0x187   : > { %s4815_s9 = scalar_lea.hbm %s6315_s2, 16 }
 0x188   : > { %p4816_p2 = scmp.ne.s32.totalorder %s6315_s2, %s4815_s9  ;;  %p4822_p3 = scmp.lt.u32.totalorder %s4815_s9, %s6315_s2 }
 0x18a   : > { %p4818_p7 = pnand %p4816_p2, %p5528_p4 }
 0x18c   : > { %p4819_p8 = pneg %p4818_p7 }
 0x18e   : > { %p4824_p10 = pnand %p4822_p3, %p4819_p8 }
 0x190   : > { %4827 = shalt.err (!%p4824_p10)
}
 0x191   : > { %s4828_s23 = scalar_lea.vmem %s5701_s11, 16  ;;  %s4835_s26 = scalar_lea.vmem %s5701_s11, 32 }
 0x192   : > { %p4829_p5 = scmp.ne.s32.totalorder %s5701_s11, %s4828_s23  ;;  %p4836_p12 = scmp.lt.s32.totalorder %s5701_s11, %s5701_s11 }
 0x193   : > { %p4837_p13 = scmp.lt.s32.totalorder %s4835_s26, %s4828_s23 }
 0x194   : > { %p4831_p6 = pnand %p4829_p5, %p5528_p4 }
 0x195   : > { %p4838_p9 = por %p4837_p13, %p4836_p12 }
 0x196   : > { %p4832_p11 = pneg %p4831_p6 }
 0x198   : > { %p4839_p0 = pnand %p4838_p9, %p4832_p11 }
 0x19a   : > { %4842 = shalt.err (!%p4839_p0)
}
 0x19b   : > { %s6316_s28 = sld [smem:[#allocation71_spill]]  ;;  %s5251_s17 = smov [#allocation27]  }
 0x19c   : > { %4214 = dma.hbm_to_vmem [thread:$0]  (!%p5516_p1), %s6315_s2, 16, %s5701_s11, [#allocation23]  }
 0x19d   : > { %s1017_s14 = sshll.u32 %s5251_s17, 4  ;;  %s5252_s7 = smov [#allocation30]   ;;  %s1018_s14 = int_to_ptr.vmem [resolvable:$true] %s1017_s14 }
 0x19e   : > { %s1039_s9 = sshll.u32 %s5252_s7, 4  ;;  %s5732_s9 = int_to_ptr.vmem [resolvable:$true] %s1039_s9 }
 0x1a1   : > { %s4843_s23 = scalar_lea.hbm %s6316_s28, 16 }
 0x1a2   : > { %p4844_p2 = scmp.ne.s32.totalorder %s6316_s28, %s4843_s23  ;;  %p4850_p3 = scmp.lt.u32.totalorder %s4843_s23, %s6316_s28 }
 0x1a4   : > { %p4846_p7 = pnand %p4844_p2, %p5528_p4 }
 0x1a6   : > { %p4847_p8 = pneg %p4846_p7 }
 0x1a8   : > { %p4852_p10 = pnand %p4850_p3, %p4847_p8 }
 0x1aa   : > { %4855 = shalt.err (!%p4852_p10)
}
 0x1ab   : > { %s4856_s26 = scalar_lea.vmem %s1018_s14, 16  ;;  %s4863_s11 = scalar_lea.vmem %s1018_s14, 32 }
 0x1ac   : > { %p4857_p5 = scmp.ne.s32.totalorder %s1018_s14, %s4856_s26  ;;  %p4864_p12 = scmp.lt.s32.totalorder %s1018_s14, %s1018_s14 }
 0x1ad   : > { %p4865_p13 = scmp.lt.s32.totalorder %s4863_s11, %s4856_s26 }
 0x1ae   : > { %p4859_p6 = pnand %p4857_p5, %p5528_p4 }
 0x1af   : > { %p4866_p9 = por %p4865_p13, %p4864_p12 }
 0x1b0   : > { %p4860_p11 = pneg %p4859_p6 }
 0x1b2   : > { %p4867_p0 = pnand %p4866_p9, %p4860_p11 }
 0x1b4   : > { %4870 = shalt.err (!%p4867_p0)
}
 0x1b5   : > { %s6317_s17 = sld [smem:[#allocation72_spill]] }
 0x1b6   : > { %4220 = dma.hbm_to_vmem [thread:$0]  (!%p5516_p1), %s6316_s28, 16, %s1018_s14, [#allocation26]  }
 0x1bb   : > { %s4871_s7 = scalar_lea.hbm %s6317_s17, 16 }
 0x1bc   : > { %p4872_p2 = scmp.ne.s32.totalorder %s6317_s17, %s4871_s7  ;;  %p4878_p3 = scmp.lt.u32.totalorder %s4871_s7, %s6317_s17 }
 0x1be   : > { %p4874_p7 = pnand %p4872_p2, %p5528_p4 }
 0x1c0   : > { %p4875_p8 = pneg %p4874_p7 }
 0x1c2   : > { %p4880_p10 = pnand %p4878_p3, %p4875_p8 }
 0x1c4   : > { %4883 = shalt.err (!%p4880_p10)
}
 0x1c5   : > { %s4884_s23 = scalar_lea.vmem %s5732_s9, 16  ;;  %s4891_s26 = scalar_lea.vmem %s5732_s9, 32 }
 0x1c6   : > { %p4885_p5 = scmp.ne.s32.totalorder %s5732_s9, %s4884_s23  ;;  %p4892_p12 = scmp.lt.s32.totalorder %s5732_s9, %s5732_s9 }
 0x1c7   : > { %p4893_p13 = scmp.lt.s32.totalorder %s4891_s26, %s4884_s23 }
 0x1c8   : > { %p4887_p6 = pnand %p4885_p5, %p5528_p4 }
 0x1c9   : > { %p4894_p9 = por %p4893_p13, %p4892_p12 }
 0x1ca   : > { %p4888_p11 = pneg %p4887_p6 }
 0x1cc   : > { %p4895_p0 = pnand %p4894_p9, %p4888_p11 }
 0x1ce   : > { %4898 = shalt.err (!%p4895_p0)
}
 0x1cf   : > { %s6318_s14 = sld [smem:[#allocation73_spill]]  ;;  %s5253_s11 = smov [#allocation33]  }
 0x1d0   : > { %4226 = dma.hbm_to_vmem [thread:$0]  (!%p5516_p1), %s6317_s17, 16, %s5732_s9, [#allocation29]  }
 0x1d1   : > { %s1061_s7 = sshll.u32 %s5253_s11, 4  ;;  %s5254_s2 = smov [#allocation34]   ;;  %s1062_s7 = int_to_ptr.vmem [resolvable:$true] %s1061_s7 }
 0x1d2   : > { %s1072_s5 = sshll.u32 %s5254_s2, 4  ;;  %s5760_s5 = int_to_ptr.vmem [resolvable:$true] %s1072_s5 }
 0x1d5   : > { %s4899_s23 = scalar_lea.hbm %s6318_s14, 16 }
 0x1d6   : > { %p4900_p2 = scmp.ne.s32.totalorder %s6318_s14, %s4899_s23  ;;  %p4906_p3 = scmp.lt.u32.totalorder %s4899_s23, %s6318_s14 }
 0x1d8   : > { %p4902_p7 = pnand %p4900_p2, %p5528_p4 }
 0x1da   : > { %p4903_p8 = pneg %p4902_p7 }
 0x1dc   : > { %p4908_p10 = pnand %p4906_p3, %p4903_p8 }
 0x1de   : > { %4911 = shalt.err (!%p4908_p10)
}
 0x1df   : > { %s4912_s26 = scalar_lea.vmem %s1062_s7, 16  ;;  %s4919_s9 = scalar_lea.vmem %s1062_s7, 32 }
 0x1e0   : > { %p4913_p5 = scmp.ne.s32.totalorder %s1062_s7, %s4912_s26  ;;  %p4920_p12 = scmp.lt.s32.totalorder %s1062_s7, %s1062_s7 }
 0x1e1   : > { %p4921_p13 = scmp.lt.s32.totalorder %s4919_s9, %s4912_s26 }
 0x1e2   : > { %p4915_p6 = pnand %p4913_p5, %p5528_p4 }
 0x1e3   : > { %p4922_p9 = por %p4921_p13, %p4920_p12 }
 0x1e4   : > { %p4916_p11 = pneg %p4915_p6 }
 0x1e6   : > { %p4923_p0 = pnand %p4922_p9, %p4916_p11 }
 0x1e8   : > { %4926 = shalt.err (!%p4923_p0)
}
 0x1e9   : > { %s6319_s2 = sld [smem:[#allocation74_spill]] }
 0x1ea   : > { %4232 = dma.hbm_to_vmem [thread:$0]  (!%p5516_p1), %s6318_s14, 16, %s1062_s7, [#allocation32]  }
 0x1ef   : > { %s4927_s11 = scalar_lea.hbm %s6319_s2, 16 }
 0x1f0   : > { %p4928_p2 = scmp.ne.s32.totalorder %s6319_s2, %s4927_s11  ;;  %p4934_p3 = scmp.lt.u32.totalorder %s4927_s11, %s6319_s2 }
 0x1f2   : > { %p4930_p7 = pnand %p4928_p2, %p5528_p4 }
 0x1f4   : > { %p4931_p8 = pneg %p4930_p7 }
 0x1f6   : > { %p4936_p10 = pnand %p4934_p3, %p4931_p8 }
 0x1f8   : > { %4939 = shalt.err (!%p4936_p10)
}
 0x1f9   : > { %s4940_s23 = scalar_lea.vmem %s5760_s5, 16  ;;  %s4947_s26 = scalar_lea.vmem %s5760_s5, 32 }
 0x1fa   : > { %p4941_p5 = scmp.ne.s32.totalorder %s5760_s5, %s4940_s23  ;;  %p4948_p12 = scmp.lt.s32.totalorder %s5760_s5, %s5760_s5 }
 0x1fb   : > { %p4949_p13 = scmp.lt.s32.totalorder %s4947_s26, %s4940_s23 }
 0x1fc   : > { %p4943_p6 = pnand %p4941_p5, %p5528_p4 }
 0x1fd   : > { %p4950_p9 = por %p4949_p13, %p4948_p12 }
 0x1fe   : > { %p4944_p11 = pneg %p4943_p6 }
 0x200   : > { %p4951_p0 = pnand %p4950_p9, %p4944_p11 }
 0x202   : > { %4954 = shalt.err (!%p4951_p0)
}
 0x203   : > { %4235 = dma.hbm_to_vmem [thread:$0]  (!%p5516_p1), %s6319_s2, 16, %s5760_s5, [#allocation35]  }
 0x204   : > { %p3688_p2 = scmp.ge.s32.totalorder %s5199_s15, 3 }
 0x205   : > { %p6320_p7 = scmp.ne.s32.totalorder (!%p3688_p2), %s6307_s20, 0 }
 0x206   : > { %1091 = sbr.rel (%p3688_p2) target bundleno = 532 (0x214), region = 116 }
 0x20d   : > { %1094 = sbr.rel (!%p6320_p7) target bundleno = 532 (0x214), region = 120  ;;  %s1096_s1 = sand.u32 (%p6320_p7), 1, %s5195_s0  }
 0x20e   : > { %s3690_s7 = sshll.u32 (%p6320_p7), %s5199_s15, 2  ;;  %s3689_s9 = sshll.u32 (%p6320_p7), %s1096_s1, 4 }
 0x20f   : > { %s1100_s11 = scalar_lea.vmem (%p6320_p7), %s5404_s30, %s3690_s7  ;;  %s1098_s23 = scalar_lea.vmem (%p6320_p7), [#allocation36], %s3689_s9 }
 0x210   : > { %v1116_v1 = vld [vmem:[%s1100_s11] sm:$0xf] (%p6320_p7)  ;;  %v1118_v2 = vld [vmem:[%s1100_s11 + $0xc] sm:$0xf] (%p6320_p7)  ;;  %v1120_v3 = vld [vmem:[%s1100_s11 + $0x18] sm:$0xf] (%p6320_p7) }
 0x211   : > { %1117 = vst [vmem:[%s1098_s23] sm:$0xf] (%p6320_p7), %v1116_v1  ;;  %1119 = vst [vmem:[%s1098_s23 + $0x4] sm:$0xf] (%p6320_p7), %v1118_v2  ;;  %v1122_v4 = vld [vmem:[%s1100_s11 + $0x24] sm:$0xf] (%p6320_p7) }
 0x212   : > { %1121 = vst [vmem:[%s1098_s23 + $0x8] sm:$0xf] (%p6320_p7), %v1120_v3  ;;  %1123 = vst [vmem:[%s1098_s23 + $0xc] sm:$0xf] (%p6320_p7), %v1122_v4 }
 0x214 PF: > { %p6321_p1 = scmp.ne.s32.totalorder %s6312_s3, 0 }
 0x215   : > { %p6322_p4 = scmp.eq.s32.totalorder (!%p6321_p1), %s5472_s18, 0 }
 0x216   : > { %1163 = sbr.rel (%p6321_p1) target bundleno = 3659 (0xe4b), region = 165 }
 0x21d   : > { %5130 = dma.done.wait (%p6322_p4), [#allocation8], 128   ;;  %p6323_p8 = pmov %p6322_p4 }
 0x21e   : > { %p6324_p3 = pmov %p6322_p4 }
 0x21f   : > { %5132 = vsyncadd (%p6323_p8), [#allocation8], 4294967168 }
 0x220   : > { %5134 = dma.done.wait (%p6324_p3), [#allocation11], 256   ;;  %p6325_p10 = pmov %p6324_p3 }
 0x221   : > { %p6326_p5 = pmov %p6324_p3 }
 0x222   : > { %5136 = vsyncadd (%p6325_p10), [#allocation11], 4294967040 }
 0x223   : > { %5138 = dma.done.wait (%p6326_p5), [#allocation14], 2176   ;;  %p6327_p6 = pmov %p6324_p3 }
 0x224   : > { %p6328_p11 = pmov %p6324_p3 }
 0x225   : > { %5140 = vsyncadd (%p6327_p6), [#allocation14], 4294965120 }
 0x226   : > { %5142 = dma.done.wait (%p6328_p11), [#allocation17], 640   ;;  %p6329_p12 = pmov %p6324_p3 }
 0x227   : > { %p6330_p13 = pmov %p6324_p3 }
 0x228   : > { %5144 = vsyncadd (%p6329_p12), [#allocation17], 4294966656 }
 0x229   : > { %5146 = dma.done.wait (%p6330_p13), [#allocation20], 528   ;;  %p6331_p9 = pmov %p6324_p3 }
 0x22a   : > { %p6332_p0 = pmov %p6324_p3 }
 0x22b   : > { %5148 = vsyncadd (%p6331_p9), [#allocation20], 4294966768 }
 0x22c   : > { %5150 = dma.done.wait (%p6332_p0), [#allocation23], 528   ;;  %p6333_p2 = pmov %p6332_p0 }
 0x22d   : > { %p6334_p7 = pmov %p6332_p0 }
 0x22e   : > { %5152 = vsyncadd (%p6333_p2), [#allocation23], 4294966768 }
 0x22f   : > { %5154 = dma.done.wait (%p6334_p7), [#allocation26], 528   ;;  %p6335_p1 = pmov %p6332_p0 }
 0x230   : > { %p6336_p4 = pmov %p6332_p0 }
 0x231   : > { %5156 = vsyncadd (%p6335_p1), [#allocation26], 4294966768 }
 0x232   : > { %5158 = dma.done.wait (%p6336_p4), [#allocation29], 32   ;;  %p6337_p8 = pmov %p6332_p0 }
 0x233   : > { %p6338_p3 = pmov %p6332_p0 }
 0x234   : > { %5160 = vsyncadd (%p6337_p8), [#allocation29], 4294967264 }
 0x235   : > { %5162 = dma.done.wait (%p6338_p3), [#allocation32], 32   ;;  %p6339_p10 = pmov %p6332_p0 }
 0x236   : > { %p6340_p5 = pmov %p6332_p0 }
 0x237   : > { %5164 = vsyncadd (%p6339_p10), [#allocation32], 4294967264 }
 0x238   : > { %5166 = dma.done.wait (%p6340_p5), [#allocation35], 16   ;;  %p6341_p6 = pmov %p6332_p0 }
 0x239   : > { %s5837_s6 = sand.u32 1, %s5191_s4   ;;  %p1326_p11 = scmp.lt.s32.totalorder %s5472_s18, 2 }
 0x23a   : > { %5168 = vsyncadd (%p6341_p6), [#allocation35], 4294967280  ;;  %s3710_s20 = sshll.u32 %s5837_s6, 4  ;;  %s3711_s3 = sshll.u32 %s5837_s6, 3 }
 0x23b   : > { %s5843_s26 = scalar_select %p1326_p11, %s5472_s18, 2 }
 0x23c   : > { %s5847_s7 = scalar_lea.vmem [#allocation36], %s3710_s20  ;;  %s5849_s9 = scalar_lea.vmem [#allocation44], %s3711_s3 }
 0x23d   : > { %p6343_p12 = scmp.ne.s32.totalorder %s5472_s18, 0 }
 0x23e   : > { %s6344_s11 = sld [smem:[#allocation65_spill]] (!%p6343_p12)  ;;  %v5255_v8 = vmov (!%p6343_p12), 0.0|0.0   ;;  %v1344_v11 = vld [vmem:[#allocation18] sm:$0xff] (!%p6343_p12)  ;;  %v1345_v12 = vld [vmem:[#allocation18 + $0x8] sm:$0xff] (!%p6343_p12)  ;;  %v1346_v14 = vld [vmem:[#allocation18 + $0x10] sm:$0xff] (!%p6343_p12)  ;;  %vm5256_vm0 = vmmov (!%p6343_p12), 0  }
 0x23f   : > { %1333 = sbr.rel (%p6343_p12) target bundleno = 2800 (0xaf0), region = 245  ;;  %4009 = vmatprep.subr.bf16.mxu1 (!%p6343_p12), %v5255_v8  ;;  %4003 = vmatprep.subr.bf16.mxu0 (!%p6343_p12), %v5255_v8  ;;  %v4004_v13 = vpack.c.bf16 (!%p6343_p12), %v1345_v12, %v1344_v11  ;;  %v5257_v15 = vmov (!%p6343_p12), 0.0   ;;  %v1347_v17 = vld [vmem:[#allocation18 + $0x18] sm:$0xff] (!%p6343_p12)  ;;  %v1509_v21 = vld [vmem:[#allocation22] sm:$0xff] (!%p6343_p12)  ;;  %v1510_v22 = vld [vmem:[#allocation22 + $0x8] sm:$0xff] (!%p6343_p12)  ;;  %vm1348_vm1 = vcmask (!%p6343_p12), 261120  }
 0x240   : > { %3843 = vmatprep.mubr.msk.f32.mxu0 (!%p6343_p12), %vm5256_vm0, %v5257_v15  ;;  %3862 = vmatprep.mubr.msk.f32.mxu1 (!%p6343_p12), %vm5256_vm0, %v5257_v15  ;;  %v4007_v20 = vpack.c.bf16 (!%p6343_p12), %v1347_v17, %v1346_v14  ;;  %v1343_v26 = vld [vmem:[#allocation7] sm:$0xff] (!%p6343_p12)  ;;  %v4022_v27 = vpack.c.bf16 (!%p6343_p12), %v1510_v22, %v1509_v21  ;;  %v1504_v32 = vld [vmem:[#allocation21] sm:$0xff] (!%p6343_p12)  ;;  %v1505_v33 = vld [vmem:[#allocation21 + $0x8] sm:$0xff] (!%p6343_p12)  ;;  %vm1422_vm2 = vcmask (!%p6343_p12), 523264   ;;  %s5258_s23 = smov (!%p6343_p12), 64   ;;  %s5259_s5 = smov (!%p6343_p12), 32  }
 0x241   : > { %4005 = vmatpush3.bf16.msra.mxu0 (!%p6343_p12), %v4004_v13  ;;  %v1511_v28 = vld [vmem:[#allocation22 + $0x10] sm:$0xff] (!%p6343_p12)  ;;  %v1512_v29 = vld [vmem:[#allocation22 + $0x18] sm:$0xff] (!%p6343_p12)  ;;  %v1508_v35 = vld [vmem:[#allocation12] sm:$0xff] (!%p6343_p12)  ;;  %v4028_v36 = vpack.c.bf16 (!%p6343_p12), %v1505_v33, %v1504_v32  ;;  %s6345_s20 = sld [smem:[#allocation69_spill]] (!%p6343_p12)  ;;  %s5260_s3 = smov (!%p6343_p12), 96   ;;  %vm2100_vm3 = vcmask (!%p6343_p12), 130112  }
 0x242   : > { %4006 = vmatprep.subr.bf16.mxu0 (!%p6343_p12), %v5255_v8  ;;  %v4025_v31 = vpack.c.bf16 (!%p6343_p12), %v1512_v29, %v1511_v28  ;;  %v1334_v34 = vld [vmem:[#allocation10] sm:$0xff] (!%p6343_p12)  ;;  %v1506_v37 = vld [vmem:[#allocation21 + $0x10] sm:$0xff] (!%p6343_p12)  ;;  %vm2165_vm4 = vcmask (!%p6343_p12), 1041409   ;;  %vm2167_vm5 = vcmask (!%p6343_p12), 1042434   ;;  %vm2169_vm6 = vcmask (!%p6343_p12), 1043459   ;;  %s6349_s1 = sld [smem:[#allocation77_spill]] (!%p6343_p12) }
 0x243   : > { %v1507_v38 = vld [vmem:[#allocation21 + $0x18] sm:$0xff] (!%p6343_p12)  ;;  %v3718_v50 = vld [vmem:[#allocation24] ss:$0 sm:$0xff] (!%p6343_p12)  ;;  %v1674_v55 = vld [vmem:[#allocation13] sm:$0xff] (!%p6343_p12)  ;;  %vm2171_vm7 = vcmask (!%p6343_p12), 1044484   ;;  %vm2173_vm8 = vcmask (!%p6343_p12), 1045509  }
 0x244   : > { %v1335_v5 = vld [vmem:[%s6344_s11] sm:$0xff] (!%p6343_p12)  ;;  %v1336_v6 = vld [vmem:[%s6344_s11 + $0x8] sm:$0xff] (!%p6343_p12)  ;;  %v1337_v7 = vld [vmem:[%s6344_s11 + $0x10] sm:$0xff] (!%p6343_p12)  ;;  %v4031_v39 = vpack.c.bf16 (!%p6343_p12), %v1507_v38, %v1506_v37  ;;  %vm2175_vm9 = vcmask (!%p6343_p12), 1046534   ;;  %vm2177_vm10 = vcmask (!%p6343_p12), 1047559   ;;  %vm2181_vm12 = vcmask (!%p6343_p12), 130048  }
 0x245   : > { %v4010_v9 = vpack.c.bf16 (!%p6343_p12), %v1336_v6, %v1335_v5  ;;  %v1338_v10 = vld [vmem:[%s6344_s11 + $0x18] sm:$0xff] (!%p6343_p12)  ;;  %v1339_v18 = vld [vmem:[%s6344_s11 + $0x20] sm:$0xff] (!%p6343_p12)  ;;  %v1340_v19 = vld [vmem:[%s6344_s11 + $0x28] sm:$0xff] (!%p6343_p12)  ;;  %4008 = vmatpush3.bf16.msra.mxu0 (!%p6343_p12), %v4007_v20  ;;  %vm3129_vm13 = vcmask (!%p6343_p12), 7168  }
 0x246   : > { %v4013_v16 = vpack.c.bf16 %v1338_v10, %v1337_v7  ;;  %v4016_v23 = vpack.c.bf16 %v1340_v19, %v1339_v18  ;;  %v1341_v24 = vld [vmem:[%s6344_s11 + $0x30] sm:$0xff]  ;;  %v1342_v25 = vld [vmem:[%s6344_s11 + $0x38] sm:$0xff]  ;;  %4021 = vmatprep.subr.bf16.mxu0 %v5255_v8  ;;  %v3715_v43 = vld [vmem:[#allocation19] ss:$0 sm:$0xff]  ;;  %3142 = vst.msk [vmem:[#allocation5] sm:$0xff] %vm3129_vm13, %v5257_v15 }
 0x247   : > { %4011 = vmatpush3.bf16.msra.mxu1 %v4010_v9  ;;  %v4019_v30 = vpack.c.bf16 %v1342_v25, %v1341_v24  ;;  %v1700_v62 = vld [vmem:[#allocation25] sm:$0xff]  ;;  %v1701_v63 = vld [vmem:[#allocation25 + $0x8] sm:$0xff]  ;;  %v1702_v0 = vld [vmem:[#allocation25 + $0x10] sm:$0xff]  ;;  %v1883_v25 = vlaneseq }
 0x248   : > { %4012 = vmatprep.subr.bf16.mxu1 %v5255_v8  ;;  %3844 = vmatmul.mubr.msk.f32.vlgmr.msra.gmra.mrb[0].mxu0 %vm1348_vm1, %v1343_v26  ;;  %v4034_v1 = vpack.c.bf16 %v1701_v63, %v1700_v62  ;;  %v1703_v2 = vld [vmem:[#allocation25 + $0x18] sm:$0xff]  ;;  %v1698_v11 = vld [vmem:[%s6345_s20 + $0x10] sm:$0xff]  ;;  %v1699_v13 = vld [vmem:[%s6345_s20 + $0x18] sm:$0xff] }
 0x249   : > { %4023 = vmatpush3.bf16.msra.mxu0 %v4022_v27  ;;  %3873 = vmatprep.mubr.msk.f32.mxu0 %vm5256_vm0, %v5257_v15  ;;  %v4037_v3 = vpack.c.bf16 %v1703_v2, %v1702_v0  ;;  %v1696_v9 = vld [vmem:[%s6345_s20] sm:$0xff]  ;;  %v1697_v10 = vld [vmem:[%s6345_s20 + $0x8] sm:$0xff]  ;;  %v4043_v14 = vpack.c.bf16 %v1699_v13, %v1698_v11  ;;  %v5926_v27 = vshrl.u32 %v1883_v25, 7 }
 0x24a   : > { %4024 = vmatprep.subr.bf16.mxu0 %v5255_v8  ;;  %v4040_v12 = vpack.c.bf16 %v1697_v10, %v1696_v9  ;;  %v3722_v29 = vld [vmem:[#allocation27] ss:$0 sm:$0xff]  ;;  %v1872_v9 = vld [vmem:[#allocation15 + $0x50] sm:$0xff] }
 0x24b   : > { %4014 = vmatpush3.bf16.msra.mxu1 %v4013_v16 }
 0x24c   : > { %4015 = vmatprep.subr.bf16.mxu1 %v5255_v8 }
 0x24d   : > { %4026 = vmatpush3.bf16.msra.mxu0 %v4025_v31 }
 0x24e   : > { %4027 = vmatprep.subr.bf16.mxu0 %v5255_v8 }
 0x24f   : > { %4017 = vmatpush3.bf16.msra.mxu1 %v4016_v23  ;;  %v5261_v23 = vmov 1966171168  }
 0x250   : > { %4018 = vmatprep.subr.bf16.mxu1 %v5255_v8  ;;  %3874 = vmatmul.mubr.msk.f32.vlgmr.msra.gmra.mrb[2].mxu0 %vm1348_vm1, %v1508_v35  ;;  %v1881_v24 = vunpack.c.l.s4 %v5261_v23 }
 0x251   : > { %4029 = vmatpush3.bf16.msra.mxu0 %v4028_v36  ;;  %3884 = vmatprep.mubr.msk.f32.mxu0 %vm5256_vm0, %v5257_v15  ;;  %v1930_v36 = vsub.s32 0, %v5926_v27 }
 0x252   : > { %4030 = vmatprep.subr.bf16.mxu0 %v5255_v8  ;;  %v1882_v26 = vunpack.c.0.s8 %v1881_v24 }
 0x253   : > { %4020 = vmatpush3.bf16.msra.mxu1 %v4019_v30 }
 0x254   : > { %4033 = vmatprep.subr.bf16.mxu1 %v5255_v8  ;;  %v5929_v31 = vsub.s32 %v1882_v26, %v5926_v27 }
 0x255   : > { %4032 = vmatpush3.bf16.msra.mxu0 %v4031_v39 }
 0x256   : > { %3863 = vmatmul.mubr.msk.f32.vlgmr.msra.gmra.mrb[0].mxu1 %vm1422_vm2, %v1334_v34  ;;  %4039 = vmatprep.subr.bf16.mxu0 %v5255_v8 }
 0x257   : > { %3895 = vmatprep.mubr.msk.f32.mxu1 %vm5256_vm0, %v5257_v15  ;;  %4035 = vmatpush3.bf16.msra.mxu1 %v4034_v1  ;;  %v1868_v1 = vld [vmem:[#allocation15 + $0x30] sm:$0xff] }
 0x258   : > { %4036 = vmatprep.subr.bf16.mxu1 %v5255_v8 }
 0x25b   : > { %4038 = vmatpush3.bf16.msra.mxu1 %v4037_v3  ;;  %v1871_v3 = vld [vmem:[#allocation15 + $0x48] sm:$0xff] }
 0x25c   : > { %4045 = vmatprep.subr.bf16.mxu1 %v5255_v8 }
 0x31b   : > { %v1418_v40 = vpop.f32.mrb[0].mxu0 }
 0x31c   : > { %v3845_v41 = vpop.f32.mrb[1].mxu0 }
 0x31d   : > { %v1863_v41 = vld [vmem:[#allocation15 + $0x8] sm:$0xff] }
 0x323   : > { %v1582_v46 = vpop.f32.mrb[2].mxu0 }
 0x324   : > { %v3875_v47 = vpop.f32.mrb[3].mxu0 }
 0x325   : > { %v1865_v47 = vld [vmem:[#allocation15 + $0x18] sm:$0xff] }
 0x329   : > { %v1492_v42 = vpop.f32.mrb[0].mxu1 }
 0x32a   : > { %v1493_v44 = vadd.f32 %v1492_v42, %v1418_v40  ;;  %v3864_v45 = vpop.f32.mrb[1].mxu1  ;;  %v1862_v40 = vld [vmem:[#allocation15] sm:$0xff] }
 0x32c   : > { %v5886_v48 = vadd.f32 %v3715_v43, %v1493_v44 }
 0x32e   : > { %3885 = vmatmul.mubr.msk.f32.vlgmr.msra.gmra.mrb[4].mxu0 %vm1348_vm1, %v5886_v48 }
 0x32f   : > { %3906 = vmatprep.mubr.msk.f32.mxu0 %vm5256_vm0, %v5257_v15  ;;  %4041 = vmatpush3.bf16.msra.mxu0 %v4040_v12  ;;  %v5938_v12 = vld [vmem:[#allocation28] ss:$0 sm:$0xff] }
 0x330   : > { %4042 = vmatprep.subr.bf16.mxu0 %v5255_v8 }
 0x333   : > { %4044 = vmatpush3.bf16.msra.mxu0 %v4043_v14 }
 0x334   : > { %4057 = vmatprep.subr.bf16.mxu0 %v5255_v8 }
 0x401   : > { %v1655_v49 = vpop.f32.mrb[4].mxu0 }
 0x402   : > { %v1656_v51 = vadd.f32 %v1655_v49, %v1582_v46  ;;  %v3886_v52 = vpop.f32.mrb[5].mxu0  ;;  %v1864_v46 = vld [vmem:[#allocation15 + $0x10] sm:$0xff] }
 0x404   : > { %v1666_v53 = vadd.f32 %v3718_v50, %v1656_v51  ;;  %v1866_v51 = vld [vmem:[#allocation15 + $0x20] sm:$0xff] }
 0x406   : > { %4392 = vtanh.f32 %v1666_v53  ;;  %v3719_v56 = vmul.f32 -1.442695, %v1666_v53 }
 0x408   : > { %4394 = vpow2.f32 %v3719_v56 }
 0x410   : > { %v4393_v54 = vpop.eup %4392 }
 0x411   : > { %1681 = vrot.lane.b32.xlu0 %v4393_v54, %s5258_s23 }
 0x412   : > { %v4395_v57 = vpop.eup %4394 }
 0x413   : > { %v1670_v58 = vadd.f32 1.0, %v4395_v57  ;;  %v1870_v57 = vld [vmem:[#allocation15 + $0x40] sm:$0xff] }
 0x415   : > { %1676 = vrot.lane.b32.xlu0 %v1674_v55, %s5259_s5  ;;  %4396 = vrcp.f32 %v1670_v58 }
 0x41f   : > { %v4397_v59 = vpop.eup %4396 }
 0x483   : > { %v1682_v60 = vpop.permute.xlu0 %1681 }
 0x484   : > { %v1684_v61 = vmul.f32 %v4397_v59, %v1682_v60 }
 0x486   : > { %1686 = vrot.lane.b32.xlu1 %v1684_v61, %s5259_s5  ;;  %v1867_v61 = vld [vmem:[#allocation15 + $0x28] sm:$0xff] }
 0x487   : > { %v1677_v4 = vpop.permute.xlu0 %1676 }
 0x488   : > { %v1679_v5 = vmul.f32 %v4397_v59, %v1677_v4 }
 0x4f8   : > { %v1687_v6 = vpop.permute.xlu1 %1686 }
 0x4f9   : > { %v5897_v7 = vadd.f32 %v1687_v6, %v1679_v5 }
 0x4fb   : > { %4398 = vtanh.f32 %v5897_v7  ;;  %1705 = vrot.lane.b32.xlu0 %v5897_v7, %s5260_s3 }
 0x505   : > { %v4399_v16 = vpop.eup %4398 }
 0x506   : > { %1692 = vrot.lane.b32.xlu1 %v4399_v16, %s5258_s23  ;;  %v1869_v16 = vld [vmem:[#allocation15 + $0x38] sm:$0xff]  ;;  %s6346_s23 = sld [smem:[#allocation64_spill]] }
 0x56d   : > { %v1706_v17 = vpop.permute.xlu0 %1705 }
 0x56e   : > { %3125 = vst.msk [vmem:[#allocation38] sm:$0xff] %vm1348_vm1, %v1706_v17  ;;  %3896 = vmatmul.mubr.msk.f32.vlgmr.msra.gmra.mrb[2].mxu1 %vm1348_vm1, %v1706_v17 }
 0x56f   : > { %3913 = vmatprep.mubr.msk.f32.mxu1 %vm5256_vm0, %v5257_v15 }
 0x578   : > { %v1693_v18 = vpop.permute.xlu1 %1692 }
 0x579   : > { %v5913_v19 = vmul.f32 %v4397_v59, %v1693_v18  ;;  %v1874_v18 = vld [vmem:[#allocation15 + $0x60] sm:$0xff] }
 0x57b   : > { %1780 = vrot.lane.b32.xlu1 %v5913_v19, %s5259_s5 }
 0x5ed   : > { %v5917_v20 = vpop.permute.xlu1 %1780 }
 0x5ee   : > { %3123 = vst.msk [vmem:[#allocation37] sm:$0xff] %vm1348_vm1, %v5917_v20  ;;  %3907 = vmatmul.mubr.msk.f32.vlgmr.msra.gmra.mrb[6].mxu0 %vm1348_vm1, %v5917_v20 }
 0x5ef   : > { %3941 = vmatprep.mubr.msk.f32.mxu0 %vm5256_vm0, %v5257_v15 }
 0x641   : > { %v1775_v21 = vpop.f32.mrb[2].mxu1 }
 0x642   : > { %v3897_v22 = vpop.f32.mrb[3].mxu1 }
 0x6c1   : > { %v1850_v28 = vpop.f32.mrb[6].mxu0 }
 0x6c2   : > { %v1851_v30 = vadd.f32 %v1850_v28, %v1775_v21  ;;  %v3908_v32 = vpop.f32.mrb[7].mxu0 }
 0x6c4   : > { %v1861_v33 = vadd.f32 %v3722_v29, %v1851_v30 }
 0x6c6   : > { %v1879_v34 = vcombine.high %v1861_v33, %v1861_v33  ;;  %v1886_v35 = vrot.slane %v1861_v33, %v5929_v31 }
 0x6c8   : > { %v1893_v37 = vrot.slane %v1879_v34, %v5929_v31  ;;  %v1894_v38 = vcombine.high %v1886_v35, %v1886_v35  ;;  %v1902_v39 = vrot.slane %v1886_v35, %v5929_v31  ;;  %v1873_v34 = vld [vmem:[#allocation15 + $0x58] sm:$0xff] }
 0x6ca   : > { %v1909_v42 = vrot.slane %v1893_v37, %v5929_v31  ;;  %v1916_v43 = vrot.slane %v1894_v38, %v5929_v31  ;;  %v1924_v44 = vcombine.high %v1902_v39, %v1902_v39  ;;  %v1931_v45 = vrot.slane %v1902_v39, %v1930_v36  ;;  %v1876_v38 = vld [vmem:[#allocation15 + $0x70] sm:$0xff] }
 0x6cb   : > { %v1895_v49 = vcombine.high %v1893_v37, %v1893_v37 }
 0x6cc   : > { %v1935_v50 = vrot.slane %v1916_v43, %v1930_v36  ;;  %v1926_v52 = vcombine.high %v1916_v43, %v1916_v43  ;;  %v1939_v53 = vrot.slane %v1924_v44, %v1930_v36  ;;  %v1968_v54 = vadd.f32 %v1931_v45, %v1862_v40  ;;  %v1875_v44 = vld [vmem:[#allocation15 + $0x68] sm:$0xff] }
 0x6cd   : > { %v1969_v55 = vadd.f32 %v1931_v45, %v1863_v41  ;;  %v1947_v56 = vrot.slane %v1909_v42, %v1930_v36  ;;  %v1923_v62 = vrot.slane %v1895_v49, %v5929_v31  ;;  %v1925_v4 = vcombine.high %v1909_v42, %v1909_v42 }
 0x6ce   : > { %v1970_v58 = vadd.f32 %v1935_v50, %v1864_v46  ;;  %v1971_v59 = vadd.f32 %v1935_v50, %v1865_v47  ;;  %v1972_v60 = vadd.f32 %v1939_v53, %v1866_v51  ;;  %4400 = vtanh.f32 %v1968_v54 }
 0x6cf   : > { %v1943_v63 = vrot.slane %v1926_v52, %v1930_v36  ;;  %4402 = vtanh.f32 %v1969_v55  ;;  %v1976_v0 = vadd.f32 %v1947_v56, %v1870_v57  ;;  %v1973_v2 = vadd.f32 %v1939_v53, %v1867_v61  ;;  %v1877_v53 = vld [vmem:[#allocation15 + $0x78] sm:$0xff] }
 0x6d0   : > { %4404 = vtanh.f32 %v1970_v58  ;;  %v1951_v5 = vrot.slane %v1923_v62, %v1930_v36  ;;  %v1927_v10 = vcombine.high %v1923_v62, %v1923_v62  ;;  %v1977_v11 = vadd.f32 %v1947_v56, %v1871_v3 }
 0x6d1   : > { %4406 = vtanh.f32 %v1971_v59  ;;  %v1974_v6 = vadd.f32 %v1943_v63, %v1868_v1  ;;  %v1955_v13 = vrot.slane %v1925_v4, %v1930_v36  ;;  %v1975_v28 = vadd.f32 %v1943_v63, %v1869_v16 }
 0x6d2   : > { %4408 = vtanh.f32 %v1972_v60  ;;  %v1978_v14 = vadd.f32 %v1951_v5, %v1872_v9  ;;  %v1959_v24 = vrot.slane %v1927_v10, %v1930_v36  ;;  %v1979_v40 = vadd.f32 %v1951_v5, %v1873_v34 }
 0x6d3   : > { %4410 = vtanh.f32 %v1976_v0  ;;  %v1980_v33 = vadd.f32 %v1955_v13, %v1874_v18  ;;  %v1981_v50 = vadd.f32 %v1955_v13, %v1875_v44  ;;  %v2090_v34 = vand.u32 127, %v1883_v25 }
 0x6d4   : > { %4412 = vtanh.f32 %v1973_v2  ;;  %v1982_v43 = vadd.f32 %v1959_v24, %v1876_v38  ;;  %v1983_v58 = vadd.f32 %v1959_v24, %v1877_v53 }
 0x6d5   : > { %4414 = vtanh.f32 %v1974_v6  ;;  %v2095_v38 = vadd.s32 4294967288, %v2090_v34 }
 0x6d6   : > { %4416 = vtanh.f32 %v1977_v11 }
 0x6d7   : > { %4418 = vtanh.f32 %v1978_v14 }
 0x6d8   : > { %v4401_v17 = vpop.eup %4400  ;;  %4420 = vtanh.f32 %v1975_v28 }
 0x6d9   : > { %v4403_v21 = vpop.eup %4402  ;;  %v2007_v22 = vmul.f32 %v4401_v17, %v5938_v12  ;;  %4422 = vtanh.f32 %v1980_v33 }
 0x6da   : > { %v4405_v23 = vpop.eup %4404  ;;  %v2008_v26 = vmul.f32 %v4403_v21, %v5938_v12  ;;  %4424 = vtanh.f32 %v1979_v40  ;;  %v2098_v40 = vsub.s32 %v2095_v38, %v5926_v27 }
 0x6db   : > { %v4407_v29 = vpop.eup %4406  ;;  %v2023_v30 = vsel %vm1422_vm2, %v2007_v22, 0.0  ;;  %v2009_v32 = vmul.f32 %v4405_v23, %v5938_v12  ;;  %4426 = vtanh.f32 %v1982_v43 }
 0x6dc   : > { %v4409_v35 = vpop.eup %4408  ;;  %v2026_v37 = vsel %vm1422_vm2, %v2008_v26, 0.0  ;;  %2024 = vadd.xlane.f32.xlu0 %v2023_v30  ;;  %v2010_v42 = vmul.f32 %v4407_v29, %v5938_v12  ;;  %4428 = vtanh.f32 %v1981_v50 }
 0x6dd   : > { %2027 = vadd.xlane.f32.xlu1 %v2026_v37  ;;  %v2011_v36 = vmul.f32 %v4409_v35, %v5938_v12  ;;  %v4411_v39 = vpop.eup %4410  ;;  %v2029_v41 = vsel %vm1422_vm2, %v2009_v32, 0.0  ;;  %4430 = vtanh.f32 %v1983_v58 }
 0x6de   : > { %v4413_v45 = vpop.eup %4412  ;;  %v2015_v47 = vmul.f32 %v4411_v39, %v5938_v12  ;;  %v2032_v51 = vsel %vm1422_vm2, %v2010_v42, 0.0 }
 0x6df   : > { %v2035_v46 = vsel %vm1422_vm2, %v2011_v36, 0.0  ;;  %v4415_v49 = vpop.eup %4414  ;;  %v2012_v52 = vmul.f32 %v4413_v45, %v5938_v12 }
 0x6e0   : > { %2030 = vadd.xlane.f32.xlu0 %v2029_v41  ;;  %v4417_v54 = vpop.eup %4416  ;;  %v2047_v55 = vsel %vm1422_vm2, %v2015_v47, 0.0  ;;  %v2013_v56 = vmul.f32 %v4415_v49, %v5938_v12 }
 0x6e1   : > { %2036 = vadd.xlane.f32.xlu1 %v2035_v46  ;;  %v4419_v57 = vpop.eup %4418  ;;  %v2038_v59 = vsel %vm1422_vm2, %v2012_v52, 0.0  ;;  %v2016_v60 = vmul.f32 %v4417_v54, %v5938_v12 }
 0x6e2   : > { %v4421_v61 = vpop.eup %4420  ;;  %v2041_v62 = vsel %vm1422_vm2, %v2013_v56, 0.0  ;;  %v2017_v63 = vmul.f32 %v4419_v57, %v5938_v12 }
 0x6e3   : > { %v4423_v0 = vpop.eup %4422  ;;  %v2050_v1 = vsel %vm1422_vm2, %v2016_v60, 0.0  ;;  %v2014_v2 = vmul.f32 %v4421_v61, %v5938_v12 }
 0x6e4   : > { %2033 = vadd.xlane.f32.xlu0 %v2032_v51  ;;  %v4425_v3 = vpop.eup %4424  ;;  %v2053_v4 = vsel %vm1422_vm2, %v2017_v63, 0.0  ;;  %v2019_v5 = vmul.f32 %v4423_v0, %v5938_v12 }
 0x6e5   : > { %2048 = vadd.xlane.f32.xlu1 %v2047_v55  ;;  %v4427_v6 = vpop.eup %4426  ;;  %v2044_v9 = vsel %vm1422_vm2, %v2014_v2, 0.0  ;;  %v2018_v10 = vmul.f32 %v4425_v3, %v5938_v12  ;;  %v2071_v3 = vld [vmem:[#allocation16] sm:$0xff] }
 0x6e6   : > { %v4429_v11 = vpop.eup %4428  ;;  %v2059_v13 = vsel %vm1422_vm2, %v2019_v5, 0.0  ;;  %v2021_v14 = vmul.f32 %v4427_v6, %v5938_v12  ;;  %vm2072_vm11 = vcmp.gt.f32.partialorder %v2071_v3, 0.5  ;;  %v2257_v3 = vld [vmem:[%s6346_s23 + $0x70] sm:$0xff] }
 0x6e7   : > { %v2056_v16 = vsel %vm1422_vm2, %v2018_v10, 0.0  ;;  %v2020_v17 = vmul.f32 %v4429_v11, %v5938_v12  ;;  %v4431_v18 = vpop.eup %4430 }
 0x6e8   : > { %2039 = vadd.xlane.f32.xlu0 %v2038_v59  ;;  %v2065_v21 = vsel %vm1422_vm2, %v2021_v14, 0.0  ;;  %v2022_v23 = vmul.f32 %v4431_v18, %v5938_v12  ;;  %v2093_v12 = vsub.s32 %v2090_v34, %v5926_v27  ;;  %v2243_v34 = vld [vmem:[%s6346_s23] sm:$0xff] }
 0x6e9   : > { %2042 = vadd.xlane.f32.xlu1 %v2041_v62  ;;  %v2062_v22 = vsel %vm1422_vm2, %v2020_v17, 0.0 }
 0x6ea   : > { %v2068_v24 = vsel %vm1422_vm2, %v2022_v23, 0.0 }
 0x6ec   : > { %2051 = vadd.xlane.f32.xlu0 %v2050_v1 }
 0x6ed   : > { %2054 = vadd.xlane.f32.xlu1 %v2053_v4 }
 0x6f0   : > { %2045 = vadd.xlane.f32.xlu0 %v2044_v9 }
 0x6f1   : > { %2060 = vadd.xlane.f32.xlu1 %v2059_v13 }
 0x6f4   : > { %2057 = vadd.xlane.f32.xlu0 %v2056_v16 }
 0x6f5   : > { %2066 = vadd.xlane.f32.xlu1 %v2065_v21 }
 0x6f8   : > { %2063 = vadd.xlane.f32.xlu0 %v2062_v22  ;;  %v3733_v22 = vld [vmem:[#allocation31] ss:$0 sm:$0xff] }
 0x6fc   : > { %2069 = vadd.xlane.f32.xlu0 %v2068_v24 }
 0x769   : > { %v2025_v26 = vpop.xlane.xlu0 %2024 }
 0x76a   : > { %v2028_v28 = vpop.xlane.xlu1 %2027  ;;  %v2094_v45 = vrot.slane %v2025_v26, %v2093_v12 }
 0x76b   : > { %v2099_v44 = vrot.slane %v2028_v28, %v2098_v40 }
 0x76d   : > { %v2031_v29 = vpop.xlane.xlu0 %2030  ;;  %v2101_v27 = vsel %vm2100_vm3, %v2099_v44, %v2094_v45  ;;  %v2246_v44 = vld [vmem:[%s6346_s23 + $0x18] sm:$0xff] }
 0x76e   : > { %v2037_v30 = vpop.xlane.xlu1 %2036  ;;  %v2105_v46 = vrot.slane %v2031_v29, %v2093_v12 }
 0x76f   : > { %v2114_v49 = vrot.slane %v2037_v30, %v2093_v12 }
 0x771   : > { %v2034_v32 = vpop.xlane.xlu0 %2033 }
 0x772   : > { %v2049_v33 = vpop.xlane.xlu1 %2048  ;;  %v2109_v42 = vrot.slane %v2034_v32, %v2098_v40 }
 0x773   : > { %v2132_v62 = vrot.slane %v2049_v33, %v2093_v12  ;;  %v3734_v33 = vld [vmem:[#allocation33] ss:$0 sm:$0xff] }
 0x774   : > { %v2110_v51 = vsel %vm2100_vm3, %v2109_v42, %v2105_v46 }
 0x775   : > { %v2040_v35 = vpop.xlane.xlu0 %2039  ;;  %v2166_v56 = vsel %vm2165_vm4, %v2110_v51, %v2101_v27 }
 0x776   : > { %v2043_v37 = vpop.xlane.xlu1 %2042  ;;  %v2118_v43 = vrot.slane %v2040_v35, %v2098_v40  ;;  %v2244_v35 = vld [vmem:[%s6346_s23 + $0x8] sm:$0xff] }
 0x777   : > { %v2123_v52 = vrot.slane %v2043_v37, %v2093_v12  ;;  %v2251_v37 = vld [vmem:[%s6346_s23 + $0x40] sm:$0xff]  ;;  %v4046_v38 = vpack.c.bf16 %v2244_v35, %v2243_v34 }
 0x778   : > { %v2119_v53 = vsel %vm2100_vm3, %v2118_v43, %v2114_v49  ;;  %v2245_v43 = vld [vmem:[%s6346_s23 + $0x10] sm:$0xff]  ;;  %v2256_v49 = vld [vmem:[%s6346_s23 + $0x68] sm:$0xff] }
 0x779   : > { %v2052_v36 = vpop.xlane.xlu0 %2051  ;;  %v2168_v59 = vsel %vm2167_vm5, %v2119_v53, %v2166_v56  ;;  %4047 = vmatpush3.bf16.msra.mxu1 %v4046_v38  ;;  %v2248_v53 = vld [vmem:[%s6346_s23 + $0x28] sm:$0xff] }
 0x77a   : > { %v2055_v39 = vpop.xlane.xlu1 %2054  ;;  %v2136_v57 = vrot.slane %v2052_v36, %v2098_v40  ;;  %v2252_v36 = vld [vmem:[%s6346_s23 + $0x48] sm:$0xff]  ;;  %4048 = vmatprep.subr.bf16.mxu1 %v5255_v8 }
 0x77b   : > { %v2141_v60 = vrot.slane %v2055_v39, %v2093_v12  ;;  %v4058_v39 = vpack.c.bf16 %v2252_v36, %v2251_v37 }
 0x77c   : > { %v2137_v4 = vsel %vm2100_vm3, %v2136_v57, %v2132_v62  ;;  %v2249_v57 = vld [vmem:[%s6346_s23 + $0x30] sm:$0xff] }
 0x77d   : > { %v2046_v41 = vpop.xlane.xlu0 %2045  ;;  %4059 = vmatpush3.bf16.msra.mxu0 %v4058_v39  ;;  %v2253_v62 = vld [vmem:[%s6346_s23 + $0x50] sm:$0xff] }
 0x77e   : > { %v2127_v47 = vrot.slane %v2046_v41, %v2098_v40  ;;  %v2061_v50 = vpop.xlane.xlu1 %2060  ;;  %4063 = vmatprep.subr.bf16.mxu0 %v5255_v8 }
 0x77f   : > { %v2150_v0 = vrot.slane %v2061_v50, %v2093_v12 }
 0x780   : > { %v2128_v54 = vsel %vm2100_vm3, %v2127_v47, %v2123_v52  ;;  %v2255_v47 = vld [vmem:[%s6346_s23 + $0x60] sm:$0xff] }
 0x781   : > { %v2058_v25 = vpop.xlane.xlu0 %2057  ;;  %v2170_v63 = vsel %vm2169_vm6, %v2128_v54, %v2168_v59  ;;  %v2247_v52 = vld [vmem:[%s6346_s23 + $0x20] sm:$0xff]  ;;  %v4064_v27 = vpack.c.bf16 %v2256_v49, %v2255_v47 }
 0x782   : > { %v2145_v55 = vrot.slane %v2058_v25, %v2098_v40  ;;  %v2067_v1 = vpop.xlane.xlu1 %2066  ;;  %v2172_v11 = vsel %vm2171_vm7, %v2137_v4, %v2170_v63  ;;  %v2254_v63 = vld [vmem:[%s6346_s23 + $0x58] sm:$0xff] }
 0x783   : > { %v2159_v9 = vrot.slane %v2067_v1, %v2093_v12  ;;  %v2258_v4 = vld [vmem:[%s6346_s23 + $0x78] sm:$0xff] }
 0x784   : > { %v2146_v2 = vsel %vm2100_vm3, %v2145_v55, %v2141_v60  ;;  %v4052_v55 = vpack.c.bf16 %v2248_v53, %v2247_v52 }
 0x785   : > { %v2064_v58 = vpop.xlane.xlu0 %2063  ;;  %v2174_v13 = vsel %vm2173_vm8, %v2146_v2, %v2172_v11 }
 0x786   : > { %v2154_v61 = vrot.slane %v2064_v58, %v2098_v40  ;;  %v2250_v58 = vld [vmem:[%s6346_s23 + $0x38] sm:$0xff] }
 0x787   : > { %v4055_v60 = vpack.c.bf16 %v2250_v58, %v2249_v57 }
 0x788   : > { %v2155_v5 = vsel %vm2100_vm3, %v2154_v61, %v2150_v0  ;;  %v4061_v0 = vpack.c.bf16 %v2254_v63, %v2253_v62 }
 0x789   : > { %v2070_v6 = vpop.xlane.xlu0 %2069  ;;  %v2176_v16 = vsel %vm2175_vm9, %v2155_v5, %v2174_v13  ;;  %v4067_v5 = vpack.c.bf16 %v2258_v4, %v2257_v3 }
 0x78a   : > { %v2163_v10 = vrot.slane %v2070_v6, %v2098_v40 }
 0x78c   : > { %v2164_v14 = vsel %vm2100_vm3, %v2163_v10, %v2159_v9 }
 0x78d   : > { %v2178_v17 = vsel %vm2177_vm10, %v2164_v14, %v2176_v16 }
 0x78e   : > { %v2180_v18 = vsel %vm2072_vm11, %v2178_v17, -1e+30 }
 0x78f   : > { %v2182_v21 = vsel %vm2181_vm12, %v2180_v18, -inf }
 0x790   : > { %2183 = vmax.xlane.f32.xlu1 %v2182_v21 }
 0x7a1   : > { %2882 = vrot.lane.b32.xlu1 %v3733_v22, %s5260_s3 }
 0x81d   : > { %v2184_v23 = vpop.xlane.xlu1 %2183 }
 0x81e   : > { %v2185_v24 = vsub.f32 %v2180_v18, %v2184_v23 }
 0x820   : > { %v2186_v26 = vmul.f32 1.442695, %v2185_v24 }
 0x821   : > { %v2883_v28 = vpop.permute.xlu1 %2882 }
 0x822   : > { %4432 = vpow2.f32 %v2186_v26  ;;  %v2885_v29 = vmul.f32 %v2883_v28, %v5913_v19 }
 0x824   : > { %2887 = vrot.lane.b32.xlu1 %v2885_v29, %s5259_s5 }
 0x82c   : > { %v4433_v30 = vpop.eup %4432 }
 0x82d   : > { %v2188_v32 = vsel %vm2181_vm12, %v4433_v30, 0.0 }
 0x82e   : > { %2189 = vadd.xlane.f32.xlu0 %v2188_v32 }
 0x844   : > { %2900 = vrot.lane.b32.xlu0 %v3734_v33, %s5259_s5  ;;  %s6347_s5 = sld [smem:[#allocation75_spill]] }
 0x84a   : > { %v2938_v9 = vld [vmem:[%s6347_s5] sm:$0xff]  ;;  %v2939_v10 = vld [vmem:[%s6347_s5 + $0x8] sm:$0xff]  ;;  %v2940_v14 = vld [vmem:[%s6347_s5 + $0x10] sm:$0xff] }
 0x84b   : > { %v4082_v11 = vpack.c.bf16 %v2939_v10, %v2938_v9  ;;  %v2941_v16 = vld [vmem:[%s6347_s5 + $0x18] sm:$0xff] }
 0x84c   : > { %v4085_v17 = vpack.c.bf16 %v2941_v16, %v2940_v14 }
 0x8bb   : > { %v2190_v19 = vpop.xlane.xlu0 %2189 }
 0x8bc   : > { %4434 = vrcp.f32 %v2190_v19 }
 0x8bf   : > { %v2901_v40 = vpop.permute.xlu0 %2900 }
 0x8c0   : > { %v2903_v12 = vmul.f32 %v2901_v40, %v5897_v7  ;;  %v4049_v7 = vpack.c.bf16 %v2246_v44, %v2245_v43  ;;  %v3732_v40 = vld [vmem:[#allocation30] ss:$0 sm:$0xff] }
 0x8c2   : > { %2905 = vrot.lane.b32.xlu1 %v2903_v12, %s5260_s3  ;;  %s6348_s3 = sld [smem:[#allocation76_spill]] }
 0x8c6   : > { %v4435_v41 = vpop.eup %4434 }
 0x8c7   : > { %v6004_v42 = vmul.f32 %v4435_v41, %v4433_v30 }
 0x8c8   : > { %v2942_v21 = vld [vmem:[%s6348_s3] sm:$0xff]  ;;  %v2943_v22 = vld [vmem:[%s6348_s3 + $0x8] sm:$0xff]  ;;  %v2944_v24 = vld [vmem:[%s6348_s3 + $0x10] sm:$0xff] }
 0x8c9   : > { %3128 = vst.msk [vmem:[#allocation41] sm:$0xff] %vm2181_vm12, %v6004_v42  ;;  %v2201_v45 = vrot.slane %v6004_v42, %v5929_v31  ;;  %v2194_v46 = vcombine.high %v6004_v42, %v6004_v42  ;;  %v4070_v23 = vpack.c.bf16 %v2943_v22, %v2942_v21  ;;  %v2945_v26 = vld [vmem:[%s6348_s3 + $0x18] sm:$0xff]  ;;  %v2946_v29 = vld [vmem:[%s6348_s3 + $0x20] sm:$0xff]  ;;  %v2947_v30 = vld [vmem:[%s6348_s3 + $0x28] sm:$0xff] }
 0x8ca   : > { %v4073_v28 = vpack.c.bf16 %v2945_v26, %v2944_v24  ;;  %v4076_v33 = vpack.c.bf16 %v2947_v30, %v2946_v29  ;;  %v2949_v35 = vld [vmem:[%s6348_s3 + $0x38] sm:$0xff] }
 0x8cb   : > { %v2217_v50 = vrot.slane %v2201_v45, %v5929_v31  ;;  %v2208_v25 = vrot.slane %v2194_v46, %v5929_v31  ;;  %v2209_v51 = vcombine.high %v2201_v45, %v2201_v45 }
 0x8cd   : > { %3914 = vmatmul.mubr.msk.f32.vlgmr.msra.gmra.mrb[4].mxu1 %vm2181_vm12, %v2217_v50  ;;  %v2224_v54 = vrot.slane %v2208_v25, %v5929_v31  ;;  %v2231_v56 = vrot.slane %v2209_v51, %v5929_v31  ;;  %v2239_v61 = vcombine.high %v2217_v50, %v2217_v50  ;;  %v2210_v2 = vcombine.high %v2208_v25, %v2208_v25 }
 0x8ce   : > { %4050 = vmatpush3.bf16.msra.mxu1 %v4049_v7  ;;  %3920 = vmatprep.mubr.msk.f32.mxu1 %vm5256_vm0, %v5257_v15 }
 0x8cf   : > { %3942 = vmatmul.mubr.msk.f32.vlgmr.msra.gmra.mrb[8].mxu0 %vm2181_vm12, %v2224_v54  ;;  %4051 = vmatprep.subr.bf16.mxu1 %v5255_v8  ;;  %v2240_v59 = vcombine.high %v2224_v54, %v2224_v54  ;;  %v2241_v1 = vcombine.high %v2231_v56, %v2231_v56  ;;  %v2238_v6 = vrot.slane %v2210_v2, %v5929_v31  ;;  %v2888_v31 = vpop.permute.xlu1 %2887 }
 0x8d0   : > { %4065 = vmatpush3.bf16.msra.mxu0 %v4064_v27  ;;  %3955 = vmatprep.mubr.msk.f32.mxu0 %vm5256_vm0, %v5257_v15  ;;  %v2890_v18 = vsel %vm1348_vm1, %v2888_v31, 0.0 }
 0x8d1   : > { %3921 = vmatmul.mubr.msk.f32.vlgmr.msra.gmra.mrb[6].mxu1 %vm2181_vm12, %v2231_v56  ;;  %4069 = vmatprep.subr.bf16.mxu0 %v5255_v8  ;;  %v2242_v13 = vcombine.high %v2238_v6, %v2238_v6 }
 0x8d2   : > { %4053 = vmatpush3.bf16.msra.mxu1 %v4052_v55  ;;  %3927 = vmatprep.mubr.msk.f32.mxu1 %vm5256_vm0, %v5257_v15 }
 0x8d3   : > { %3956 = vmatmul.mubr.msk.f32.vlgmr.msra.gmra.mrb[10].mxu0 %vm2181_vm12, %v2240_v59  ;;  %4054 = vmatprep.subr.bf16.mxu1 %v5255_v8 }
 0x8d4   : > { %3981 = vmatprep.mubr.msk.f32.mxu0 %vm5256_vm0, %v5257_v15  ;;  %4071 = vmatpush3.bf16.msra.mxu0 %v4070_v23 }
 0x8d5   : > { %3928 = vmatmul.mubr.msk.f32.vlgmr.msra.gmra.mrb[8].mxu1 %vm2181_vm12, %v2239_v61  ;;  %4072 = vmatprep.subr.bf16.mxu0 %v5255_v8 }
 0x8d6   : > { %4056 = vmatpush3.bf16.msra.mxu1 %v4055_v60  ;;  %3934 = vmatprep.mubr.msk.f32.mxu1 %vm5256_vm0, %v5257_v15 }
 0x8d7   : > { %4060 = vmatprep.subr.bf16.mxu1 %v5255_v8 }
 0x8d8   : > { %4074 = vmatpush3.bf16.msra.mxu0 %v4073_v28  ;;  %v3735_v28 = vld [vmem:[#allocation34] ss:$0 sm:$0xff] }
 0x8d9   : > { %3935 = vmatmul.mubr.msk.f32.vlgmr.msra.gmra.mrb[10].mxu1 %vm2181_vm12, %v2241_v1  ;;  %4075 = vmatprep.subr.bf16.mxu0 %v5255_v8 }
 0x8da   : > { %4062 = vmatpush3.bf16.msra.mxu1 %v4061_v0  ;;  %3948 = vmatprep.mubr.msk.f32.mxu1 %vm5256_vm0, %v5257_v15 }
 0x8db   : > { %4066 = vmatprep.subr.bf16.mxu1 %v5255_v8 }
 0x8dc   : > { %4077 = vmatpush3.bf16.msra.mxu0 %v4076_v33 }
 0x8dd   : > { %3949 = vmatmul.mubr.msk.f32.vlgmr.msra.gmra.mrb[12].mxu1 %vm2181_vm12, %v2238_v6  ;;  %4078 = vmatprep.subr.bf16.mxu0 %v5255_v8 }
 0x8de   : > { %4068 = vmatpush3.bf16.msra.mxu1 %v4067_v5  ;;  %3962 = vmatprep.mubr.msk.f32.mxu1 %vm5256_vm0, %v5257_v15 }
 0x8df   : > { %4081 = vmatprep.subr.bf16.mxu1 %v5255_v8 }
 0x8e1   : > { %3963 = vmatmul.mubr.msk.f32.vlgmr.msra.gmra.mrb[14].mxu1 %vm2181_vm12, %v2242_v13 }
 0x8e2   : > { %4083 = vmatpush3.bf16.msra.mxu1 %v4082_v11  ;;  %3992 = vmatprep.mubr.msk.f32.mxu1 %vm5256_vm0, %v5257_v15 }
 0x8e3   : > { %4084 = vmatprep.subr.bf16.mxu1 %v5255_v8 }
 0x8e6   : > { %4086 = vmatpush3.bf16.msra.mxu1 %v4085_v17  ;;  %2891 = vadd.xlane.f32.xlu1 %v2890_v18 }
 0x8e9   : > { %3993 = vmatmul.mubr.msk.f32.vlgmr.msra.gmra.mrb[16].mxu1 %vm1348_vm1, %v5917_v20  ;;  %v2948_v20 = vld [vmem:[%s6348_s3 + $0x30] sm:$0xff] }
 0x8ea   : > { %v4079_v37 = vpack.c.bf16 %v2949_v35, %v2948_v20  ;;  %v5262_v35 = vmov -1e+30  }
 0x8eb   : > { %3141 = vst.msk [vmem:[#allocation4] sm:$0xff] %vm3129_vm13, %v5262_v35 }
 0x8ec   : > { %4080 = vmatpush3.bf16.msra.mxu0 %v4079_v37  ;;  %v5263_v37 = vmov 0  }
 0x8ed   : > { %4390 = vset.pattern.permute.xlu1 %v5263_v37  ;;  %4391 = vset.pattern.permute.xlu0 %v5263_v37 }
 0x934   : > { %v2906_v32 = vpop.permute.xlu1 %2905 }
 0x935   : > { %v2908_v34 = vsel %vm1348_vm1, %v2906_v32, 0.0  ;;  %v2919_v32 = vmul.f32 %v3735_v28, %v5886_v48 }
 0x936   : > { %2909 = vadd.xlane.f32.xlu0 %v2908_v34 }
 0x937   : > { %v2920_v20 = vsel %vm1348_vm1, %v2919_v32, 0.0 }
 0x9a0   : > { %v2327_v38 = vpop.f32.mrb[4].mxu1 }
 0x9a1   : > { %v3915_v36 = vpop.f32.mrb[5].mxu1  ;;  %v2842_v46 = vmul.f32 %v3732_v40, %v2327_v38 }
 0x9a2   : > { %v2615_v39 = vpop.f32.mrb[8].mxu0  ;;  %v2892_v36 = vpop.xlane.xlu1 %2891 }
 0x9a3   : > { %v3943_v19 = vpop.f32.mrb[9].mxu0  ;;  %v2846_v54 = vmul.f32 %v3732_v40, %v2615_v39  ;;  %v2964_v60 = vrot.slane %v2615_v39, 4 }
 0x9a4   : > { %v2399_v12 = vpop.f32.mrb[6].mxu1 }
 0x9a5   : > { %v2843_v41 = vmul.f32 %v3732_v40, %v2399_v12  ;;  %v2958_v43 = vrot.slane %v2399_v12, 7  ;;  %v3922_v44 = vpop.f32.mrb[7].mxu1  ;;  %v2864_v63 = vrot.slane %v2846_v54, 4 }
 0x9a6   : > { %v2759_v45 = vpop.f32.mrb[10].mxu0 }
 0x9a7   : > { %v2858_v47 = vrot.slane %v2843_v41, 7  ;;  %v2959_v49 = vsel %vm2165_vm4, %v2958_v43, %v2327_v38  ;;  %v3957_v7 = vpop.f32.mrb[11].mxu0  ;;  %v2848_v0 = vmul.f32 %v3732_v40, %v2759_v45  ;;  %v2968_v9 = vrot.slane %v2759_v45, 2 }
 0x9a8   : > { %v2471_v50 = vpop.f32.mrb[8].mxu1  ;;  %v3740_v7 = vld [vmem:[%s6349_s1] ss:$0 sm:$0xff] }
 0x9a9   : > { %v2859_v25 = vsel %vm2165_vm4, %v2858_v47, %v2842_v46  ;;  %v2844_v8 = vmul.f32 %v3732_v40, %v2471_v50  ;;  %v2960_v51 = vrot.slane %v2471_v50, 6  ;;  %v3929_v52 = vpop.f32.mrb[9].mxu1  ;;  %v2868_v14 = vrot.slane %v2848_v0, 2 }
 0x9ab   : > { %v2860_v53 = vrot.slane %v2844_v8, 6  ;;  %v2961_v27 = vsel %vm2167_vm5, %v2960_v51, %v2959_v49 }
 0x9ac   : > { %v2543_v55 = vpop.f32.mrb[10].mxu1 }
 0x9ad   : > { %v2861_v56 = vsel %vm2167_vm5, %v2860_v53, %v2859_v25  ;;  %v2845_v57 = vmul.f32 %v3732_v40, %v2543_v55  ;;  %v2962_v58 = vrot.slane %v2543_v55, 5  ;;  %v3936_v59 = vpop.f32.mrb[11].mxu1 }
 0x9af   : > { %v2862_v61 = vrot.slane %v2845_v57, 5  ;;  %v2963_v62 = vsel %vm2169_vm6, %v2962_v58, %v2961_v27 }
 0x9b0   : > { %v2687_v1 = vpop.f32.mrb[12].mxu1  ;;  %v2965_v2 = vsel %vm2171_vm7, %v2964_v60, %v2963_v62 }
 0x9b1   : > { %v2863_v3 = vsel %vm2169_vm6, %v2862_v61, %v2861_v56  ;;  %v2847_v4 = vmul.f32 %v3732_v40, %v2687_v1  ;;  %v2966_v5 = vrot.slane %v2687_v1, 3  ;;  %v3950_v6 = vpop.f32.mrb[13].mxu1 }
 0x9b2   : > { %v2865_v10 = vsel %vm2171_vm7, %v2864_v63, %v2863_v3 }
 0x9b3   : > { %v2866_v11 = vrot.slane %v2847_v4, 3  ;;  %v2967_v13 = vsel %vm2173_vm8, %v2966_v5, %v2965_v2 }
 0x9b4   : > { %v2831_v16 = vpop.f32.mrb[14].mxu1  ;;  %v2969_v31 = vsel %vm2175_vm9, %v2968_v9, %v2967_v13 }
 0x9b5   : > { %v2849_v17 = vmul.f32 %v3732_v40, %v2831_v16  ;;  %v2970_v18 = vrot.slane %v2831_v16, 1  ;;  %v3964_v21 = vpop.f32.mrb[15].mxu1  ;;  %v2867_v22 = vsel %vm2173_vm8, %v2866_v11, %v2865_v10  ;;  %v3736_v40 = vld [vmem:[#allocation6] ss:$0 sm:$0xff] }
 0x9b6   : > { %v2869_v23 = vsel %vm2175_vm9, %v2868_v14, %v2867_v22 }
 0x9b7   : > { %v2870_v24 = vrot.slane %v2849_v17, 1  ;;  %v2971_v26 = vsel %vm2177_vm10, %v2970_v18, %v2969_v31 }
 0x9b8   : > { %3982 = vmatmul.mubr.msk.f32.vlgmr.msra.gmra.mrb[12].mxu0 %vm1422_vm2, %v2971_v26  ;;  %3127 = vst.msk [vmem:[#allocation40] sm:$0xff] %vm1422_vm2, %v2971_v26 }
 0x9b9   : > { %v2871_v29 = vsel %vm2177_vm10, %v2870_v24, %v2869_v23 }
 0x9ba   : > { %v2873_v30 = vsel %vm1422_vm2, %v2871_v29, 0.0 }
 0x9bb   : > { %2874 = vadd.xlane.f32.xlu0 %v2873_v30 }
 0x9bc   : > { %v3110_v33 = vpop.f32.mrb[16].mxu1 }
 0x9bd   : > { %v3994_v34 = vpop.f32.mrb[17].mxu1 }
 0x9bf   : > { %2921 = vadd.xlane.f32.xlu0 %v2920_v20 }
 0x9c3   : > { %v2910_v38 = vpop.xlane.xlu0 %2909 }
 0xa48   : > { %v2875_v48 = vpop.xlane.xlu0 %2874 }
 0xa49   : > { %v2893_v39 = vadd.f32 %v2892_v36, %v2875_v48 }
 0xa4b   : > { %v2911_v19 = vadd.f32 %v2910_v38, %v2893_v39 }
 0xa4c   : > { %v2922_v12 = vpop.xlane.xlu0 %2921 }
 0xa4d   : > { %v2923_v41 = vadd.f32 %v2922_v12, %v2911_v19 }
 0xa4f   : > { %v2931_v43 = vadd.f32 %v3736_v40, %v2923_v41 }
 0xa51   : > { %v3737_v44 = vmul.f32 -1.442695, %v2931_v43 }
 0xa53   : > { %4436 = vpow2.f32 %v3737_v44 }
 0xa5d   : > { %v4437_v45 = vpop.eup %4436 }
 0xa5e   : > { %v2935_v46 = vadd.f32 1.0, %v4437_v45 }
 0xa60   : > { %4438 = vrcp.f32 %v2935_v46 }
 0xa6a   : > { %v4439_v15 = vpop.eup %4438 }
 0xa6b   : > { %3130 = vst.msk [vmem:[%s5434_s22] sm:$0xff] %vm3129_vm13, %v4439_v15  ;;  %3140 = vst.msk [vmem:[#allocation3] sm:$0xff] %vm3129_vm13, %v4439_v15  ;;  %v3131_v47 = vsub.f32 1.0, %v4439_v15 }
 0xa6d   : > { %3134 = vperm.xlu1 %4390, %v3131_v47  }
 0xa8b   : > { %v3040_v49 = vpop.f32.mrb[12].mxu0 }
 0xa8c   : > { %v3111_v50 = vadd.f32 %v3110_v33, %v3040_v49  ;;  %v3983_v25 = vpop.f32.mrb[13].mxu0 }
 0xa8e   : > { %v3121_v8 = vadd.f32 %v3740_v7, %v3111_v50 }
 0xa90   : > { %3139 = vst.msk [vmem:[#allocation2] sm:$0xff] %vm1348_vm1, %v3121_v8 }
 0xaec   : > { %v3135_v51 = vpop.permute.xlu1 %3134 }
 0xaed   : > { %v3137_v52 = vmul.f32 %v3135_v51, %v6004_v42 }
 0xaef   : > { %3138 = vst.msk [vmem:[#allocation43] sm:$0xff] %vm2181_vm12, %v3137_v52 }
 0xaf0 PF: > { %s6350_s2 = sld [smem:[#allocation78_spill]]  ;;  %v4441_v53 = vld [vmem:[%s5847_s7] sm:$0xff]   ;;  %v5264_v27 = vmov 0.0   ;;  %v4442_v54 = vld [vmem:[%s5847_s7 + $0x8] sm:$0xff]   ;;  %vm5265_vm14 = vmmov 0   ;;  %vm3168_vm15 = vcmask 261120  }
 0xaf1   : > { %3995 = vmatprep.subr.bf16.mxu0 %v5264_v27  ;;  %3999 = vmatprep.mubr.msk.bf16.mxu0 %vm5265_vm14, %v5264_v27  ;;  %v3147_v55 = vld [vmem:[#allocation2] sm:$0xff]  ;;  %v5266_v62 = vmov 0   ;;  %v3213_v63 = vld [vmem:[#allocation4] sm:$0xff]  ;;  %vm3233_vm0 = vcmask 7168   ;;  %p3745_p13 = scmp.ne.s32.totalorder %s5472_s18, 2 }
 0xaf2   : > { %3996 = vmatpush3.bf16.msra.mxu0 %v4441_v53  ;;  %v3148_v56 = vpack.c.bf16 %v3147_v55, %v3147_v55  ;;  %4440 = vset.pattern.permute.xlu0 %v5266_v62  ;;  %v3245_v17 = vld [vmem:[#allocation3] sm:$0xff] (!%p3745_p13) }
 0xaf3   : > { %3997 = vmatprep.subr.bf16.mxu0 %v5264_v27 }
 0xaf6   : > { %3998 = vmatpush3.bf16.msra.mxu0 %v4442_v54  ;;  %s6351_s1 = scalar_lea.vmem %s6350_s2, %s5843_s26 }
 0xaf7   : > { %v3741_v42 = vld [vmem:[%s6351_s1] ss:$0 sm:$0xff]  ;;  %v3217_v11 = vld [vmem:[#allocation5] sm:$0xff] }
 0xaf9   : > { %4000 = vmatmul.mubr.msk.bf16.vlgmr.msra.gmra.mrb[0].mxu0 %vm3168_vm15, %v3148_v56 }
 0xbcc   : > { %v3206_v57 = vpop.f32.mrb[0].mxu0 }
 0xbcd   : > { %v3207_v58 = vadd.f32 %v3741_v42, %v3206_v57  ;;  %v4001_v59 = vpop.f32.mrb[1].mxu0 }
 0xbce   : > { %v3209_v60 = vpop.f32.mrb[2].mxu0 }
 0xbcf   : > { %3212 = vst [vmem:[%s5849_s9] sm:$0xff] %v3207_v58  ;;  %3214 = vmax.xlane.f32.xlu0 %v3207_v58  ;;  %v4002_v61 = vpop.f32.mrb[3].mxu0 }
 0xc5c   : > { %v3215_v0 = vpop.xlane.xlu0 %3214 }
 0xc5d   : > { %v3216_v1 = vmax.f32 %v3213_v63, %v3215_v0 }
 0xc5f   : > { %v3218_v2 = vsub.f32 %v3213_v63, %v3216_v1  ;;  %3235 = vst.msk [vmem:[#allocation4] sm:$0xff] %vm3233_vm0, %v3216_v1  ;;  %3224 = vperm.xlu0 %4440, %v3216_v1  }
 0xc61   : > { %v3219_v9 = vmul.f32 1.442695, %v3218_v2 }
 0xc66   : > { %v3240_v21 = vld [vmem:[#allocation4] sm:$0xff] (!%p3745_p13) }
 0xcde   : > { %v3225_v3 = vpop.permute.xlu0 %3224 }
 0xcdf   : > { %v3227_v4 = vsub.f32 %v3207_v58, %v3225_v3 }
 0xce1   : > { %v3228_v5 = vmul.f32 1.442695, %v3227_v4 }
 0xce3   : > { %4443 = vpow2.f32 %v3228_v5 }
 0xce4   : > { %4445 = vpow2.f32 %v3219_v9 }
 0xced   : > { %v4444_v6 = vpop.eup %4443 }
 0xcee   : > { %3230 = vadd.xlane.f32.xlu1 %v4444_v6  ;;  %v4446_v10 = vpop.eup %4445 }
 0xcef   : > { %v3221_v13 = vmul.f32 %v4446_v10, %v3217_v11 }
 0xd78   : > { %3239 = sbr.rel (%p3745_p13) target bundleno = 3480 (0xd98), region = 249 }
 0xd7b   : > { %v3231_v14 = vpop.xlane.xlu1 %3230 }
 0xd7c   : > { %v3232_v16 = vadd.f32 %v3231_v14, %v3221_v13 }
 0xd7e   : > { %3234 = vst.msk [vmem:[#allocation5] sm:$0xff] %vm3233_vm0, %v3232_v16 }
 0xd85   : > { %v3241_v31 = vld [vmem:[#allocation5] sm:$0xff] }
 0xd86   : > { %4447 = vlog2.f32 %v3241_v31 }
 0xd87   : > { %4449 = vlog2.f32 %v3245_v17 }
 0xd90   : > { %v4448_v18 = vpop.eup %4447 }
 0xd91   : > { %v4450_v22 = vpop.eup %4449  ;;  %v3243_v23 = vmul.f32 0.6931472, %v4448_v18 }
 0xd92   : > { %v3247_v24 = vmul.f32 0.6931472, %v4450_v22 }
 0xd93   : > { %v3244_v26 = vadd.f32 %v3243_v23, %v3240_v21 }
 0xd95   : > { %v3248_v28 = vsub.f32 %v3244_v26, %v3247_v24 }
 0xd97   : > { %3249 = vst.msk [vmem:[%s5449_s16] sm:$0xff] %vm3233_vm0, %v3248_v28 }
 0xd98 PF: > { %s5267_s2 = smov [#allocation38]   ;;  %s5268_s7 = smov [#allocation41]  }
 0xd99   : > { %s3273_s26 = sshll.u32 %s5267_s2, 4  ;;  %s3295_s1 = sshll.u32 %s5268_s7, 4  ;;  %s3274_s26 = int_to_ptr.vmem [resolvable:$true] %s3273_s26  ;;  %s6119_s1 = int_to_ptr.vmem [resolvable:$true] %s3295_s1 }
 0xd9a   : > { %s4955_s3 = scalar_lea.vmem %s3274_s26, 128  ;;  %p6352_p0 = scmp.eq.s32.totalorder %s5472_s18, 2 }
 0xd9b   : > { %p4956_p9 = scmp.ne.s32.totalorder %s3274_s26, %s4955_s3  ;;  %p4962_p1 = scmp.lt.s32.totalorder %s3274_s26, %s3274_s26 }
 0xd9c   : > { %p4963_p4 = scmp.lt.s32.totalorder %s4955_s3, %s4955_s3 }
 0xd9d   : > { %p4957_p2 = pnand %p4956_p9, %p6352_p0 }
 0xd9e   : > { %p4964_p8 = por %p4963_p4, %p4962_p1 }
 0xd9f   : > { %p4958_p7 = pneg %p4957_p2 }
 0xda1   : > { %p4965_p3 = pnand %p4964_p8, %p4958_p7 }
 0xda3   : > { %4968 = shalt.err (!%p4965_p3)
}
 0xda4   : > { %s6353_s5 = sld [smem:[#allocation80_spill]]  ;;  %p6354_p5 = pmov %p6352_p0 }
 0xdaa   : > { %s4969_s2 = scalar_lea.hbm %s6353_s5, 128 }
 0xdab   : > { %p4970_p10 = scmp.ne.s32.totalorder %s6353_s5, %s4969_s2  ;;  %p4975_p12 = scmp.lt.u32.totalorder %s4969_s2, %s6353_s5 }
 0xdad   : > { %p4971_p6 = pnand %p4970_p10, %p6354_p5 }
 0xdaf   : > { %p4972_p11 = pneg %p4971_p6 }
 0xdb1   : > { %p4977_p13 = pnand %p4975_p12, %p4972_p11 }
 0xdb3   : > { %4980 = shalt.err (!%p4977_p13)
}
 0xdb4   : > { %p6355_p9 = pmov %p6352_p0  ;;  %s4981_s3 = scalar_lea.vmem %s6119_s1, 128 }
 0xdb5   : > { %p4982_p0 = scmp.ne.s32.totalorder %s6119_s1, %s4981_s3  ;;  %p6356_p2 = pmov %p6354_p5 }
 0xdb6   : > { %4162 = dma.vmem_to_hbm [thread:$0]  (%p6355_p9), %s3274_s26, 128, %s6353_s5, [#allocation39]  }
 0xdb7   : > { %p4983_p7 = pnand %p4982_p0, %p6356_p2  ;;  %p4988_p4 = scmp.lt.s32.totalorder %s6119_s1, %s6119_s1 }
 0xdb8   : > { %p4989_p8 = scmp.lt.s32.totalorder %s4981_s3, %s4981_s3 }
 0xdb9   : > { %p4984_p1 = pneg %p4983_p7 }
 0xdba   : > { %p4990_p3 = por %p4989_p8, %p4988_p4 }
 0xdbc   : > { %p4991_p10 = pnand %p4990_p3, %p4984_p1 }
 0xdbe   : > { %4994 = shalt.err (!%p4991_p10)
}
 0xdbf   : > { %s6357_s7 = sld [smem:[#allocation82_spill]]  ;;  %p6358_p6 = pmov %p6356_p2 }
 0xdc5   : > { %s4995_s2 = scalar_lea.hbm %s6357_s7, 128 }
 0xdc6   : > { %p4996_p5 = scmp.ne.s32.totalorder %s6357_s7, %s4995_s2  ;;  %p5001_p13 = scmp.lt.u32.totalorder %s4995_s2, %s6357_s7 }
 0xdc8   : > { %p4997_p11 = pnand %p4996_p5, %p6358_p6 }
 0xdca   : > { %p4998_p12 = pneg %p4997_p11 }
 0xdcc   : > { %p5003_p9 = pnand %p5001_p13, %p4998_p12 }
 0xdce   : > { %5006 = shalt.err (!%p5003_p9)
}
 0xdcf   : > { %p6359_p0 = pmov %p6356_p2  ;;  %s5269_s26 = smov [#allocation37]  }
 0xdd0   : > { %s3262_s3 = sshll.u32 %s5269_s26, 4  ;;  %s5270_s5 = smov [#allocation40]   ;;  %s3263_s3 = int_to_ptr.vmem [resolvable:$true] %s3262_s3 }
 0xdd1   : > { %4166 = dma.vmem_to_hbm [thread:$0]  (%p6359_p0), %s6119_s1, 128, %s6357_s7, [#allocation42]  }
 0xdd2   : > { %s3284_s8 = sshll.u32 %s5270_s5, 4  ;;  %s5007_s11 = scalar_lea.vmem %s3263_s3, 128  ;;  %s6146_s8 = int_to_ptr.vmem [resolvable:$true] %s3284_s8 }
 0xdd3   : > { %p5008_p2 = scmp.ne.s32.totalorder %s3263_s3, %s5007_s11  ;;  %p6360_p7 = pmov %p6359_p0 }
 0xdd4   : > { %p5014_p8 = scmp.lt.s32.totalorder %s3263_s3, %s3263_s3  ;;  %p5015_p3 = scmp.lt.s32.totalorder %s5007_s11, %s5007_s11 }
 0xdd5   : > { %p5009_p1 = pnand %p5008_p2, %p6360_p7 }
 0xdd6   : > { %p5016_p10 = por %p5015_p3, %p5014_p8 }
 0xdd7   : > { %p5010_p4 = pneg %p5009_p1 }
 0xdd9   : > { %p5017_p5 = pnand %p5016_p10, %p5010_p4 }
 0xddb   : > { %5020 = shalt.err (!%p5017_p5)
}
 0xddc   : > { %s6361_s2 = sld [smem:[#allocation79_spill]]  ;;  %p6362_p11 = pmov %p6359_p0 }
 0xde2   : > { %s5021_s1 = scalar_lea.hbm %s6361_s2, 128 }
 0xde3   : > { %p5022_p6 = scmp.ne.s32.totalorder %s6361_s2, %s5021_s1  ;;  %p5027_p9 = scmp.lt.u32.totalorder %s5021_s1, %s6361_s2 }
 0xde5   : > { %p5023_p12 = pnand %p5022_p6, %p6362_p11 }
 0xde7   : > { %p5024_p13 = pneg %p5023_p12 }
 0xde9   : > { %p5029_p0 = pnand %p5027_p9, %p5024_p13 }
 0xdeb   : > { %5032 = shalt.err (!%p5029_p0)
}
 0xdec   : > { %p6363_p2 = pmov %p6360_p7  ;;  %s5033_s11 = scalar_lea.vmem %s6146_s8, 128 }
 0xded   : > { %p5034_p7 = scmp.ne.s32.totalorder %s6146_s8, %s5033_s11  ;;  %p5040_p3 = scmp.lt.s32.totalorder %s6146_s8, %s6146_s8 }
 0xdee   : > { %4160 = dma.vmem_to_hbm [thread:$0]  (%p6363_p2), %s3263_s3, 128, %s6361_s2, [#allocation9]  }
 0xdef   : > { %p6364_p1 = pmov %p6363_p2  ;;  %p5041_p10 = scmp.lt.s32.totalorder %s5033_s11, %s5033_s11 }
 0xdf1   : > { %p5035_p4 = pnand %p5034_p7, %p6364_p1  ;;  %p5042_p5 = por %p5041_p10, %p5040_p3 }
 0xdf3   : > { %p5036_p8 = pneg %p5035_p4 }
 0xdf5   : > { %p5043_p6 = pnand %p5042_p5, %p5036_p8 }
 0xdf7   : > { %5046 = shalt.err (!%p5043_p6)
}
 0xdf8   : > { %s6365_s5 = sld [smem:[#allocation81_spill]]  ;;  %p6366_p12 = pmov %p6364_p1 }
 0xdfe   : > { %s5047_s26 = scalar_lea.hbm %s6365_s5, 128 }
 0xdff   : > { %p5048_p11 = scmp.ne.s32.totalorder %s6365_s5, %s5047_s26  ;;  %p5053_p0 = scmp.lt.u32.totalorder %s5047_s26, %s6365_s5 }
 0xe01   : > { %p5049_p13 = pnand %p5048_p11, %p6366_p12 }
 0xe03   : > { %p5050_p9 = pneg %p5049_p13 }
 0xe05   : > { %p5055_p2 = pnand %p5053_p0, %p5050_p9 }
 0xe07   : > { %5058 = shalt.err (!%p5055_p2)
}
 0xe08   : > { %p6367_p7 = pmov %p6364_p1  ;;  %s5271_s3 = smov [#allocation43]  }
 0xe09   : > { %s3309_s1 = sshll.u32 %s5271_s3, 4  ;;  %s3752_s11 = sshll.u32 %s5472_s18, 7  ;;  %s3310_s1 = int_to_ptr.vmem [resolvable:$true] %s3309_s1 }
 0xe0a   : > { %4164 = dma.vmem_to_hbm [thread:$0]  (%p6367_p7), %s6146_s8, 128, %s6365_s5, [#allocation39]  }
 0xe0b   : > { %s6175_s2 = scalar_lea.hbm %s5444_s10, %s3752_s11  ;;  %s5059_s7 = scalar_lea.vmem %s3310_s1, 128 }
 0xe0c   : > { %p5060_p1 = scmp.ne.s32.totalorder %s3310_s1, %s5059_s7  ;;  %p6368_p4 = pmov %p6367_p7 }
 0xe0d   : > { %p5066_p10 = scmp.lt.s32.totalorder %s3310_s1, %s3310_s1  ;;  %p5067_p5 = scmp.lt.s32.totalorder %s5059_s7, %s5059_s7 }
 0xe0e   : > { %p5061_p8 = pnand %p5060_p1, %p6368_p4 }
 0xe0f   : > { %p5068_p6 = por %p5067_p5, %p5066_p10 }
 0xe10   : > { %p5062_p3 = pneg %p5061_p8 }
 0xe12   : > { %p5069_p11 = pnand %p5068_p6, %p5062_p3 }
 0xe14   : > { %5072 = shalt.err (!%p5069_p11)
}
 0xe15   : > { %s6369_s26 = sld [smem:[#allocation83_spill]]  ;;  %p6370_p13 = pmov %p6368_p4 }
 0xe1b   : > { %s5073_s8 = scalar_lea.hbm %s6369_s26, 128 }
 0xe1c   : > { %p5074_p12 = scmp.ne.s32.totalorder %s6369_s26, %s5073_s8  ;;  %p5079_p2 = scmp.lt.u32.totalorder %s5073_s8, %s6369_s26 }
 0xe1e   : > { %p5075_p9 = pnand %p5074_p12, %p6370_p13 }
 0xe20   : > { %p5076_p0 = pneg %p5075_p9 }
 0xe22   : > { %p5081_p7 = pnand %p5079_p2, %p5076_p0 }
 0xe24   : > { %5084 = shalt.err (!%p5081_p7)
}
 0xe25   : > { %p6371_p1 = pmov %p6368_p4  ;;  %s6372_s7 = sld [smem:[#allocation87_spill]] }
 0xe26   : > { %s3322_s3 = sshll.u32 %s5849_s9, 4  ;;  %s3251_s11 = scalar_lea.sflag [#allocation45], %s5837_s6  ;;  %s3323_s3 = int_to_ptr.vmem [resolvable:$true] %s3322_s3 }
 0xe27   : > { %4168 = dma.vmem_to_hbm [thread:$0]  (%p6371_p1), %s3310_s1, 128, %s6369_s26, [#allocation42]  }
 0xe28   : > { %s5085_s5 = scalar_lea.vmem %s3323_s3, 128  ;;  %s5272_s12 = smov [#allocation44]  }
 0xe29   : > { %p5086_p4 = scmp.ne.s32.totalorder %s3323_s3, %s5085_s5  ;;  %s5089_s13 = sshll.u32 %s5272_s12, 4  ;;  %s5090_s13 = int_to_ptr.vmem [resolvable:$false] %s5089_s13 }
 0xe2a   : > { %s5091_s8 = scalar_lea.vmem %s5090_s13, 256  ;;  %p5092_p5 = scmp.lt.s32.totalorder %s3323_s3, %s5090_s13 }
 0xe2b   : > { %p6373_p8 = scmp.ne.s32.totalorder %s6372_s7, 0  ;;  %p5093_p6 = scmp.lt.s32.totalorder %s5091_s8, %s5085_s5 }
 0xe2d   : > { %p5087_p3 = pnand %p5086_p4, %p6373_p8  ;;  %p5094_p11 = por %p5093_p6, %p5092_p5 }
 0xe2f   : > { %p5088_p10 = pneg %p5087_p3 }
 0xe31   : > { %p5095_p12 = pnand %p5094_p11, %p5088_p10 }
 0xe33   : > { %5098 = shalt.err (!%p5095_p12)
}
 0xe34   : > { %s5099_s6 = scalar_lea.hbm %s6175_s2, 128  ;;  %s5103_s12 = scalar_lea.hbm %s5444_s10, 384 }
 0xe35   : > { %p5100_p13 = scmp.ne.s32.totalorder %s6175_s2, %s5099_s6  ;;  %p5104_p2 = scmp.lt.u32.totalorder %s6175_s2, %s5444_s10 }
 0xe36   : > { %p5105_p7 = scmp.lt.u32.totalorder %s5103_s12, %s5099_s6  ;;  %p5107_p4 = scmp.lt.u32.totalorder %s5099_s6, %s6175_s2 }
 0xe37   : > { %p5101_p9 = pnand %p5100_p13, %p6373_p8 }
 0xe38   : > { %p5106_p1 = por %p5105_p7, %p5104_p2 }
 0xe39   : > { %p5102_p0 = pneg %p5101_p9 }
 0xe3a   : > { %p5108_p3 = por %p5107_p4, %p5106_p1 }
 0xe3c   : > { %p5109_p10 = pnand %p5108_p3, %p5102_p0 }
 0xe3e   : > { %5112 = shalt.err (!%p5109_p10)
}
 0xe3f   : > { %4169 = dma.vmem_to_hbm [thread:$0]  (%p6373_p8), %s3323_s3, 128, %s6175_s2, %s3251_s11  }
 0xe40   : > { %p6374_p5 = scmp.eq.s32.totalorder %s5472_s18, 2 }
 0xe42   : > { %5170 = dma.done.wait (%p6374_p5), [#allocation9], 128   ;;  %p6375_p6 = pmov %p6374_p5 }
 0xe43   : > { %p6376_p11 = pmov %p6374_p5 }
 0xe44   : > { %5172 = vsyncadd (%p6375_p6), [#allocation9], 4294967168 }
 0xe45   : > { %5174 = dma.done.wait (%p6376_p11), [#allocation39], 256   ;;  %p6377_p12 = pmov %p6374_p5 }
 0xe46   : > { %p6378_p13 = pmov %p6374_p5 }
 0xe47   : > { %5176 = vsyncadd (%p6377_p12), [#allocation39], 4294967040 }
 0xe48   : > { %5178 = dma.done.wait (%p6378_p13), [#allocation42], 256   ;;  %p6379_p9 = pmov %p6374_p5 }
 0xe4a   : > { %5180 = vsyncadd (%p6379_p9), [#allocation42], 4294967040 }
 0xe4b PF: > { %s6380_s13 = sld [smem:[#allocation84_spill]]  ;;  %s6381_s9 = sld [smem:[#allocation88_spill]] }
 0xe4c   : > { %p4286_p8 = scmp.ge.s32.totalorder %s5199_s15, 2 }
 0xe51   : > { %s3363_s2 = sand.u32 1, %s6380_s13   ;;  %p6382_p0 = scmp.ne.s32.totalorder %s6381_s9, 0 }
 0xe52   : > { %s3364_s5 = scalar_lea.sflag [#allocation45], %s3363_s2 }
 0xe53   : > { %p4237_p2 = pnand %p4286_p8, %p6382_p0 }
 0xe55   : > { %5182 = dma.done.wait (!%p4237_p2), %s3364_s5, 128  }
 0xe56   : > { %5184 = vsyncadd (!%p4237_p2), %s3364_s5, 4294967168  ;;  %s6383_s15 = sld [smem:[#allocation85_spill]]  ;;  %s6384_s1 = sld [smem:[#allocation86_spill]] }
 0xe57   : > { %s6385_s6 = smov %s5191_s4  ;;  %s6386_s4 = smov %s5195_s0 }
 0xe5c   : > { %p95_p7 = scmp.ge.s32.totalorder %s6383_s15, 5   ;;  %s6387_s0 = smov %s6384_s1 }
 0xe5e   :  { %97 = sbr.rel (!%p95_p7) target bundleno = 78 (0x4e), region = 384 }
 0xe65   :  { %3369 = vsyncpa [#allocation8], 1 }
 0xe66   :  { %3371 = vsyncpa [#allocation8 + $0x1], 1 }
 0xe67   :  { %3372 = vsyncpa [#allocation11], 1 }
 0xe68   :  { %3373 = vsyncpa [#allocation14], 1 }
 0xe69   :  { %3374 = vsyncpa [#allocation17], 1 }
 0xe6a   :  { %3375 = vsyncpa [#allocation20], 1 }
 0xe6b   :  { %3376 = vsyncpa [#allocation23], 1 }
 0xe6c   :  { %3377 = vsyncpa [#allocation26], 1 }
 0xe6d   :  { %3378 = vsyncpa [#allocation29], 1 }
 0xe6e   :  { %3379 = vsyncpa [#allocation32], 1 }
 0xe6f   :  { %3380 = vsyncpa [#allocation35], 1 }
 0xe70   :  { %3381 = vsyncpa [#allocation9], 1 }
 0xe71   :  { %3383 = vsyncpa [#allocation9 + $0x1], 1 }
 0xe72   :  { %3384 = vsyncpa [#allocation39], 1 }
 0xe73   :  { %3385 = vsyncpa [#allocation42], 1 }
 0xe74   :  { %3386 = vsyncpa [#allocation45], 1 }
 0xe75   :  { %3388 = vsyncpa [#allocation45 + $0x1], 1 }

</bundles_post_ra>
